<compile_context>
chip_gen: v6e
topology: v6e:2x2x1
jax: 0.10.0
libtpu: 0.0.40
codegen_flags: <defaults>
</compile_context>

<pallas_src>
import jax
import jax.numpy as jnp
from jax.experimental import pallas as pl
from jax.experimental.pallas import tpu as pltpu

# ----------------------------- problem sizes -----------------------------
BATCH = 2
INPUT_SIZE = 4
HIDDEN = 32          # hidden_size; reshape(-1, H*H) forces seq_len == HIDDEN
SEQ_LEN = HIDDEN
N_HID = 32
OUTPUT_SIZE = 8
B_PAD = 8            # f32 sublane tile


# ----------------------------- fused LSTM + MLP kernel -----------------------------
def _fused_kernel(x_ref, wih_ref, whh_ref, b_ref,
                  w1_ref, b1_ref, w2_ref, b2_ref, w3_ref, b3_ref,
                  o_ref, xp_ref, acc_ref):
    # x_ref:   (T*B_PAD, I) f32   time-major, batch padded to 8 (row t*8 + b)
    # wih_ref: (I, 4H)      f32   W_ih^T
    # whh_ref: (H, 4H)      bf16  W_hh^T (MXU operand)
    # b_ref:   (1, 4H)      f32   b_ih + b_hh
    # w1/w2/w3: (in, out)   bf16  MLP weights pre-transposed; b1/b2/b3 (1, out) f32
    # o_ref:   (B, out)     f32
    # xp_ref:  (T*B_PAD, 4H) f32  VMEM scratch: hoisted input projection
    # acc_ref: (B_PAD, T*H) f32   VMEM scratch: lane-dense LSTM outputs
    Bp, TH = acc_ref.shape
    H = whh_ref.shape[0]
    H4 = 4 * H
    T = TH // H
    Bout = o_ref.shape[0]

    whh = whh_ref[...]                                        # loop-invariant bf16

    # Hoisted input projection for ALL timesteps: one MXU matmul instead of T.
    # (One-time, off the serial critical path -> kept in f32; cost negligible.)
    xp_ref[...] = (jnp.dot(x_ref[...], wih_ref[...],
                           preferred_element_type=jnp.float32)
                   + b_ref[...])                              # (T*Bp, 4H)

    # Hoisted gate-blend constants (PyTorch gate order i, f, g, o).  g lanes get
    # tanh, the rest sigmoid via sigmoid(x) = 0.5*tanh(x/2) + 0.5, so each step
    # issues a SINGLE full-width tanh instead of tanh + sigmoid (exp + recip).
    lane = jax.lax.broadcasted_iota(jnp.int32, (Bp, H4), 1)
    is_g = jnp.logical_and(lane >= 2 * H, lane < 3 * H)
    scale = jnp.where(is_g, 1.0, 0.5).astype(jnp.float32)     # (Bp, 4H)
    shift = jnp.where(is_g, 0.0, 0.5).astype(jnp.float32)

    h_bf = jnp.zeros((Bp, H), jnp.bfloat16)                   # MXU operand
    c = jnp.zeros((Bp, H), jnp.float32)

    # T is small and static: full unroll, every slice/store offset is static
    # and sublane-aligned (Bp == 8).
    for t in range(T):
        gates = xp_ref[t * Bp:(t + 1) * Bp, :] + jnp.dot(
            h_bf, whh, preferred_element_type=jnp.float32)    # (Bp, 4H) f32
        act = jnp.tanh(gates * scale) * scale + shift         # sigmoid/tanh blend
        i_g = act[:, 0 * H:1 * H]
        f_g = act[:, 1 * H:2 * H]
        g_g = act[:, 2 * H:3 * H]
        o_g = act[:, 3 * H:4 * H]
        c = f_g * c + i_g * g_g
        h = o_g * jnp.tanh(c)                                 # f32
        h_bf = h.astype(jnp.bfloat16)                         # operand for step t+1
        # Off-critical-path store into the lane-dense accumulator; this is the
        # exact (B, T*H) layout output.reshape(-1, H*H) needs.
        acc_ref[:, t * H:(t + 1) * H] = h

    # Fused 3-layer MLP on the flattened LSTM outputs (bf16 MXU, f32 accum,
    # f32 elementwise).
    flat = acc_ref[...].astype(jnp.bfloat16)                  # (Bp, T*H)
    h1 = jnp.dot(flat, w1_ref[...],
                 preferred_element_type=jnp.float32) + b1_ref[...]
    h1 = jnp.maximum(h1, 0.0)
    h2 = jnp.dot(h1.astype(jnp.bfloat16), w2_ref[...],
                 preferred_element_type=jnp.float32) + b2_ref[...]
    h2 = jnp.maximum(h2, 0.0)
    out = jnp.dot(h2.astype(jnp.bfloat16), w3_ref[...],
                  preferred_element_type=jnp.float32) + b3_ref[...]
    o_ref[...] = out[:Bout, :]                                # drop ghost rows


# ----------------------------- full forward -----------------------------
def lstm_module_forward(x, kp):
    """x: (B, input_size, seq_len) — the layout the PyTorch module receives.

    `kp` are the init-time-prepared kernel params (pre-transposed, bias
    pre-summed, MXU weights pre-cast to bf16) so the per-call wrapper is just
    one tiny fused transpose+pad of x plus the pallas_call.
    """
    B, I, T = x.shape
    H = kp["whh_t"].shape[0]
    out_dim = kp["w3_t"].shape[1]

    # time-major + pad batch to the f32 sublane tile (fuses into one XLA op).
    xt = jnp.transpose(x.astype(jnp.float32), (2, 0, 1))      # (T, B, I)
    xt = jnp.pad(xt, ((0, 0), (0, B_PAD - B), (0, 0)))        # (T, 8, I)
    x2d = xt.reshape(T * B_PAD, I)                            # (T*8, I)

    vmem = pl.BlockSpec(memory_space=pltpu.MemorySpace.VMEM)
    return pl.pallas_call(
        _fused_kernel,
        out_shape=jax.ShapeDtypeStruct((B, out_dim), jnp.float32),
        in_specs=[vmem] * 10,
        out_specs=vmem,
        scratch_shapes=[pltpu.VMEM((T * B_PAD, 4 * H), jnp.float32),  # x_proj
                        pltpu.VMEM((B_PAD, T * H), jnp.float32)],     # lstm outs
        cost_estimate=pl.CostEstimate(flops=3_100_000,
                                      transcendentals=41_000,
                                      bytes_accessed=400_000),
    )(x2d,
      kp["wih_t"], kp["whh_t"], kp["bias"],
      kp["w1_t"], kp["b1"], kp["w2_t"], kp["b2"], kp["w3_t"], kp["b3"])


# ----------------------------- init-time param preparation -----------------------------
def prepare_kernel_params(p):
    """One-time layout/dtype prep: everything the old wrapper did per call."""
    f32, bf16 = jnp.float32, jnp.bfloat16
    return {
        "wih_t": p["w_ih"].T.astype(f32),                      # (I, 4H)
        "whh_t": p["w_hh"].T.astype(bf16),                     # (H, 4H)
        "bias": (p["b_ih"] + p["b_hh"]).reshape(1, -1).astype(f32),
        "w1_t": p["w1"].T.astype(bf16),                        # (H*H, n_hid)
        "b1": p["b1"].reshape(1, -1).astype(f32),
        "w2_t": p["w2"].T.astype(bf16),
        "b2": p["b2"].reshape(1, -1).astype(f32),
        "w3_t": p["w3"].T.astype(bf16),
        "b3": p["b3"].reshape(1, -1).astype(f32),
    }


# ----------------------------- pure-JAX reference (f32) -----------------------------
def reference_forward(x, params):
    H = HIDDEN
    x = jnp.transpose(x, (0, 2, 1)).astype(jnp.float32)       # (B, T, I)
    B = x.shape[0]

    def step(carry, x_t):
        h, c = carry
        gates = (x_t @ params["w_ih"].T + params["b_ih"]
                 + h @ params["w_hh"].T + params["b_hh"])
        i_g, f_g, g_g, o_g = jnp.split(gates, 4, axis=-1)
        i_g = jax.nn.sigmoid(i_g)
        f_g = jax.nn.sigmoid(f_g)
        g_g = jnp.tanh(g_g)
        o_g = jax.nn.sigmoid(o_g)
        c = f_g * c + i_g * g_g
        h = o_g * jnp.tanh(c)
        return (h, c), h

    h0 = jnp.zeros((B, H), jnp.float32)
    c0 = jnp.zeros((B, H), jnp.float32)
    _, ys = jax.lax.scan(step, (h0, c0), jnp.transpose(x, (1, 0, 2)))
    out = jnp.transpose(ys, (1, 0, 2)).reshape(-1, H * H)

    h1 = jnp.maximum(out @ params["w1"].T + params["b1"], 0.0)
    h2 = jnp.maximum(h1 @ params["w2"].T + params["b2"], 0.0)
    return h2 @ params["w3"].T + params["b3"]


# ----------------------------- param init (PyTorch layouts, f32) -----------------------------
def init_params(key):
    H, I = HIDDEN, INPUT_SIZE
    ks = jax.random.split(key, 12)

    def u(k, shape, fan):
        bound = 1.0 / jnp.sqrt(fan)
        return jax.random.uniform(k, shape, jnp.float32, -bound, bound)

    return {
        # nn.LSTM layer 0 (PyTorch shapes)
        "w_ih": u(ks[0], (4 * H, I), H),
        "w_hh": u(ks[1], (4 * H, H), H),
        "b_ih": u(ks[2], (4 * H,), H),
        "b_hh": u(ks[3], (4 * H,), H),
        # MLP (PyTorch Linear: weight (out, in))
        "w1": u(ks[4], (N_HID, H * H), H * H),
        "b1": u(ks[5], (N_HID,), H * H),
        "w2": u(ks[6], (N_HID, N_HID), N_HID),
        "b2": u(ks[7], (N_HID,), N_HID),
        "w3": u(ks[8], (OUTPUT_SIZE, N_HID), N_HID),
        "b3": u(ks[9], (OUTPUT_SIZE,), N_HID),
    }


if __name__ == "__main__":
    key = jax.random.PRNGKey(0)
    pkey, xkey = jax.random.split(key)
    params = init_params(pkey)
    kparams = prepare_kernel_params(params)   # one-time, outside the jitted path

    # x: (B, input_size, seq_len), seq_len == hidden_size as the reshape requires.
    x = jax.random.normal(xkey, (BATCH, INPUT_SIZE, SEQ_LEN), jnp.float32)

    fwd = jax.jit(lstm_module_forward)
    out = jax.block_until_ready(fwd(x, kparams))

    ref = jax.block_until_ready(reference_forward(x, params))
    assert out.shape == (BATCH, OUTPUT_SIZE), out.shape
    # bf16 MXU operands (f32 accumulation) per the perf review -> tolerance is
    # slightly looser than the pure-f32 version's 1e-3.
    assert jnp.allclose(out, ref, rtol=2e-2, atol=2e-2), (
        f"max abs err {jnp.max(jnp.abs(out - ref))}")

    print("KERNEL_OK")
</pallas_src>

<mosaic_0001>
module attributes {stable_mosaic.version = 11 : i64} {
  func.func @_fused_kernel(%arg0: memref<256x4xf32, #tpu.memory_space<vmem>>, %arg1: memref<4x128xf32, #tpu.memory_space<vmem>>, %arg2: memref<32x128xbf16, #tpu.memory_space<vmem>>, %arg3: memref<1x128xf32, #tpu.memory_space<vmem>>, %arg4: memref<1024x32xbf16, #tpu.memory_space<vmem>>, %arg5: memref<1x32xf32, #tpu.memory_space<vmem>>, %arg6: memref<32x32xbf16, #tpu.memory_space<vmem>>, %arg7: memref<1x32xf32, #tpu.memory_space<vmem>>, %arg8: memref<32x8xbf16, #tpu.memory_space<vmem>>, %arg9: memref<1x8xf32, #tpu.memory_space<vmem>>, %arg10: memref<2x8xf32, #tpu.memory_space<vmem>>, %arg11: memref<256x128xf32, #tpu.memory_space<vmem>>, %arg12: memref<8x1024xf32, #tpu.memory_space<vmem>>) attributes {dimension_semantics = [], scalar_prefetch = 0 : i64, scratch_operands = 2 : i64, tpu.core_type = #tpu.core_type<tc>} {
    %c0 = arith.constant 0 : index
    %c0_0 = arith.constant 0 : index
    %0 = vector.load %arg2[%c0, %c0_0] : memref<32x128xbf16, #tpu.memory_space<vmem>>, vector<32x128xbf16>
    %c0_1 = arith.constant 0 : index
    %c0_2 = arith.constant 0 : index
    %1 = vector.load %arg0[%c0_1, %c0_2] : memref<256x4xf32, #tpu.memory_space<vmem>>, vector<256x4xf32>
    %c0_3 = arith.constant 0 : index
    %c0_4 = arith.constant 0 : index
    %2 = vector.load %arg1[%c0_3, %c0_4] : memref<4x128xf32, #tpu.memory_space<vmem>>, vector<4x128xf32>
    %cst = arith.constant dense<0.000000e+00> : vector<256x128xf32>
    %3 = tpu.matmul %1, %2, %cst {dimension_numbers = #tpu.dot_dimension_numbers<[1], [0], [0], [1], [0, 0, 1, 1], [], []>} : vector<256x4xf32>, vector<4x128xf32>, vector<256x128xf32> -> vector<256x128xf32>
    %c0_5 = arith.constant 0 : index
    %c0_6 = arith.constant 0 : index
    %4 = vector.load %arg3[%c0_5, %c0_6] : memref<1x128xf32, #tpu.memory_space<vmem>>, vector<1x128xf32>
    %5 = vector.broadcast %4 : vector<1x128xf32> to vector<256x128xf32>
    %6 = arith.addf %3, %5 : vector<256x128xf32>
    %c0_7 = arith.constant 0 : index
    %c0_8 = arith.constant 0 : index
    %7 = vector.load %arg11[%c0_7, %c0_8] : memref<256x128xf32, #tpu.memory_space<vmem>>, vector<256x128xf32>
    tpu.vector_store %arg11[%c0_7, %c0_8], %6 {strides = array<i32>} : memref<256x128xf32, #tpu.memory_space<vmem>>, vector<256x128xf32>,
    %8 = tpu.iota {dimensions = array<i32: 1>} : vector<8x128xi32>
    %c64_i32 = arith.constant 64 : i32
    %9 = vector.broadcast %c64_i32 : i32 to vector<8x128xi32>
    %10 = arith.cmpi sge, %8, %9 : vector<8x128xi32>
    %c96_i32 = arith.constant 96 : i32
    %11 = vector.broadcast %c96_i32 : i32 to vector<8x128xi32>
    %12 = arith.cmpi slt, %8, %11 : vector<8x128xi32>
    %13 = arith.andi %10, %12 : vector<8x128xi1>
    %cst_9 = arith.constant 1.000000e+00 : f32
    %cst_10 = arith.constant 5.000000e-01 : f32
    %14 = vector.broadcast %cst_9 : f32 to vector<8x128xf32>
    %15 = vector.broadcast %cst_10 : f32 to vector<8x128xf32>
    %16 = arith.select %13, %14, %15 : vector<8x128xi1>, vector<8x128xf32>
    %cst_11 = arith.constant 0.000000e+00 : f32
    %cst_12 = arith.constant 5.000000e-01 : f32
    %17 = vector.broadcast %cst_11 : f32 to vector<8x128xf32>
    %18 = vector.broadcast %cst_12 : f32 to vector<8x128xf32>
    %19 = arith.select %13, %17, %18 : vector<8x128xi1>, vector<8x128xf32>
    %cst_13 = arith.constant 0.000000e+00 : bf16
    %20 = vector.broadcast %cst_13 : bf16 to vector<8x32xbf16>
    %cst_14 = arith.constant 0.000000e+00 : f32
    %21 = vector.broadcast %cst_14 : f32 to vector<8x32xf32>
    %c0_15 = arith.constant 0 : index
    %c0_16 = arith.constant 0 : index
    %22 = vector.load %arg11[%c0_15, %c0_16] : memref<256x128xf32, #tpu.memory_space<vmem>>, vector<8x128xf32>
    %cst_17 = arith.constant dense<0.000000e+00> : vector<8x128xf32>
    %23 = tpu.matmul %20, %0, %cst_17 {dimension_numbers = #tpu.dot_dimension_numbers<[1], [0], [0], [1], [0, 0, 1, 1], [], []>} : vector<8x32xbf16>, vector<32x128xbf16>, vector<8x128xf32> -> vector<8x128xf32>
    %24 = arith.addf %22, %23 : vector<8x128xf32>
    %25 = arith.mulf %24, %16 : vector<8x128xf32>
    %26 = math.tanh %25 : vector<8x128xf32>
    %27 = arith.mulf %26, %16 : vector<8x128xf32>
    %28 = arith.addf %27, %19 : vector<8x128xf32>
    %29 = vector.extract_strided_slice %28 {offsets = [0, 0], sizes = [8, 32], strides = [1, 1]} : vector<8x128xf32> to vector<8x32xf32>
    %30 = vector.extract_strided_slice %28 {offsets = [0, 32], sizes = [8, 32], strides = [1, 1]} : vector<8x128xf32> to vector<8x32xf32>
    %31 = vector.extract_strided_slice %28 {offsets = [0, 64], sizes = [8, 32], strides = [1, 1]} : vector<8x128xf32> to vector<8x32xf32>
    %32 = vector.extract_strided_slice %28 {offsets = [0, 96], sizes = [8, 32], strides = [1, 1]} : vector<8x128xf32> to vector<8x32xf32>
    %33 = arith.mulf %30, %21 : vector<8x32xf32>
    %34 = arith.mulf %29, %31 : vector<8x32xf32>
    %35 = arith.addf %33, %34 : vector<8x32xf32>
    %36 = math.tanh %35 : vector<8x32xf32>
    %37 = arith.mulf %32, %36 : vector<8x32xf32>
    %38 = arith.truncf %37 : vector<8x32xf32> to vector<8x32xbf16>
    %c0_18 = arith.constant 0 : index
    %c0_19 = arith.constant 0 : index
    %39 = vector.load %arg12[%c0_18, %c0_19] : memref<8x1024xf32, #tpu.memory_space<vmem>>, vector<8x32xf32>
    tpu.vector_store %arg12[%c0_18, %c0_19], %37 {strides = array<i32>} : memref<8x1024xf32, #tpu.memory_space<vmem>>, vector<8x32xf32>,
    %c8 = arith.constant 8 : index
    %c0_20 = arith.constant 0 : index
    %40 = vector.load %arg11[%c8, %c0_20] : memref<256x128xf32, #tpu.memory_space<vmem>>, vector<8x128xf32>
    %cst_21 = arith.constant dense<0.000000e+00> : vector<8x128xf32>
    %41 = tpu.matmul %38, %0, %cst_21 {dimension_numbers = #tpu.dot_dimension_numbers<[1], [0], [0], [1], [0, 0, 1, 1], [], []>} : vector<8x32xbf16>, vector<32x128xbf16>, vector<8x128xf32> -> vector<8x128xf32>
    %42 = arith.addf %40, %41 : vector<8x128xf32>
    %43 = arith.mulf %42, %16 : vector<8x128xf32>
    %44 = math.tanh %43 : vector<8x128xf32>
    %45 = arith.mulf %44, %16 : vector<8x128xf32>
    %46 = arith.addf %45, %19 : vector<8x128xf32>
    %47 = vector.extract_strided_slice %46 {offsets = [0, 0], sizes = [8, 32], strides = [1, 1]} : vector<8x128xf32> to vector<8x32xf32>
    %48 = vector.extract_strided_slice %46 {offsets = [0, 32], sizes = [8, 32], strides = [1, 1]} : vector<8x128xf32> to vector<8x32xf32>
    %49 = vector.extract_strided_slice %46 {offsets = [0, 64], sizes = [8, 32], strides = [1, 1]} : vector<8x128xf32> to vector<8x32xf32>
    %50 = vector.extract_strided_slice %46 {offsets = [0, 96], sizes = [8, 32], strides = [1, 1]} : vector<8x128xf32> to vector<8x32xf32>
    %51 = arith.mulf %48, %35 : vector<8x32xf32>
    %52 = arith.mulf %47, %49 : vector<8x32xf32>
    %53 = arith.addf %51, %52 : vector<8x32xf32>
    %54 = math.tanh %53 : vector<8x32xf32>
    %55 = arith.mulf %50, %54 : vector<8x32xf32>
    %56 = arith.truncf %55 : vector<8x32xf32> to vector<8x32xbf16>
    %c0_22 = arith.constant 0 : index
    %c32 = arith.constant 32 : index
    %57 = vector.load %arg12[%c0_22, %c32] : memref<8x1024xf32, #tpu.memory_space<vmem>>, vector<8x32xf32>
    tpu.vector_store %arg12[%c0_22, %c32], %55 {strides = array<i32>} : memref<8x1024xf32, #tpu.memory_space<vmem>>, vector<8x32xf32>,
    %c16 = arith.constant 16 : index
    %c0_23 = arith.constant 0 : index
    %58 = vector.load %arg11[%c16, %c0_23] : memref<256x128xf32, #tpu.memory_space<vmem>>, vector<8x128xf32>
    %cst_24 = arith.constant dense<0.000000e+00> : vector<8x128xf32>
    %59 = tpu.matmul %56, %0, %cst_24 {dimension_numbers = #tpu.dot_dimension_numbers<[1], [0], [0], [1], [0, 0, 1, 1], [], []>} : vector<8x32xbf16>, vector<32x128xbf16>, vector<8x128xf32> -> vector<8x128xf32>
    %60 = arith.addf %58, %59 : vector<8x128xf32>
    %61 = arith.mulf %60, %16 : vector<8x128xf32>
    %62 = math.tanh %61 : vector<8x128xf32>
    %63 = arith.mulf %62, %16 : vector<8x128xf32>
    %64 = arith.addf %63, %19 : vector<8x128xf32>
    %65 = vector.extract_strided_slice %64 {offsets = [0, 0], sizes = [8, 32], strides = [1, 1]} : vector<8x128xf32> to vector<8x32xf32>
    %66 = vector.extract_strided_slice %64 {offsets = [0, 32], sizes = [8, 32], strides = [1, 1]} : vector<8x128xf32> to vector<8x32xf32>
    %67 = vector.extract_strided_slice %64 {offsets = [0, 64], sizes = [8, 32], strides = [1, 1]} : vector<8x128xf32> to vector<8x32xf32>
    %68 = vector.extract_strided_slice %64 {offsets = [0, 96], sizes = [8, 32], strides = [1, 1]} : vector<8x128xf32> to vector<8x32xf32>
    %69 = arith.mulf %66, %53 : vector<8x32xf32>
    %70 = arith.mulf %65, %67 : vector<8x32xf32>
    %71 = arith.addf %69, %70 : vector<8x32xf32>
    %72 = math.tanh %71 : vector<8x32xf32>
    %73 = arith.mulf %68, %72 : vector<8x32xf32>
    %74 = arith.truncf %73 : vector<8x32xf32> to vector<8x32xbf16>
    %c0_25 = arith.constant 0 : index
    %c64 = arith.constant 64 : index
    %75 = vector.load %arg12[%c0_25, %c64] : memref<8x1024xf32, #tpu.memory_space<vmem>>, vector<8x32xf32>
    tpu.vector_store %arg12[%c0_25, %c64], %73 {strides = array<i32>} : memref<8x1024xf32, #tpu.memory_space<vmem>>, vector<8x32xf32>,
    %c24 = arith.constant 24 : index
    %c0_26 = arith.constant 0 : index
    %76 = vector.load %arg11[%c24, %c0_26] : memref<256x128xf32, #tpu.memory_space<vmem>>, vector<8x128xf32>
    %cst_27 = arith.constant dense<0.000000e+00> : vector<8x128xf32>
    %77 = tpu.matmul %74, %0, %cst_27 {dimension_numbers = #tpu.dot_dimension_numbers<[1], [0], [0], [1], [0, 0, 1, 1], [], []>} : vector<8x32xbf16>, vector<32x128xbf16>, vector<8x128xf32> -> vector<8x128xf32>
    %78 = arith.addf %76, %77 : vector<8x128xf32>
    %79 = arith.mulf %78, %16 : vector<8x128xf32>
    %80 = math.tanh %79 : vector<8x128xf32>
    %81 = arith.mulf %80, %16 : vector<8x128xf32>
    %82 = arith.addf %81, %19 : vector<8x128xf32>
    %83 = vector.extract_strided_slice %82 {offsets = [0, 0], sizes = [8, 32], strides = [1, 1]} : vector<8x128xf32> to vector<8x32xf32>
    %84 = vector.extract_strided_slice %82 {offsets = [0, 32], sizes = [8, 32], strides = [1, 1]} : vector<8x128xf32> to vector<8x32xf32>
    %85 = vector.extract_strided_slice %82 {offsets = [0, 64], sizes = [8, 32], strides = [1, 1]} : vector<8x128xf32> to vector<8x32xf32>
    %86 = vector.extract_strided_slice %82 {offsets = [0, 96], sizes = [8, 32], strides = [1, 1]} : vector<8x128xf32> to vector<8x32xf32>
    %87 = arith.mulf %84, %71 : vector<8x32xf32>
    %88 = arith.mulf %83, %85 : vector<8x32xf32>
    %89 = arith.addf %87, %88 : vector<8x32xf32>
    %90 = math.tanh %89 : vector<8x32xf32>
    %91 = arith.mulf %86, %90 : vector<8x32xf32>
    %92 = arith.truncf %91 : vector<8x32xf32> to vector<8x32xbf16>
    %c0_28 = arith.constant 0 : index
    %c96 = arith.constant 96 : index
    %93 = vector.load %arg12[%c0_28, %c96] : memref<8x1024xf32, #tpu.memory_space<vmem>>, vector<8x32xf32>
    tpu.vector_store %arg12[%c0_28, %c96], %91 {strides = array<i32>} : memref<8x1024xf32, #tpu.memory_space<vmem>>, vector<8x32xf32>,
    %c32_29 = arith.constant 32 : index
    %c0_30 = arith.constant 0 : index
    %94 = vector.load %arg11[%c32_29, %c0_30] : memref<256x128xf32, #tpu.memory_space<vmem>>, vector<8x128xf32>
    %cst_31 = arith.constant dense<0.000000e+00> : vector<8x128xf32>
    %95 = tpu.matmul %92, %0, %cst_31 {dimension_numbers = #tpu.dot_dimension_numbers<[1], [0], [0], [1], [0, 0, 1, 1], [], []>} : vector<8x32xbf16>, vector<32x128xbf16>, vector<8x128xf32> -> vector<8x128xf32>
    %96 = arith.addf %94, %95 : vector<8x128xf32>
    %97 = arith.mulf %96, %16 : vector<8x128xf32>
    %98 = math.tanh %97 : vector<8x128xf32>
    %99 = arith.mulf %98, %16 : vector<8x128xf32>
    %100 = arith.addf %99, %19 : vector<8x128xf32>
    %101 = vector.extract_strided_slice %100 {offsets = [0, 0], sizes = [8, 32], strides = [1, 1]} : vector<8x128xf32> to vector<8x32xf32>
    %102 = vector.extract_strided_slice %100 {offsets = [0, 32], sizes = [8, 32], strides = [1, 1]} : vector<8x128xf32> to vector<8x32xf32>
    %103 = vector.extract_strided_slice %100 {offsets = [0, 64], sizes = [8, 32], strides = [1, 1]} : vector<8x128xf32> to vector<8x32xf32>
    %104 = vector.extract_strided_slice %100 {offsets = [0, 96], sizes = [8, 32], strides = [1, 1]} : vector<8x128xf32> to vector<8x32xf32>
    %105 = arith.mulf %102, %89 : vector<8x32xf32>
    %106 = arith.mulf %101, %103 : vector<8x32xf32>
    %107 = arith.addf %105, %106 : vector<8x32xf32>
    %108 = math.tanh %107 : vector<8x32xf32>
    %109 = arith.mulf %104, %108 : vector<8x32xf32>
    %110 = arith.truncf %109 : vector<8x32xf32> to vector<8x32xbf16>
    %c0_32 = arith.constant 0 : index
    %c128 = arith.constant 128 : index
    %111 = vector.load %arg12[%c0_32, %c128] : memref<8x1024xf32, #tpu.memory_space<vmem>>, vector<8x32xf32>
    tpu.vector_store %arg12[%c0_32, %c128], %109 {strides = array<i32>} : memref<8x1024xf32, #tpu.memory_space<vmem>>, vector<8x32xf32>,
    %c40 = arith.constant 40 : index
    %c0_33 = arith.constant 0 : index
    %112 = vector.load %arg11[%c40, %c0_33] : memref<256x128xf32, #tpu.memory_space<vmem>>, vector<8x128xf32>
    %cst_34 = arith.constant dense<0.000000e+00> : vector<8x128xf32>
    %113 = tpu.matmul %110, %0, %cst_34 {dimension_numbers = #tpu.dot_dimension_numbers<[1], [0], [0], [1], [0, 0, 1, 1], [], []>} : vector<8x32xbf16>, vector<32x128xbf16>, vector<8x128xf32> -> vector<8x128xf32>
    %114 = arith.addf %112, %113 : vector<8x128xf32>
    %115 = arith.mulf %114, %16 : vector<8x128xf32>
    %116 = math.tanh %115 : vector<8x128xf32>
    %117 = arith.mulf %116, %16 : vector<8x128xf32>
    %118 = arith.addf %117, %19 : vector<8x128xf32>
    %119 = vector.extract_strided_slice %118 {offsets = [0, 0], sizes = [8, 32], strides = [1, 1]} : vector<8x128xf32> to vector<8x32xf32>
    %120 = vector.extract_strided_slice %118 {offsets = [0, 32], sizes = [8, 32], strides = [1, 1]} : vector<8x128xf32> to vector<8x32xf32>
    %121 = vector.extract_strided_slice %118 {offsets = [0, 64], sizes = [8, 32], strides = [1, 1]} : vector<8x128xf32> to vector<8x32xf32>
    %122 = vector.extract_strided_slice %118 {offsets = [0, 96], sizes = [8, 32], strides = [1, 1]} : vector<8x128xf32> to vector<8x32xf32>
    %123 = arith.mulf %120, %107 : vector<8x32xf32>
    %124 = arith.mulf %119, %121 : vector<8x32xf32>
    %125 = arith.addf %123, %124 : vector<8x32xf32>
    %126 = math.tanh %125 : vector<8x32xf32>
    %127 = arith.mulf %122, %126 : vector<8x32xf32>
    %128 = arith.truncf %127 : vector<8x32xf32> to vector<8x32xbf16>
    %c0_35 = arith.constant 0 : index
    %c160 = arith.constant 160 : index
    %129 = vector.load %arg12[%c0_35, %c160] : memref<8x1024xf32, #tpu.memory_space<vmem>>, vector<8x32xf32>
    tpu.vector_store %arg12[%c0_35, %c160], %127 {strides = array<i32>} : memref<8x1024xf32, #tpu.memory_space<vmem>>, vector<8x32xf32>,
    %c48 = arith.constant 48 : index
    %c0_36 = arith.constant 0 : index
    %130 = vector.load %arg11[%c48, %c0_36] : memref<256x128xf32, #tpu.memory_space<vmem>>, vector<8x128xf32>
    %cst_37 = arith.constant dense<0.000000e+00> : vector<8x128xf32>
    %131 = tpu.matmul %128, %0, %cst_37 {dimension_numbers = #tpu.dot_dimension_numbers<[1], [0], [0], [1], [0, 0, 1, 1], [], []>} : vector<8x32xbf16>, vector<32x128xbf16>, vector<8x128xf32> -> vector<8x128xf32>
    %132 = arith.addf %130, %131 : vector<8x128xf32>
    %133 = arith.mulf %132, %16 : vector<8x128xf32>
    %134 = math.tanh %133 : vector<8x128xf32>
    %135 = arith.mulf %134, %16 : vector<8x128xf32>
    %136 = arith.addf %135, %19 : vector<8x128xf32>
    %137 = vector.extract_strided_slice %136 {offsets = [0, 0], sizes = [8, 32], strides = [1, 1]} : vector<8x128xf32> to vector<8x32xf32>
    %138 = vector.extract_strided_slice %136 {offsets = [0, 32], sizes = [8, 32], strides = [1, 1]} : vector<8x128xf32> to vector<8x32xf32>
    %139 = vector.extract_strided_slice %136 {offsets = [0, 64], sizes = [8, 32], strides = [1, 1]} : vector<8x128xf32> to vector<8x32xf32>
    %140 = vector.extract_strided_slice %136 {offsets = [0, 96], sizes = [8, 32], strides = [1, 1]} : vector<8x128xf32> to vector<8x32xf32>
    %141 = arith.mulf %138, %125 : vector<8x32xf32>
    %142 = arith.mulf %137, %139 : vector<8x32xf32>
    %143 = arith.addf %141, %142 : vector<8x32xf32>
    %144 = math.tanh %143 : vector<8x32xf32>
    %145 = arith.mulf %140, %144 : vector<8x32xf32>
    %146 = arith.truncf %145 : vector<8x32xf32> to vector<8x32xbf16>
    %c0_38 = arith.constant 0 : index
    %c192 = arith.constant 192 : index
    %147 = vector.load %arg12[%c0_38, %c192] : memref<8x1024xf32, #tpu.memory_space<vmem>>, vector<8x32xf32>
    tpu.vector_store %arg12[%c0_38, %c192], %145 {strides = array<i32>} : memref<8x1024xf32, #tpu.memory_space<vmem>>, vector<8x32xf32>,
    %c56 = arith.constant 56 : index
    %c0_39 = arith.constant 0 : index
    %148 = vector.load %arg11[%c56, %c0_39] : memref<256x128xf32, #tpu.memory_space<vmem>>, vector<8x128xf32>
    %cst_40 = arith.constant dense<0.000000e+00> : vector<8x128xf32>
    %149 = tpu.matmul %146, %0, %cst_40 {dimension_numbers = #tpu.dot_dimension_numbers<[1], [0], [0], [1], [0, 0, 1, 1], [], []>} : vector<8x32xbf16>, vector<32x128xbf16>, vector<8x128xf32> -> vector<8x128xf32>
    %150 = arith.addf %148, %149 : vector<8x128xf32>
    %151 = arith.mulf %150, %16 : vector<8x128xf32>
    %152 = math.tanh %151 : vector<8x128xf32>
    %153 = arith.mulf %152, %16 : vector<8x128xf32>
    %154 = arith.addf %153, %19 : vector<8x128xf32>
    %155 = vector.extract_strided_slice %154 {offsets = [0, 0], sizes = [8, 32], strides = [1, 1]} : vector<8x128xf32> to vector<8x32xf32>
    %156 = vector.extract_strided_slice %154 {offsets = [0, 32], sizes = [8, 32], strides = [1, 1]} : vector<8x128xf32> to vector<8x32xf32>
    %157 = vector.extract_strided_slice %154 {offsets = [0, 64], sizes = [8, 32], strides = [1, 1]} : vector<8x128xf32> to vector<8x32xf32>
    %158 = vector.extract_strided_slice %154 {offsets = [0, 96], sizes = [8, 32], strides = [1, 1]} : vector<8x128xf32> to vector<8x32xf32>
    %159 = arith.mulf %156, %143 : vector<8x32xf32>
    %160 = arith.mulf %155, %157 : vector<8x32xf32>
    %161 = arith.addf %159, %160 : vector<8x32xf32>
    %162 = math.tanh %161 : vector<8x32xf32>
    %163 = arith.mulf %158, %162 : vector<8x32xf32>
    %164 = arith.truncf %163 : vector<8x32xf32> to vector<8x32xbf16>
    %c0_41 = arith.constant 0 : index
    %c224 = arith.constant 224 : index
    %165 = vector.load %arg12[%c0_41, %c224] : memref<8x1024xf32, #tpu.memory_space<vmem>>, vector<8x32xf32>
    tpu.vector_store %arg12[%c0_41, %c224], %163 {strides = array<i32>} : memref<8x1024xf32, #tpu.memory_space<vmem>>, vector<8x32xf32>,
    %c64_42 = arith.constant 64 : index
    %c0_43 = arith.constant 0 : index
    %166 = vector.load %arg11[%c64_42, %c0_43] : memref<256x128xf32, #tpu.memory_space<vmem>>, vector<8x128xf32>
    %cst_44 = arith.constant dense<0.000000e+00> : vector<8x128xf32>
    %167 = tpu.matmul %164, %0, %cst_44 {dimension_numbers = #tpu.dot_dimension_numbers<[1], [0], [0], [1], [0, 0, 1, 1], [], []>} : vector<8x32xbf16>, vector<32x128xbf16>, vector<8x128xf32> -> vector<8x128xf32>
    %168 = arith.addf %166, %167 : vector<8x128xf32>
    %169 = arith.mulf %168, %16 : vector<8x128xf32>
    %170 = math.tanh %169 : vector<8x128xf32>
    %171 = arith.mulf %170, %16 : vector<8x128xf32>
    %172 = arith.addf %171, %19 : vector<8x128xf32>
    %173 = vector.extract_strided_slice %172 {offsets = [0, 0], sizes = [8, 32], strides = [1, 1]} : vector<8x128xf32> to vector<8x32xf32>
    %174 = vector.extract_strided_slice %172 {offsets = [0, 32], sizes = [8, 32], strides = [1, 1]} : vector<8x128xf32> to vector<8x32xf32>
    %175 = vector.extract_strided_slice %172 {offsets = [0, 64], sizes = [8, 32], strides = [1, 1]} : vector<8x128xf32> to vector<8x32xf32>
    %176 = vector.extract_strided_slice %172 {offsets = [0, 96], sizes = [8, 32], strides = [1, 1]} : vector<8x128xf32> to vector<8x32xf32>
    %177 = arith.mulf %174, %161 : vector<8x32xf32>
    %178 = arith.mulf %173, %175 : vector<8x32xf32>
    %179 = arith.addf %177, %178 : vector<8x32xf32>
    %180 = math.tanh %179 : vector<8x32xf32>
    %181 = arith.mulf %176, %180 : vector<8x32xf32>
    %182 = arith.truncf %181 : vector<8x32xf32> to vector<8x32xbf16>
    %c0_45 = arith.constant 0 : index
    %c256 = arith.constant 256 : index
    %183 = vector.load %arg12[%c0_45, %c256] : memref<8x1024xf32, #tpu.memory_space<vmem>>, vector<8x32xf32>
    tpu.vector_store %arg12[%c0_45, %c256], %181 {strides = array<i32>} : memref<8x1024xf32, #tpu.memory_space<vmem>>, vector<8x32xf32>,
    %c72 = arith.constant 72 : index
    %c0_46 = arith.constant 0 : index
    %184 = vector.load %arg11[%c72, %c0_46] : memref<256x128xf32, #tpu.memory_space<vmem>>, vector<8x128xf32>
    %cst_47 = arith.constant dense<0.000000e+00> : vector<8x128xf32>
    %185 = tpu.matmul %182, %0, %cst_47 {dimension_numbers = #tpu.dot_dimension_numbers<[1], [0], [0], [1], [0, 0, 1, 1], [], []>} : vector<8x32xbf16>, vector<32x128xbf16>, vector<8x128xf32> -> vector<8x128xf32>
    %186 = arith.addf %184, %185 : vector<8x128xf32>
    %187 = arith.mulf %186, %16 : vector<8x128xf32>
    %188 = math.tanh %187 : vector<8x128xf32>
    %189 = arith.mulf %188, %16 : vector<8x128xf32>
    %190 = arith.addf %189, %19 : vector<8x128xf32>
    %191 = vector.extract_strided_slice %190 {offsets = [0, 0], sizes = [8, 32], strides = [1, 1]} : vector<8x128xf32> to vector<8x32xf32>
    %192 = vector.extract_strided_slice %190 {offsets = [0, 32], sizes = [8, 32], strides = [1, 1]} : vector<8x128xf32> to vector<8x32xf32>
    %193 = vector.extract_strided_slice %190 {offsets = [0, 64], sizes = [8, 32], strides = [1, 1]} : vector<8x128xf32> to vector<8x32xf32>
    %194 = vector.extract_strided_slice %190 {offsets = [0, 96], sizes = [8, 32], strides = [1, 1]} : vector<8x128xf32> to vector<8x32xf32>
    %195 = arith.mulf %192, %179 : vector<8x32xf32>
    %196 = arith.mulf %191, %193 : vector<8x32xf32>
    %197 = arith.addf %195, %196 : vector<8x32xf32>
    %198 = math.tanh %197 : vector<8x32xf32>
    %199 = arith.mulf %194, %198 : vector<8x32xf32>
    %200 = arith.truncf %199 : vector<8x32xf32> to vector<8x32xbf16>
    %c0_48 = arith.constant 0 : index
    %c288 = arith.constant 288 : index
    %201 = vector.load %arg12[%c0_48, %c288] : memref<8x1024xf32, #tpu.memory_space<vmem>>, vector<8x32xf32>
    tpu.vector_store %arg12[%c0_48, %c288], %199 {strides = array<i32>} : memref<8x1024xf32, #tpu.memory_space<vmem>>, vector<8x32xf32>,
    %c80 = arith.constant 80 : index
    %c0_49 = arith.constant 0 : index
    %202 = vector.load %arg11[%c80, %c0_49] : memref<256x128xf32, #tpu.memory_space<vmem>>, vector<8x128xf32>
    %cst_50 = arith.constant dense<0.000000e+00> : vector<8x128xf32>
    %203 = tpu.matmul %200, %0, %cst_50 {dimension_numbers = #tpu.dot_dimension_numbers<[1], [0], [0], [1], [0, 0, 1, 1], [], []>} : vector<8x32xbf16>, vector<32x128xbf16>, vector<8x128xf32> -> vector<8x128xf32>
    %204 = arith.addf %202, %203 : vector<8x128xf32>
    %205 = arith.mulf %204, %16 : vector<8x128xf32>
    %206 = math.tanh %205 : vector<8x128xf32>
    %207 = arith.mulf %206, %16 : vector<8x128xf32>
    %208 = arith.addf %207, %19 : vector<8x128xf32>
    %209 = vector.extract_strided_slice %208 {offsets = [0, 0], sizes = [8, 32], strides = [1, 1]} : vector<8x128xf32> to vector<8x32xf32>
    %210 = vector.extract_strided_slice %208 {offsets = [0, 32], sizes = [8, 32], strides = [1, 1]} : vector<8x128xf32> to vector<8x32xf32>
    %211 = vector.extract_strided_slice %208 {offsets = [0, 64], sizes = [8, 32], strides = [1, 1]} : vector<8x128xf32> to vector<8x32xf32>
    %212 = vector.extract_strided_slice %208 {offsets = [0, 96], sizes = [8, 32], strides = [1, 1]} : vector<8x128xf32> to vector<8x32xf32>
    %213 = arith.mulf %210, %197 : vector<8x32xf32>
    %214 = arith.mulf %209, %211 : vector<8x32xf32>
    %215 = arith.addf %213, %214 : vector<8x32xf32>
    %216 = math.tanh %215 : vector<8x32xf32>
    %217 = arith.mulf %212, %216 : vector<8x32xf32>
    %218 = arith.truncf %217 : vector<8x32xf32> to vector<8x32xbf16>
    %c0_51 = arith.constant 0 : index
    %c320 = arith.constant 320 : index
    %219 = vector.load %arg12[%c0_51, %c320] : memref<8x1024xf32, #tpu.memory_space<vmem>>, vector<8x32xf32>
    tpu.vector_store %arg12[%c0_51, %c320], %217 {strides = array<i32>} : memref<8x1024xf32, #tpu.memory_space<vmem>>, vector<8x32xf32>,
    %c88 = arith.constant 88 : index
    %c0_52 = arith.constant 0 : index
    %220 = vector.load %arg11[%c88, %c0_52] : memref<256x128xf32, #tpu.memory_space<vmem>>, vector<8x128xf32>
    %cst_53 = arith.constant dense<0.000000e+00> : vector<8x128xf32>
    %221 = tpu.matmul %218, %0, %cst_53 {dimension_numbers = #tpu.dot_dimension_numbers<[1], [0], [0], [1], [0, 0, 1, 1], [], []>} : vector<8x32xbf16>, vector<32x128xbf16>, vector<8x128xf32> -> vector<8x128xf32>
    %222 = arith.addf %220, %221 : vector<8x128xf32>
    %223 = arith.mulf %222, %16 : vector<8x128xf32>
    %224 = math.tanh %223 : vector<8x128xf32>
    %225 = arith.mulf %224, %16 : vector<8x128xf32>
    %226 = arith.addf %225, %19 : vector<8x128xf32>
    %227 = vector.extract_strided_slice %226 {offsets = [0, 0], sizes = [8, 32], strides = [1, 1]} : vector<8x128xf32> to vector<8x32xf32>
    %228 = vector.extract_strided_slice %226 {offsets = [0, 32], sizes = [8, 32], strides = [1, 1]} : vector<8x128xf32> to vector<8x32xf32>
    %229 = vector.extract_strided_slice %226 {offsets = [0, 64], sizes = [8, 32], strides = [1, 1]} : vector<8x128xf32> to vector<8x32xf32>
    %230 = vector.extract_strided_slice %226 {offsets = [0, 96], sizes = [8, 32], strides = [1, 1]} : vector<8x128xf32> to vector<8x32xf32>
    %231 = arith.mulf %228, %215 : vector<8x32xf32>
    %232 = arith.mulf %227, %229 : vector<8x32xf32>
    %233 = arith.addf %231, %232 : vector<8x32xf32>
    %234 = math.tanh %233 : vector<8x32xf32>
    %235 = arith.mulf %230, %234 : vector<8x32xf32>
    %236 = arith.truncf %235 : vector<8x32xf32> to vector<8x32xbf16>
    %c0_54 = arith.constant 0 : index
    %c352 = arith.constant 352 : index
    %237 = vector.load %arg12[%c0_54, %c352] : memref<8x1024xf32, #tpu.memory_space<vmem>>, vector<8x32xf32>
    tpu.vector_store %arg12[%c0_54, %c352], %235 {strides = array<i32>} : memref<8x1024xf32, #tpu.memory_space<vmem>>, vector<8x32xf32>,
    %c96_55 = arith.constant 96 : index
    %c0_56 = arith.constant 0 : index
    %238 = vector.load %arg11[%c96_55, %c0_56] : memref<256x128xf32, #tpu.memory_space<vmem>>, vector<8x128xf32>
    %cst_57 = arith.constant dense<0.000000e+00> : vector<8x128xf32>
    %239 = tpu.matmul %236, %0, %cst_57 {dimension_numbers = #tpu.dot_dimension_numbers<[1], [0], [0], [1], [0, 0, 1, 1], [], []>} : vector<8x32xbf16>, vector<32x128xbf16>, vector<8x128xf32> -> vector<8x128xf32>
    %240 = arith.addf %238, %239 : vector<8x128xf32>
    %241 = arith.mulf %240, %16 : vector<8x128xf32>
    %242 = math.tanh %241 : vector<8x128xf32>
    %243 = arith.mulf %242, %16 : vector<8x128xf32>
    %244 = arith.addf %243, %19 : vector<8x128xf32>
    %245 = vector.extract_strided_slice %244 {offsets = [0, 0], sizes = [8, 32], strides = [1, 1]} : vector<8x128xf32> to vector<8x32xf32>
    %246 = vector.extract_strided_slice %244 {offsets = [0, 32], sizes = [8, 32], strides = [1, 1]} : vector<8x128xf32> to vector<8x32xf32>
    %247 = vector.extract_strided_slice %244 {offsets = [0, 64], sizes = [8, 32], strides = [1, 1]} : vector<8x128xf32> to vector<8x32xf32>
    %248 = vector.extract_strided_slice %244 {offsets = [0, 96], sizes = [8, 32], strides = [1, 1]} : vector<8x128xf32> to vector<8x32xf32>
    %249 = arith.mulf %246, %233 : vector<8x32xf32>
    %250 = arith.mulf %245, %247 : vector<8x32xf32>
    %251 = arith.addf %249, %250 : vector<8x32xf32>
    %252 = math.tanh %251 : vector<8x32xf32>
    %253 = arith.mulf %248, %252 : vector<8x32xf32>
    %254 = arith.truncf %253 : vector<8x32xf32> to vector<8x32xbf16>
    %c0_58 = arith.constant 0 : index
    %c384 = arith.constant 384 : index
    %255 = vector.load %arg12[%c0_58, %c384] : memref<8x1024xf32, #tpu.memory_space<vmem>>, vector<8x32xf32>
    tpu.vector_store %arg12[%c0_58, %c384], %253 {strides = array<i32>} : memref<8x1024xf32, #tpu.memory_space<vmem>>, vector<8x32xf32>,
    %c104 = arith.constant 104 : index
    %c0_59 = arith.constant 0 : index
    %256 = vector.load %arg11[%c104, %c0_59] : memref<256x128xf32, #tpu.memory_space<vmem>>, vector<8x128xf32>
    %cst_60 = arith.constant dense<0.000000e+00> : vector<8x128xf32>
    %257 = tpu.matmul %254, %0, %cst_60 {dimension_numbers = #tpu.dot_dimension_numbers<[1], [0], [0], [1], [0, 0, 1, 1], [], []>} : vector<8x32xbf16>, vector<32x128xbf16>, vector<8x128xf32> -> vector<8x128xf32>
    %258 = arith.addf %256, %257 : vector<8x128xf32>
    %259 = arith.mulf %258, %16 : vector<8x128xf32>
    %260 = math.tanh %259 : vector<8x128xf32>
    %261 = arith.mulf %260, %16 : vector<8x128xf32>
    %262 = arith.addf %261, %19 : vector<8x128xf32>
    %263 = vector.extract_strided_slice %262 {offsets = [0, 0], sizes = [8, 32], strides = [1, 1]} : vector<8x128xf32> to vector<8x32xf32>
    %264 = vector.extract_strided_slice %262 {offsets = [0, 32], sizes = [8, 32], strides = [1, 1]} : vector<8x128xf32> to vector<8x32xf32>
    %265 = vector.extract_strided_slice %262 {offsets = [0, 64], sizes = [8, 32], strides = [1, 1]} : vector<8x128xf32> to vector<8x32xf32>
    %266 = vector.extract_strided_slice %262 {offsets = [0, 96], sizes = [8, 32], strides = [1, 1]} : vector<8x128xf32> to vector<8x32xf32>
    %267 = arith.mulf %264, %251 : vector<8x32xf32>
    %268 = arith.mulf %263, %265 : vector<8x32xf32>
    %269 = arith.addf %267, %268 : vector<8x32xf32>
    %270 = math.tanh %269 : vector<8x32xf32>
    %271 = arith.mulf %266, %270 : vector<8x32xf32>
    %272 = arith.truncf %271 : vector<8x32xf32> to vector<8x32xbf16>
    %c0_61 = arith.constant 0 : index
    %c416 = arith.constant 416 : index
    %273 = vector.load %arg12[%c0_61, %c416] : memref<8x1024xf32, #tpu.memory_space<vmem>>, vector<8x32xf32>
    tpu.vector_store %arg12[%c0_61, %c416], %271 {strides = array<i32>} : memref<8x1024xf32, #tpu.memory_space<vmem>>, vector<8x32xf32>,
    %c112 = arith.constant 112 : index
    %c0_62 = arith.constant 0 : index
    %274 = vector.load %arg11[%c112, %c0_62] : memref<256x128xf32, #tpu.memory_space<vmem>>, vector<8x128xf32>
    %cst_63 = arith.constant dense<0.000000e+00> : vector<8x128xf32>
    %275 = tpu.matmul %272, %0, %cst_63 {dimension_numbers = #tpu.dot_dimension_numbers<[1], [0], [0], [1], [0, 0, 1, 1], [], []>} : vector<8x32xbf16>, vector<32x128xbf16>, vector<8x128xf32> -> vector<8x128xf32>
    %276 = arith.addf %274, %275 : vector<8x128xf32>
    %277 = arith.mulf %276, %16 : vector<8x128xf32>
    %278 = math.tanh %277 : vector<8x128xf32>
    %279 = arith.mulf %278, %16 : vector<8x128xf32>
    %280 = arith.addf %279, %19 : vector<8x128xf32>
    %281 = vector.extract_strided_slice %280 {offsets = [0, 0], sizes = [8, 32], strides = [1, 1]} : vector<8x128xf32> to vector<8x32xf32>
    %282 = vector.extract_strided_slice %280 {offsets = [0, 32], sizes = [8, 32], strides = [1, 1]} : vector<8x128xf32> to vector<8x32xf32>
    %283 = vector.extract_strided_slice %280 {offsets = [0, 64], sizes = [8, 32], strides = [1, 1]} : vector<8x128xf32> to vector<8x32xf32>
    %284 = vector.extract_strided_slice %280 {offsets = [0, 96], sizes = [8, 32], strides = [1, 1]} : vector<8x128xf32> to vector<8x32xf32>
    %285 = arith.mulf %282, %269 : vector<8x32xf32>
    %286 = arith.mulf %281, %283 : vector<8x32xf32>
    %287 = arith.addf %285, %286 : vector<8x32xf32>
    %288 = math.tanh %287 : vector<8x32xf32>
    %289 = arith.mulf %284, %288 : vector<8x32xf32>
    %290 = arith.truncf %289 : vector<8x32xf32> to vector<8x32xbf16>
    %c0_64 = arith.constant 0 : index
    %c448 = arith.constant 448 : index
    %291 = vector.load %arg12[%c0_64, %c448] : memref<8x1024xf32, #tpu.memory_space<vmem>>, vector<8x32xf32>
    tpu.vector_store %arg12[%c0_64, %c448], %289 {strides = array<i32>} : memref<8x1024xf32, #tpu.memory_space<vmem>>, vector<8x32xf32>,
    %c120 = arith.constant 120 : index
    %c0_65 = arith.constant 0 : index
    %292 = vector.load %arg11[%c120, %c0_65] : memref<256x128xf32, #tpu.memory_space<vmem>>, vector<8x128xf32>
    %cst_66 = arith.constant dense<0.000000e+00> : vector<8x128xf32>
    %293 = tpu.matmul %290, %0, %cst_66 {dimension_numbers = #tpu.dot_dimension_numbers<[1], [0], [0], [1], [0, 0, 1, 1], [], []>} : vector<8x32xbf16>, vector<32x128xbf16>, vector<8x128xf32> -> vector<8x128xf32>
    %294 = arith.addf %292, %293 : vector<8x128xf32>
    %295 = arith.mulf %294, %16 : vector<8x128xf32>
    %296 = math.tanh %295 : vector<8x128xf32>
    %297 = arith.mulf %296, %16 : vector<8x128xf32>
    %298 = arith.addf %297, %19 : vector<8x128xf32>
    %299 = vector.extract_strided_slice %298 {offsets = [0, 0], sizes = [8, 32], strides = [1, 1]} : vector<8x128xf32> to vector<8x32xf32>
    %300 = vector.extract_strided_slice %298 {offsets = [0, 32], sizes = [8, 32], strides = [1, 1]} : vector<8x128xf32> to vector<8x32xf32>
    %301 = vector.extract_strided_slice %298 {offsets = [0, 64], sizes = [8, 32], strides = [1, 1]} : vector<8x128xf32> to vector<8x32xf32>
    %302 = vector.extract_strided_slice %298 {offsets = [0, 96], sizes = [8, 32], strides = [1, 1]} : vector<8x128xf32> to vector<8x32xf32>
    %303 = arith.mulf %300, %287 : vector<8x32xf32>
    %304 = arith.mulf %299, %301 : vector<8x32xf32>
    %305 = arith.addf %303, %304 : vector<8x32xf32>
    %306 = math.tanh %305 : vector<8x32xf32>
    %307 = arith.mulf %302, %306 : vector<8x32xf32>
    %308 = arith.truncf %307 : vector<8x32xf32> to vector<8x32xbf16>
    %c0_67 = arith.constant 0 : index
    %c480 = arith.constant 480 : index
    %309 = vector.load %arg12[%c0_67, %c480] : memref<8x1024xf32, #tpu.memory_space<vmem>>, vector<8x32xf32>
    tpu.vector_store %arg12[%c0_67, %c480], %307 {strides = array<i32>} : memref<8x1024xf32, #tpu.memory_space<vmem>>, vector<8x32xf32>,
    %c128_68 = arith.constant 128 : index
    %c0_69 = arith.constant 0 : index
    %310 = vector.load %arg11[%c128_68, %c0_69] : memref<256x128xf32, #tpu.memory_space<vmem>>, vector<8x128xf32>
    %cst_70 = arith.constant dense<0.000000e+00> : vector<8x128xf32>
    %311 = tpu.matmul %308, %0, %cst_70 {dimension_numbers = #tpu.dot_dimension_numbers<[1], [0], [0], [1], [0, 0, 1, 1], [], []>} : vector<8x32xbf16>, vector<32x128xbf16>, vector<8x128xf32> -> vector<8x128xf32>
    %312 = arith.addf %310, %311 : vector<8x128xf32>
    %313 = arith.mulf %312, %16 : vector<8x128xf32>
    %314 = math.tanh %313 : vector<8x128xf32>
    %315 = arith.mulf %314, %16 : vector<8x128xf32>
    %316 = arith.addf %315, %19 : vector<8x128xf32>
    %317 = vector.extract_strided_slice %316 {offsets = [0, 0], sizes = [8, 32], strides = [1, 1]} : vector<8x128xf32> to vector<8x32xf32>
    %318 = vector.extract_strided_slice %316 {offsets = [0, 32], sizes = [8, 32], strides = [1, 1]} : vector<8x128xf32> to vector<8x32xf32>
    %319 = vector.extract_strided_slice %316 {offsets = [0, 64], sizes = [8, 32], strides = [1, 1]} : vector<8x128xf32> to vector<8x32xf32>
    %320 = vector.extract_strided_slice %316 {offsets = [0, 96], sizes = [8, 32], strides = [1, 1]} : vector<8x128xf32> to vector<8x32xf32>
    %321 = arith.mulf %318, %305 : vector<8x32xf32>
    %322 = arith.mulf %317, %319 : vector<8x32xf32>
    %323 = arith.addf %321, %322 : vector<8x32xf32>
    %324 = math.tanh %323 : vector<8x32xf32>
    %325 = arith.mulf %320, %324 : vector<8x32xf32>
    %326 = arith.truncf %325 : vector<8x32xf32> to vector<8x32xbf16>
    %c0_71 = arith.constant 0 : index
    %c512 = arith.constant 512 : index
    %327 = vector.load %arg12[%c0_71, %c512] : memref<8x1024xf32, #tpu.memory_space<vmem>>, vector<8x32xf32>
    tpu.vector_store %arg12[%c0_71, %c512], %325 {strides = array<i32>} : memref<8x1024xf32, #tpu.memory_space<vmem>>, vector<8x32xf32>,
    %c136 = arith.constant 136 : index
    %c0_72 = arith.constant 0 : index
    %328 = vector.load %arg11[%c136, %c0_72] : memref<256x128xf32, #tpu.memory_space<vmem>>, vector<8x128xf32>
    %cst_73 = arith.constant dense<0.000000e+00> : vector<8x128xf32>
    %329 = tpu.matmul %326, %0, %cst_73 {dimension_numbers = #tpu.dot_dimension_numbers<[1], [0], [0], [1], [0, 0, 1, 1], [], []>} : vector<8x32xbf16>, vector<32x128xbf16>, vector<8x128xf32> -> vector<8x128xf32>
    %330 = arith.addf %328, %329 : vector<8x128xf32>
    %331 = arith.mulf %330, %16 : vector<8x128xf32>
    %332 = math.tanh %331 : vector<8x128xf32>
    %333 = arith.mulf %332, %16 : vector<8x128xf32>
    %334 = arith.addf %333, %19 : vector<8x128xf32>
    %335 = vector.extract_strided_slice %334 {offsets = [0, 0], sizes = [8, 32], strides = [1, 1]} : vector<8x128xf32> to vector<8x32xf32>
    %336 = vector.extract_strided_slice %334 {offsets = [0, 32], sizes = [8, 32], strides = [1, 1]} : vector<8x128xf32> to vector<8x32xf32>
    %337 = vector.extract_strided_slice %334 {offsets = [0, 64], sizes = [8, 32], strides = [1, 1]} : vector<8x128xf32> to vector<8x32xf32>
    %338 = vector.extract_strided_slice %334 {offsets = [0, 96], sizes = [8, 32], strides = [1, 1]} : vector<8x128xf32> to vector<8x32xf32>
    %339 = arith.mulf %336, %323 : vector<8x32xf32>
    %340 = arith.mulf %335, %337 : vector<8x32xf32>
    %341 = arith.addf %339, %340 : vector<8x32xf32>
    %342 = math.tanh %341 : vector<8x32xf32>
    %343 = arith.mulf %338, %342 : vector<8x32xf32>
    %344 = arith.truncf %343 : vector<8x32xf32> to vector<8x32xbf16>
    %c0_74 = arith.constant 0 : index
    %c544 = arith.constant 544 : index
    %345 = vector.load %arg12[%c0_74, %c544] : memref<8x1024xf32, #tpu.memory_space<vmem>>, vector<8x32xf32>
    tpu.vector_store %arg12[%c0_74, %c544], %343 {strides = array<i32>} : memref<8x1024xf32, #tpu.memory_space<vmem>>, vector<8x32xf32>,
    %c144 = arith.constant 144 : index
    %c0_75 = arith.constant 0 : index
    %346 = vector.load %arg11[%c144, %c0_75] : memref<256x128xf32, #tpu.memory_space<vmem>>, vector<8x128xf32>
    %cst_76 = arith.constant dense<0.000000e+00> : vector<8x128xf32>
    %347 = tpu.matmul %344, %0, %cst_76 {dimension_numbers = #tpu.dot_dimension_numbers<[1], [0], [0], [1], [0, 0, 1, 1], [], []>} : vector<8x32xbf16>, vector<32x128xbf16>, vector<8x128xf32> -> vector<8x128xf32>
    %348 = arith.addf %346, %347 : vector<8x128xf32>
    %349 = arith.mulf %348, %16 : vector<8x128xf32>
    %350 = math.tanh %349 : vector<8x128xf32>
    %351 = arith.mulf %350, %16 : vector<8x128xf32>
    %352 = arith.addf %351, %19 : vector<8x128xf32>
    %353 = vector.extract_strided_slice %352 {offsets = [0, 0], sizes = [8, 32], strides = [1, 1]} : vector<8x128xf32> to vector<8x32xf32>
    %354 = vector.extract_strided_slice %352 {offsets = [0, 32], sizes = [8, 32], strides = [1, 1]} : vector<8x128xf32> to vector<8x32xf32>
    %355 = vector.extract_strided_slice %352 {offsets = [0, 64], sizes = [8, 32], strides = [1, 1]} : vector<8x128xf32> to vector<8x32xf32>
    %356 = vector.extract_strided_slice %352 {offsets = [0, 96], sizes = [8, 32], strides = [1, 1]} : vector<8x128xf32> to vector<8x32xf32>
    %357 = arith.mulf %354, %341 : vector<8x32xf32>
    %358 = arith.mulf %353, %355 : vector<8x32xf32>
    %359 = arith.addf %357, %358 : vector<8x32xf32>
    %360 = math.tanh %359 : vector<8x32xf32>
    %361 = arith.mulf %356, %360 : vector<8x32xf32>
    %362 = arith.truncf %361 : vector<8x32xf32> to vector<8x32xbf16>
    %c0_77 = arith.constant 0 : index
    %c576 = arith.constant 576 : index
    %363 = vector.load %arg12[%c0_77, %c576] : memref<8x1024xf32, #tpu.memory_space<vmem>>, vector<8x32xf32>
    tpu.vector_store %arg12[%c0_77, %c576], %361 {strides = array<i32>} : memref<8x1024xf32, #tpu.memory_space<vmem>>, vector<8x32xf32>,
    %c152 = arith.constant 152 : index
    %c0_78 = arith.constant 0 : index
    %364 = vector.load %arg11[%c152, %c0_78] : memref<256x128xf32, #tpu.memory_space<vmem>>, vector<8x128xf32>
    %cst_79 = arith.constant dense<0.000000e+00> : vector<8x128xf32>
    %365 = tpu.matmul %362, %0, %cst_79 {dimension_numbers = #tpu.dot_dimension_numbers<[1], [0], [0], [1], [0, 0, 1, 1], [], []>} : vector<8x32xbf16>, vector<32x128xbf16>, vector<8x128xf32> -> vector<8x128xf32>
    %366 = arith.addf %364, %365 : vector<8x128xf32>
    %367 = arith.mulf %366, %16 : vector<8x128xf32>
    %368 = math.tanh %367 : vector<8x128xf32>
    %369 = arith.mulf %368, %16 : vector<8x128xf32>
    %370 = arith.addf %369, %19 : vector<8x128xf32>
    %371 = vector.extract_strided_slice %370 {offsets = [0, 0], sizes = [8, 32], strides = [1, 1]} : vector<8x128xf32> to vector<8x32xf32>
    %372 = vector.extract_strided_slice %370 {offsets = [0, 32], sizes = [8, 32], strides = [1, 1]} : vector<8x128xf32> to vector<8x32xf32>
    %373 = vector.extract_strided_slice %370 {offsets = [0, 64], sizes = [8, 32], strides = [1, 1]} : vector<8x128xf32> to vector<8x32xf32>
    %374 = vector.extract_strided_slice %370 {offsets = [0, 96], sizes = [8, 32], strides = [1, 1]} : vector<8x128xf32> to vector<8x32xf32>
    %375 = arith.mulf %372, %359 : vector<8x32xf32>
    %376 = arith.mulf %371, %373 : vector<8x32xf32>
    %377 = arith.addf %375, %376 : vector<8x32xf32>
    %378 = math.tanh %377 : vector<8x32xf32>
    %379 = arith.mulf %374, %378 : vector<8x32xf32>
    %380 = arith.truncf %379 : vector<8x32xf32> to vector<8x32xbf16>
    %c0_80 = arith.constant 0 : index
    %c608 = arith.constant 608 : index
    %381 = vector.load %arg12[%c0_80, %c608] : memref<8x1024xf32, #tpu.memory_space<vmem>>, vector<8x32xf32>
    tpu.vector_store %arg12[%c0_80, %c608], %379 {strides = array<i32>} : memref<8x1024xf32, #tpu.memory_space<vmem>>, vector<8x32xf32>,
    %c160_81 = arith.constant 160 : index
    %c0_82 = arith.constant 0 : index
    %382 = vector.load %arg11[%c160_81, %c0_82] : memref<256x128xf32, #tpu.memory_space<vmem>>, vector<8x128xf32>
    %cst_83 = arith.constant dense<0.000000e+00> : vector<8x128xf32>
    %383 = tpu.matmul %380, %0, %cst_83 {dimension_numbers = #tpu.dot_dimension_numbers<[1], [0], [0], [1], [0, 0, 1, 1], [], []>} : vector<8x32xbf16>, vector<32x128xbf16>, vector<8x128xf32> -> vector<8x128xf32>
    %384 = arith.addf %382, %383 : vector<8x128xf32>
    %385 = arith.mulf %384, %16 : vector<8x128xf32>
    %386 = math.tanh %385 : vector<8x128xf32>
    %387 = arith.mulf %386, %16 : vector<8x128xf32>
    %388 = arith.addf %387, %19 : vector<8x128xf32>
    %389 = vector.extract_strided_slice %388 {offsets = [0, 0], sizes = [8, 32], strides = [1, 1]} : vector<8x128xf32> to vector<8x32xf32>
    %390 = vector.extract_strided_slice %388 {offsets = [0, 32], sizes = [8, 32], strides = [1, 1]} : vector<8x128xf32> to vector<8x32xf32>
    %391 = vector.extract_strided_slice %388 {offsets = [0, 64], sizes = [8, 32], strides = [1, 1]} : vector<8x128xf32> to vector<8x32xf32>
    %392 = vector.extract_strided_slice %388 {offsets = [0, 96], sizes = [8, 32], strides = [1, 1]} : vector<8x128xf32> to vector<8x32xf32>
    %393 = arith.mulf %390, %377 : vector<8x32xf32>
    %394 = arith.mulf %389, %391 : vector<8x32xf32>
    %395 = arith.addf %393, %394 : vector<8x32xf32>
    %396 = math.tanh %395 : vector<8x32xf32>
    %397 = arith.mulf %392, %396 : vector<8x32xf32>
    %398 = arith.truncf %397 : vector<8x32xf32> to vector<8x32xbf16>
    %c0_84 = arith.constant 0 : index
    %c640 = arith.constant 640 : index
    %399 = vector.load %arg12[%c0_84, %c640] : memref<8x1024xf32, #tpu.memory_space<vmem>>, vector<8x32xf32>
    tpu.vector_store %arg12[%c0_84, %c640], %397 {strides = array<i32>} : memref<8x1024xf32, #tpu.memory_space<vmem>>, vector<8x32xf32>,
    %c168 = arith.constant 168 : index
    %c0_85 = arith.constant 0 : index
    %400 = vector.load %arg11[%c168, %c0_85] : memref<256x128xf32, #tpu.memory_space<vmem>>, vector<8x128xf32>
    %cst_86 = arith.constant dense<0.000000e+00> : vector<8x128xf32>
    %401 = tpu.matmul %398, %0, %cst_86 {dimension_numbers = #tpu.dot_dimension_numbers<[1], [0], [0], [1], [0, 0, 1, 1], [], []>} : vector<8x32xbf16>, vector<32x128xbf16>, vector<8x128xf32> -> vector<8x128xf32>
    %402 = arith.addf %400, %401 : vector<8x128xf32>
    %403 = arith.mulf %402, %16 : vector<8x128xf32>
    %404 = math.tanh %403 : vector<8x128xf32>
    %405 = arith.mulf %404, %16 : vector<8x128xf32>
    %406 = arith.addf %405, %19 : vector<8x128xf32>
    %407 = vector.extract_strided_slice %406 {offsets = [0, 0], sizes = [8, 32], strides = [1, 1]} : vector<8x128xf32> to vector<8x32xf32>
    %408 = vector.extract_strided_slice %406 {offsets = [0, 32], sizes = [8, 32], strides = [1, 1]} : vector<8x128xf32> to vector<8x32xf32>
    %409 = vector.extract_strided_slice %406 {offsets = [0, 64], sizes = [8, 32], strides = [1, 1]} : vector<8x128xf32> to vector<8x32xf32>
    %410 = vector.extract_strided_slice %406 {offsets = [0, 96], sizes = [8, 32], strides = [1, 1]} : vector<8x128xf32> to vector<8x32xf32>
    %411 = arith.mulf %408, %395 : vector<8x32xf32>
    %412 = arith.mulf %407, %409 : vector<8x32xf32>
    %413 = arith.addf %411, %412 : vector<8x32xf32>
    %414 = math.tanh %413 : vector<8x32xf32>
    %415 = arith.mulf %410, %414 : vector<8x32xf32>
    %416 = arith.truncf %415 : vector<8x32xf32> to vector<8x32xbf16>
    %c0_87 = arith.constant 0 : index
    %c672 = arith.constant 672 : index
    %417 = vector.load %arg12[%c0_87, %c672] : memref<8x1024xf32, #tpu.memory_space<vmem>>, vector<8x32xf32>
    tpu.vector_store %arg12[%c0_87, %c672], %415 {strides = array<i32>} : memref<8x1024xf32, #tpu.memory_space<vmem>>, vector<8x32xf32>,
    %c176 = arith.constant 176 : index
    %c0_88 = arith.constant 0 : index
    %418 = vector.load %arg11[%c176, %c0_88] : memref<256x128xf32, #tpu.memory_space<vmem>>, vector<8x128xf32>
    %cst_89 = arith.constant dense<0.000000e+00> : vector<8x128xf32>
    %419 = tpu.matmul %416, %0, %cst_89 {dimension_numbers = #tpu.dot_dimension_numbers<[1], [0], [0], [1], [0, 0, 1, 1], [], []>} : vector<8x32xbf16>, vector<32x128xbf16>, vector<8x128xf32> -> vector<8x128xf32>
    %420 = arith.addf %418, %419 : vector<8x128xf32>
    %421 = arith.mulf %420, %16 : vector<8x128xf32>
    %422 = math.tanh %421 : vector<8x128xf32>
    %423 = arith.mulf %422, %16 : vector<8x128xf32>
    %424 = arith.addf %423, %19 : vector<8x128xf32>
    %425 = vector.extract_strided_slice %424 {offsets = [0, 0], sizes = [8, 32], strides = [1, 1]} : vector<8x128xf32> to vector<8x32xf32>
    %426 = vector.extract_strided_slice %424 {offsets = [0, 32], sizes = [8, 32], strides = [1, 1]} : vector<8x128xf32> to vector<8x32xf32>
    %427 = vector.extract_strided_slice %424 {offsets = [0, 64], sizes = [8, 32], strides = [1, 1]} : vector<8x128xf32> to vector<8x32xf32>
    %428 = vector.extract_strided_slice %424 {offsets = [0, 96], sizes = [8, 32], strides = [1, 1]} : vector<8x128xf32> to vector<8x32xf32>
    %429 = arith.mulf %426, %413 : vector<8x32xf32>
    %430 = arith.mulf %425, %427 : vector<8x32xf32>
    %431 = arith.addf %429, %430 : vector<8x32xf32>
    %432 = math.tanh %431 : vector<8x32xf32>
    %433 = arith.mulf %428, %432 : vector<8x32xf32>
    %434 = arith.truncf %433 : vector<8x32xf32> to vector<8x32xbf16>
    %c0_90 = arith.constant 0 : index
    %c704 = arith.constant 704 : index
    %435 = vector.load %arg12[%c0_90, %c704] : memref<8x1024xf32, #tpu.memory_space<vmem>>, vector<8x32xf32>
    tpu.vector_store %arg12[%c0_90, %c704], %433 {strides = array<i32>} : memref<8x1024xf32, #tpu.memory_space<vmem>>, vector<8x32xf32>,
    %c184 = arith.constant 184 : index
    %c0_91 = arith.constant 0 : index
    %436 = vector.load %arg11[%c184, %c0_91] : memref<256x128xf32, #tpu.memory_space<vmem>>, vector<8x128xf32>
    %cst_92 = arith.constant dense<0.000000e+00> : vector<8x128xf32>
    %437 = tpu.matmul %434, %0, %cst_92 {dimension_numbers = #tpu.dot_dimension_numbers<[1], [0], [0], [1], [0, 0, 1, 1], [], []>} : vector<8x32xbf16>, vector<32x128xbf16>, vector<8x128xf32> -> vector<8x128xf32>
    %438 = arith.addf %436, %437 : vector<8x128xf32>
    %439 = arith.mulf %438, %16 : vector<8x128xf32>
    %440 = math.tanh %439 : vector<8x128xf32>
    %441 = arith.mulf %440, %16 : vector<8x128xf32>
    %442 = arith.addf %441, %19 : vector<8x128xf32>
    %443 = vector.extract_strided_slice %442 {offsets = [0, 0], sizes = [8, 32], strides = [1, 1]} : vector<8x128xf32> to vector<8x32xf32>
    %444 = vector.extract_strided_slice %442 {offsets = [0, 32], sizes = [8, 32], strides = [1, 1]} : vector<8x128xf32> to vector<8x32xf32>
    %445 = vector.extract_strided_slice %442 {offsets = [0, 64], sizes = [8, 32], strides = [1, 1]} : vector<8x128xf32> to vector<8x32xf32>
    %446 = vector.extract_strided_slice %442 {offsets = [0, 96], sizes = [8, 32], strides = [1, 1]} : vector<8x128xf32> to vector<8x32xf32>
    %447 = arith.mulf %444, %431 : vector<8x32xf32>
    %448 = arith.mulf %443, %445 : vector<8x32xf32>
    %449 = arith.addf %447, %448 : vector<8x32xf32>
    %450 = math.tanh %449 : vector<8x32xf32>
    %451 = arith.mulf %446, %450 : vector<8x32xf32>
    %452 = arith.truncf %451 : vector<8x32xf32> to vector<8x32xbf16>
    %c0_93 = arith.constant 0 : index
    %c736 = arith.constant 736 : index
    %453 = vector.load %arg12[%c0_93, %c736] : memref<8x1024xf32, #tpu.memory_space<vmem>>, vector<8x32xf32>
    tpu.vector_store %arg12[%c0_93, %c736], %451 {strides = array<i32>} : memref<8x1024xf32, #tpu.memory_space<vmem>>, vector<8x32xf32>,
    %c192_94 = arith.constant 192 : index
    %c0_95 = arith.constant 0 : index
    %454 = vector.load %arg11[%c192_94, %c0_95] : memref<256x128xf32, #tpu.memory_space<vmem>>, vector<8x128xf32>
    %cst_96 = arith.constant dense<0.000000e+00> : vector<8x128xf32>
    %455 = tpu.matmul %452, %0, %cst_96 {dimension_numbers = #tpu.dot_dimension_numbers<[1], [0], [0], [1], [0, 0, 1, 1], [], []>} : vector<8x32xbf16>, vector<32x128xbf16>, vector<8x128xf32> -> vector<8x128xf32>
    %456 = arith.addf %454, %455 : vector<8x128xf32>
    %457 = arith.mulf %456, %16 : vector<8x128xf32>
    %458 = math.tanh %457 : vector<8x128xf32>
    %459 = arith.mulf %458, %16 : vector<8x128xf32>
    %460 = arith.addf %459, %19 : vector<8x128xf32>
    %461 = vector.extract_strided_slice %460 {offsets = [0, 0], sizes = [8, 32], strides = [1, 1]} : vector<8x128xf32> to vector<8x32xf32>
    %462 = vector.extract_strided_slice %460 {offsets = [0, 32], sizes = [8, 32], strides = [1, 1]} : vector<8x128xf32> to vector<8x32xf32>
    %463 = vector.extract_strided_slice %460 {offsets = [0, 64], sizes = [8, 32], strides = [1, 1]} : vector<8x128xf32> to vector<8x32xf32>
    %464 = vector.extract_strided_slice %460 {offsets = [0, 96], sizes = [8, 32], strides = [1, 1]} : vector<8x128xf32> to vector<8x32xf32>
    %465 = arith.mulf %462, %449 : vector<8x32xf32>
    %466 = arith.mulf %461, %463 : vector<8x32xf32>
    %467 = arith.addf %465, %466 : vector<8x32xf32>
    %468 = math.tanh %467 : vector<8x32xf32>
    %469 = arith.mulf %464, %468 : vector<8x32xf32>
    %470 = arith.truncf %469 : vector<8x32xf32> to vector<8x32xbf16>
    %c0_97 = arith.constant 0 : index
    %c768 = arith.constant 768 : index
    %471 = vector.load %arg12[%c0_97, %c768] : memref<8x1024xf32, #tpu.memory_space<vmem>>, vector<8x32xf32>
    tpu.vector_store %arg12[%c0_97, %c768], %469 {strides = array<i32>} : memref<8x1024xf32, #tpu.memory_space<vmem>>, vector<8x32xf32>,
    %c200 = arith.constant 200 : index
    %c0_98 = arith.constant 0 : index
    %472 = vector.load %arg11[%c200, %c0_98] : memref<256x128xf32, #tpu.memory_space<vmem>>, vector<8x128xf32>
    %cst_99 = arith.constant dense<0.000000e+00> : vector<8x128xf32>
    %473 = tpu.matmul %470, %0, %cst_99 {dimension_numbers = #tpu.dot_dimension_numbers<[1], [0], [0], [1], [0, 0, 1, 1], [], []>} : vector<8x32xbf16>, vector<32x128xbf16>, vector<8x128xf32> -> vector<8x128xf32>
    %474 = arith.addf %472, %473 : vector<8x128xf32>
    %475 = arith.mulf %474, %16 : vector<8x128xf32>
    %476 = math.tanh %475 : vector<8x128xf32>
    %477 = arith.mulf %476, %16 : vector<8x128xf32>
    %478 = arith.addf %477, %19 : vector<8x128xf32>
    %479 = vector.extract_strided_slice %478 {offsets = [0, 0], sizes = [8, 32], strides = [1, 1]} : vector<8x128xf32> to vector<8x32xf32>
    %480 = vector.extract_strided_slice %478 {offsets = [0, 32], sizes = [8, 32], strides = [1, 1]} : vector<8x128xf32> to vector<8x32xf32>
    %481 = vector.extract_strided_slice %478 {offsets = [0, 64], sizes = [8, 32], strides = [1, 1]} : vector<8x128xf32> to vector<8x32xf32>
    %482 = vector.extract_strided_slice %478 {offsets = [0, 96], sizes = [8, 32], strides = [1, 1]} : vector<8x128xf32> to vector<8x32xf32>
    %483 = arith.mulf %480, %467 : vector<8x32xf32>
    %484 = arith.mulf %479, %481 : vector<8x32xf32>
    %485 = arith.addf %483, %484 : vector<8x32xf32>
    %486 = math.tanh %485 : vector<8x32xf32>
    %487 = arith.mulf %482, %486 : vector<8x32xf32>
    %488 = arith.truncf %487 : vector<8x32xf32> to vector<8x32xbf16>
    %c0_100 = arith.constant 0 : index
    %c800 = arith.constant 800 : index
    %489 = vector.load %arg12[%c0_100, %c800] : memref<8x1024xf32, #tpu.memory_space<vmem>>, vector<8x32xf32>
    tpu.vector_store %arg12[%c0_100, %c800], %487 {strides = array<i32>} : memref<8x1024xf32, #tpu.memory_space<vmem>>, vector<8x32xf32>,
    %c208 = arith.constant 208 : index
    %c0_101 = arith.constant 0 : index
    %490 = vector.load %arg11[%c208, %c0_101] : memref<256x128xf32, #tpu.memory_space<vmem>>, vector<8x128xf32>
    %cst_102 = arith.constant dense<0.000000e+00> : vector<8x128xf32>
    %491 = tpu.matmul %488, %0, %cst_102 {dimension_numbers = #tpu.dot_dimension_numbers<[1], [0], [0], [1], [0, 0, 1, 1], [], []>} : vector<8x32xbf16>, vector<32x128xbf16>, vector<8x128xf32> -> vector<8x128xf32>
    %492 = arith.addf %490, %491 : vector<8x128xf32>
    %493 = arith.mulf %492, %16 : vector<8x128xf32>
    %494 = math.tanh %493 : vector<8x128xf32>
    %495 = arith.mulf %494, %16 : vector<8x128xf32>
    %496 = arith.addf %495, %19 : vector<8x128xf32>
    %497 = vector.extract_strided_slice %496 {offsets = [0, 0], sizes = [8, 32], strides = [1, 1]} : vector<8x128xf32> to vector<8x32xf32>
    %498 = vector.extract_strided_slice %496 {offsets = [0, 32], sizes = [8, 32], strides = [1, 1]} : vector<8x128xf32> to vector<8x32xf32>
    %499 = vector.extract_strided_slice %496 {offsets = [0, 64], sizes = [8, 32], strides = [1, 1]} : vector<8x128xf32> to vector<8x32xf32>
    %500 = vector.extract_strided_slice %496 {offsets = [0, 96], sizes = [8, 32], strides = [1, 1]} : vector<8x128xf32> to vector<8x32xf32>
    %501 = arith.mulf %498, %485 : vector<8x32xf32>
    %502 = arith.mulf %497, %499 : vector<8x32xf32>
    %503 = arith.addf %501, %502 : vector<8x32xf32>
    %504 = math.tanh %503 : vector<8x32xf32>
    %505 = arith.mulf %500, %504 : vector<8x32xf32>
    %506 = arith.truncf %505 : vector<8x32xf32> to vector<8x32xbf16>
    %c0_103 = arith.constant 0 : index
    %c832 = arith.constant 832 : index
    %507 = vector.load %arg12[%c0_103, %c832] : memref<8x1024xf32, #tpu.memory_space<vmem>>, vector<8x32xf32>
    tpu.vector_store %arg12[%c0_103, %c832], %505 {strides = array<i32>} : memref<8x1024xf32, #tpu.memory_space<vmem>>, vector<8x32xf32>,
    %c216 = arith.constant 216 : index
    %c0_104 = arith.constant 0 : index
    %508 = vector.load %arg11[%c216, %c0_104] : memref<256x128xf32, #tpu.memory_space<vmem>>, vector<8x128xf32>
    %cst_105 = arith.constant dense<0.000000e+00> : vector<8x128xf32>
    %509 = tpu.matmul %506, %0, %cst_105 {dimension_numbers = #tpu.dot_dimension_numbers<[1], [0], [0], [1], [0, 0, 1, 1], [], []>} : vector<8x32xbf16>, vector<32x128xbf16>, vector<8x128xf32> -> vector<8x128xf32>
    %510 = arith.addf %508, %509 : vector<8x128xf32>
    %511 = arith.mulf %510, %16 : vector<8x128xf32>
    %512 = math.tanh %511 : vector<8x128xf32>
    %513 = arith.mulf %512, %16 : vector<8x128xf32>
    %514 = arith.addf %513, %19 : vector<8x128xf32>
    %515 = vector.extract_strided_slice %514 {offsets = [0, 0], sizes = [8, 32], strides = [1, 1]} : vector<8x128xf32> to vector<8x32xf32>
    %516 = vector.extract_strided_slice %514 {offsets = [0, 32], sizes = [8, 32], strides = [1, 1]} : vector<8x128xf32> to vector<8x32xf32>
    %517 = vector.extract_strided_slice %514 {offsets = [0, 64], sizes = [8, 32], strides = [1, 1]} : vector<8x128xf32> to vector<8x32xf32>
    %518 = vector.extract_strided_slice %514 {offsets = [0, 96], sizes = [8, 32], strides = [1, 1]} : vector<8x128xf32> to vector<8x32xf32>
    %519 = arith.mulf %516, %503 : vector<8x32xf32>
    %520 = arith.mulf %515, %517 : vector<8x32xf32>
    %521 = arith.addf %519, %520 : vector<8x32xf32>
    %522 = math.tanh %521 : vector<8x32xf32>
    %523 = arith.mulf %518, %522 : vector<8x32xf32>
    %524 = arith.truncf %523 : vector<8x32xf32> to vector<8x32xbf16>
    %c0_106 = arith.constant 0 : index
    %c864 = arith.constant 864 : index
    %525 = vector.load %arg12[%c0_106, %c864] : memref<8x1024xf32, #tpu.memory_space<vmem>>, vector<8x32xf32>
    tpu.vector_store %arg12[%c0_106, %c864], %523 {strides = array<i32>} : memref<8x1024xf32, #tpu.memory_space<vmem>>, vector<8x32xf32>,
    %c224_107 = arith.constant 224 : index
    %c0_108 = arith.constant 0 : index
    %526 = vector.load %arg11[%c224_107, %c0_108] : memref<256x128xf32, #tpu.memory_space<vmem>>, vector<8x128xf32>
    %cst_109 = arith.constant dense<0.000000e+00> : vector<8x128xf32>
    %527 = tpu.matmul %524, %0, %cst_109 {dimension_numbers = #tpu.dot_dimension_numbers<[1], [0], [0], [1], [0, 0, 1, 1], [], []>} : vector<8x32xbf16>, vector<32x128xbf16>, vector<8x128xf32> -> vector<8x128xf32>
    %528 = arith.addf %526, %527 : vector<8x128xf32>
    %529 = arith.mulf %528, %16 : vector<8x128xf32>
    %530 = math.tanh %529 : vector<8x128xf32>
    %531 = arith.mulf %530, %16 : vector<8x128xf32>
    %532 = arith.addf %531, %19 : vector<8x128xf32>
    %533 = vector.extract_strided_slice %532 {offsets = [0, 0], sizes = [8, 32], strides = [1, 1]} : vector<8x128xf32> to vector<8x32xf32>
    %534 = vector.extract_strided_slice %532 {offsets = [0, 32], sizes = [8, 32], strides = [1, 1]} : vector<8x128xf32> to vector<8x32xf32>
    %535 = vector.extract_strided_slice %532 {offsets = [0, 64], sizes = [8, 32], strides = [1, 1]} : vector<8x128xf32> to vector<8x32xf32>
    %536 = vector.extract_strided_slice %532 {offsets = [0, 96], sizes = [8, 32], strides = [1, 1]} : vector<8x128xf32> to vector<8x32xf32>
    %537 = arith.mulf %534, %521 : vector<8x32xf32>
    %538 = arith.mulf %533, %535 : vector<8x32xf32>
    %539 = arith.addf %537, %538 : vector<8x32xf32>
    %540 = math.tanh %539 : vector<8x32xf32>
    %541 = arith.mulf %536, %540 : vector<8x32xf32>
    %542 = arith.truncf %541 : vector<8x32xf32> to vector<8x32xbf16>
    %c0_110 = arith.constant 0 : index
    %c896 = arith.constant 896 : index
    %543 = vector.load %arg12[%c0_110, %c896] : memref<8x1024xf32, #tpu.memory_space<vmem>>, vector<8x32xf32>
    tpu.vector_store %arg12[%c0_110, %c896], %541 {strides = array<i32>} : memref<8x1024xf32, #tpu.memory_space<vmem>>, vector<8x32xf32>,
    %c232 = arith.constant 232 : index
    %c0_111 = arith.constant 0 : index
    %544 = vector.load %arg11[%c232, %c0_111] : memref<256x128xf32, #tpu.memory_space<vmem>>, vector<8x128xf32>
    %cst_112 = arith.constant dense<0.000000e+00> : vector<8x128xf32>
    %545 = tpu.matmul %542, %0, %cst_112 {dimension_numbers = #tpu.dot_dimension_numbers<[1], [0], [0], [1], [0, 0, 1, 1], [], []>} : vector<8x32xbf16>, vector<32x128xbf16>, vector<8x128xf32> -> vector<8x128xf32>
    %546 = arith.addf %544, %545 : vector<8x128xf32>
    %547 = arith.mulf %546, %16 : vector<8x128xf32>
    %548 = math.tanh %547 : vector<8x128xf32>
    %549 = arith.mulf %548, %16 : vector<8x128xf32>
    %550 = arith.addf %549, %19 : vector<8x128xf32>
    %551 = vector.extract_strided_slice %550 {offsets = [0, 0], sizes = [8, 32], strides = [1, 1]} : vector<8x128xf32> to vector<8x32xf32>
    %552 = vector.extract_strided_slice %550 {offsets = [0, 32], sizes = [8, 32], strides = [1, 1]} : vector<8x128xf32> to vector<8x32xf32>
    %553 = vector.extract_strided_slice %550 {offsets = [0, 64], sizes = [8, 32], strides = [1, 1]} : vector<8x128xf32> to vector<8x32xf32>
    %554 = vector.extract_strided_slice %550 {offsets = [0, 96], sizes = [8, 32], strides = [1, 1]} : vector<8x128xf32> to vector<8x32xf32>
    %555 = arith.mulf %552, %539 : vector<8x32xf32>
    %556 = arith.mulf %551, %553 : vector<8x32xf32>
    %557 = arith.addf %555, %556 : vector<8x32xf32>
    %558 = math.tanh %557 : vector<8x32xf32>
    %559 = arith.mulf %554, %558 : vector<8x32xf32>
    %560 = arith.truncf %559 : vector<8x32xf32> to vector<8x32xbf16>
    %c0_113 = arith.constant 0 : index
    %c928 = arith.constant 928 : index
    %561 = vector.load %arg12[%c0_113, %c928] : memref<8x1024xf32, #tpu.memory_space<vmem>>, vector<8x32xf32>
    tpu.vector_store %arg12[%c0_113, %c928], %559 {strides = array<i32>} : memref<8x1024xf32, #tpu.memory_space<vmem>>, vector<8x32xf32>,
    %c240 = arith.constant 240 : index
    %c0_114 = arith.constant 0 : index
    %562 = vector.load %arg11[%c240, %c0_114] : memref<256x128xf32, #tpu.memory_space<vmem>>, vector<8x128xf32>
    %cst_115 = arith.constant dense<0.000000e+00> : vector<8x128xf32>
    %563 = tpu.matmul %560, %0, %cst_115 {dimension_numbers = #tpu.dot_dimension_numbers<[1], [0], [0], [1], [0, 0, 1, 1], [], []>} : vector<8x32xbf16>, vector<32x128xbf16>, vector<8x128xf32> -> vector<8x128xf32>
    %564 = arith.addf %562, %563 : vector<8x128xf32>
    %565 = arith.mulf %564, %16 : vector<8x128xf32>
    %566 = math.tanh %565 : vector<8x128xf32>
    %567 = arith.mulf %566, %16 : vector<8x128xf32>
    %568 = arith.addf %567, %19 : vector<8x128xf32>
    %569 = vector.extract_strided_slice %568 {offsets = [0, 0], sizes = [8, 32], strides = [1, 1]} : vector<8x128xf32> to vector<8x32xf32>
    %570 = vector.extract_strided_slice %568 {offsets = [0, 32], sizes = [8, 32], strides = [1, 1]} : vector<8x128xf32> to vector<8x32xf32>
    %571 = vector.extract_strided_slice %568 {offsets = [0, 64], sizes = [8, 32], strides = [1, 1]} : vector<8x128xf32> to vector<8x32xf32>
    %572 = vector.extract_strided_slice %568 {offsets = [0, 96], sizes = [8, 32], strides = [1, 1]} : vector<8x128xf32> to vector<8x32xf32>
    %573 = arith.mulf %570, %557 : vector<8x32xf32>
    %574 = arith.mulf %569, %571 : vector<8x32xf32>
    %575 = arith.addf %573, %574 : vector<8x32xf32>
    %576 = math.tanh %575 : vector<8x32xf32>
    %577 = arith.mulf %572, %576 : vector<8x32xf32>
    %578 = arith.truncf %577 : vector<8x32xf32> to vector<8x32xbf16>
    %c0_116 = arith.constant 0 : index
    %c960 = arith.constant 960 : index
    %579 = vector.load %arg12[%c0_116, %c960] : memref<8x1024xf32, #tpu.memory_space<vmem>>, vector<8x32xf32>
    tpu.vector_store %arg12[%c0_116, %c960], %577 {strides = array<i32>} : memref<8x1024xf32, #tpu.memory_space<vmem>>, vector<8x32xf32>,
    %c248 = arith.constant 248 : index
    %c0_117 = arith.constant 0 : index
    %580 = vector.load %arg11[%c248, %c0_117] : memref<256x128xf32, #tpu.memory_space<vmem>>, vector<8x128xf32>
    %cst_118 = arith.constant dense<0.000000e+00> : vector<8x128xf32>
    %581 = tpu.matmul %578, %0, %cst_118 {dimension_numbers = #tpu.dot_dimension_numbers<[1], [0], [0], [1], [0, 0, 1, 1], [], []>} : vector<8x32xbf16>, vector<32x128xbf16>, vector<8x128xf32> -> vector<8x128xf32>
    %582 = arith.addf %580, %581 : vector<8x128xf32>
    %583 = arith.mulf %582, %16 : vector<8x128xf32>
    %584 = math.tanh %583 : vector<8x128xf32>
    %585 = arith.mulf %584, %16 : vector<8x128xf32>
    %586 = arith.addf %585, %19 : vector<8x128xf32>
    %587 = vector.extract_strided_slice %586 {offsets = [0, 0], sizes = [8, 32], strides = [1, 1]} : vector<8x128xf32> to vector<8x32xf32>
    %588 = vector.extract_strided_slice %586 {offsets = [0, 32], sizes = [8, 32], strides = [1, 1]} : vector<8x128xf32> to vector<8x32xf32>
    %589 = vector.extract_strided_slice %586 {offsets = [0, 64], sizes = [8, 32], strides = [1, 1]} : vector<8x128xf32> to vector<8x32xf32>
    %590 = vector.extract_strided_slice %586 {offsets = [0, 96], sizes = [8, 32], strides = [1, 1]} : vector<8x128xf32> to vector<8x32xf32>
    %591 = arith.mulf %588, %575 : vector<8x32xf32>
    %592 = arith.mulf %587, %589 : vector<8x32xf32>
    %593 = arith.addf %591, %592 : vector<8x32xf32>
    %594 = math.tanh %593 : vector<8x32xf32>
    %595 = arith.mulf %590, %594 : vector<8x32xf32>
    %c0_119 = arith.constant 0 : index
    %c992 = arith.constant 992 : index
    %596 = vector.load %arg12[%c0_119, %c992] : memref<8x1024xf32, #tpu.memory_space<vmem>>, vector<8x32xf32>
    tpu.vector_store %arg12[%c0_119, %c992], %595 {strides = array<i32>} : memref<8x1024xf32, #tpu.memory_space<vmem>>, vector<8x32xf32>,
    %c0_120 = arith.constant 0 : index
    %c0_121 = arith.constant 0 : index
    %597 = vector.load %arg12[%c0_120, %c0_121] : memref<8x1024xf32, #tpu.memory_space<vmem>>, vector<8x1024xf32>
    %598 = arith.truncf %597 : vector<8x1024xf32> to vector<8x1024xbf16>
    %c0_122 = arith.constant 0 : index
    %c0_123 = arith.constant 0 : index
    %599 = vector.load %arg4[%c0_122, %c0_123] : memref<1024x32xbf16, #tpu.memory_space<vmem>>, vector<1024x32xbf16>
    %cst_124 = arith.constant dense<0.000000e+00> : vector<8x32xf32>
    %600 = tpu.matmul %598, %599, %cst_124 {dimension_numbers = #tpu.dot_dimension_numbers<[1], [0], [0], [1], [0, 0, 1, 1], [], []>} : vector<8x1024xbf16>, vector<1024x32xbf16>, vector<8x32xf32> -> vector<8x32xf32>
    %c0_125 = arith.constant 0 : index
    %c0_126 = arith.constant 0 : index
    %601 = vector.load %arg5[%c0_125, %c0_126] : memref<1x32xf32, #tpu.memory_space<vmem>>, vector<1x32xf32>
    %602 = vector.broadcast %601 : vector<1x32xf32> to vector<8x32xf32>
    %603 = arith.addf %600, %602 : vector<8x32xf32>
    %cst_127 = arith.constant 0.000000e+00 : f32
    %604 = vector.broadcast %cst_127 : f32 to vector<8x32xf32>
    %605 = arith.maximumf %603, %604 : vector<8x32xf32>
    %606 = arith.truncf %605 : vector<8x32xf32> to vector<8x32xbf16>
    %c0_128 = arith.constant 0 : index
    %c0_129 = arith.constant 0 : index
    %607 = vector.load %arg6[%c0_128, %c0_129] : memref<32x32xbf16, #tpu.memory_space<vmem>>, vector<32x32xbf16>
    %cst_130 = arith.constant dense<0.000000e+00> : vector<8x32xf32>
    %608 = tpu.matmul %606, %607, %cst_130 {dimension_numbers = #tpu.dot_dimension_numbers<[1], [0], [0], [1], [0, 0, 1, 1], [], []>} : vector<8x32xbf16>, vector<32x32xbf16>, vector<8x32xf32> -> vector<8x32xf32>
    %c0_131 = arith.constant 0 : index
    %c0_132 = arith.constant 0 : index
    %609 = vector.load %arg7[%c0_131, %c0_132] : memref<1x32xf32, #tpu.memory_space<vmem>>, vector<1x32xf32>
    %610 = vector.broadcast %609 : vector<1x32xf32> to vector<8x32xf32>
    %611 = arith.addf %608, %610 : vector<8x32xf32>
    %cst_133 = arith.constant 0.000000e+00 : f32
    %612 = vector.broadcast %cst_133 : f32 to vector<8x32xf32>
    %613 = arith.maximumf %611, %612 : vector<8x32xf32>
    %614 = arith.truncf %613 : vector<8x32xf32> to vector<8x32xbf16>
    %c0_134 = arith.constant 0 : index
    %c0_135 = arith.constant 0 : index
    %615 = vector.load %arg8[%c0_134, %c0_135] : memref<32x8xbf16, #tpu.memory_space<vmem>>, vector<32x8xbf16>
    %cst_136 = arith.constant dense<0.000000e+00> : vector<8x8xf32>
    %616 = tpu.matmul %614, %615, %cst_136 {dimension_numbers = #tpu.dot_dimension_numbers<[1], [0], [0], [1], [0, 0, 1, 1], [], []>} : vector<8x32xbf16>, vector<32x8xbf16>, vector<8x8xf32> -> vector<8x8xf32>
    %c0_137 = arith.constant 0 : index
    %c0_138 = arith.constant 0 : index
    %617 = vector.load %arg9[%c0_137, %c0_138] : memref<1x8xf32, #tpu.memory_space<vmem>>, vector<1x8xf32>
    %618 = vector.broadcast %617 : vector<1x8xf32> to vector<8x8xf32>
    %619 = arith.addf %616, %618 : vector<8x8xf32>
    %620 = vector.extract_strided_slice %619 {offsets = [0, 0], sizes = [2, 8], strides = [1, 1]} : vector<8x8xf32> to vector<2x8xf32>
    %c0_139 = arith.constant 0 : index
    %c0_140 = arith.constant 0 : index
    %621 = vector.load %arg10[%c0_139, %c0_140] : memref<2x8xf32, #tpu.memory_space<vmem>>, vector<2x8xf32>
    tpu.vector_store %arg10[%c0_139, %c0_140], %620 {strides = array<i32>} : memref<2x8xf32, #tpu.memory_space<vmem>>, vector<2x8xf32>,
    return
  }
}

</mosaic_0001>

<bundles_post_ra>
// kernel: lstm_module_forward.1
= control target key start
LH: loop header
LB: loop body
LE: loop exit
PB: predicated region body
PF: predicated region fallthrough
CT: control target
= control target key end

     0   :  { %vm178_vm0 = vcmask 1043456   ;;  %vm81_vm1 = vcmask 31744   ;;  %v4592_v2 = vmov 0.0   ;;  %vm4593_vm2 = vmmov 0   ;;  %s5826_s0 = inlined_call_operand.vmem [shape: f32[256,4], index: 0, kind: input, shape index: {}]   ;;  %s5827_s1 = inlined_call_operand.vmem [shape: f32[4,128], index: 1, kind: input, shape index: {}]   ;;  %s5828_s2 = inlined_call_operand.vmem [shape: bf16[32,128], index: 2, kind: input, shape index: {}]   ;;  %s5829_s3 = inlined_call_operand.vmem [shape: f32[1,128], index: 3, kind: input, shape index: {}]   ;;  %s5830_s4 = inlined_call_operand.vmem [shape: bf16[1024,32], index: 4, kind: input, shape index: {}]   ;;  %s5831_s5 = inlined_call_operand.vmem [shape: f32[1,32], index: 5, kind: input, shape index: {}]   ;;  %s5832_s6 = inlined_call_operand.vmem [shape: bf16[32,32], index: 6, kind: input, shape index: {}]   ;;  %s5833_s7 = inlined_call_operand.vmem [shape: f32[1,32], index: 7, kind: input, shape index: {}]   ;;  %s5834_s8 = inlined_call_operand.vmem [shape: bf16[32,8], index: 8, kind: input, shape index: {}]   ;;  %s5835_s9 = inlined_call_operand.vmem [shape: f32[1,8], index: 9, kind: input, shape index: {}]   ;;  %s5836_s10 = inlined_call_operand.hbm [shape: f32[2,8], index: 10, kind: output, shape index: {}]  }
   0x1   :  { %v73_v0 = vld [vmem:[%s5827_s1] sm:$0xf]  ;;  %4086 = vmatprep.subr.bf16.mxu1 %v4592_v2  ;;  %v4665_v3 = vld [vmem:[%s5828_s2 + $0x8] sm:$0xff]   ;;  %4090 = vmatprep.mubr.msk.bf16.mxu1 %vm4593_vm2, %v4592_v2  ;;  %v4594_v6 = vmov 0  }
   0x2   :  { %v41_v1 = vld [vmem:[%s5826_s0] sm:$0xff]  ;;  %4036 = vmatprep.subr.msk.mxu0 %vm178_vm0, %v73_v0  ;;  %v42_v4 = vld [vmem:[%s5826_s0 + $0x8] sm:$0xff]  ;;  %4087 = vmatpush3.bf16.msra.mxu1 %v4665_v3 }
   0x3   :  { %4037 = vmatpush3.msk.msra.mxu0 %vm178_vm0, %v73_v0  ;;  %4038 = vmatprep.mubr.msk.f32.mxu0 %vm81_vm1, %v41_v1  ;;  %v4676_v5 = vld [vmem:[%s5828_s2] sm:$0xff]  }
   0x4   :  { %4039 = vmatmul.mubr.msk.f32.vlgmr.msra.gmra.mxu0 %vm81_vm1, %v42_v4  ;;  %4088 = vmatprep.subr.bf16.mxu1 %v4592_v2 }
   0x5   :  { %4150 = vmatprep.subr.bf16.mxu0 %v4592_v2 }
   0x6   :  { %4151 = vmatpush3.bf16.msra.mxu0 %v4665_v3  ;;  %4089 = vmatpush3.bf16.msra.mxu1 %v4676_v5 }
   0x7   :  { %4152 = vmatprep.subr.bf16.mxu0 %v4592_v2  ;;  %4094 = vmatprep.subr.bf16.mxu1 %v4592_v2 }
   0x9   :  { %4091 = vmatmul.mubr.bf16.vlgmr.msra.gmra.mxu1 %v4594_v6 }
   0xa   :  { %4153 = vmatpush3.bf16.msra.mxu0 %v4676_v5  ;;  %4095 = vmatpush3.bf16.msra.mxu1 %v4665_v3 }
   0xb   :  { %4098 = vmatprep.mubr.msk.bf16.mxu1 %vm4593_vm2, %v4592_v2  ;;  %4096 = vmatprep.subr.bf16.mxu1 %v4592_v2 }
   0xc   :  { %4166 = vmatprep.subr.bf16.mxu0 %v4592_v2 }
   0xe   :  { %4097 = vmatpush3.bf16.msra.mxu1 %v4676_v5 }
   0xf   :  { %4102 = vmatprep.subr.bf16.mxu1 %v4592_v2 }
  0x10   :  { %15 = vsyncpa [#allocation5], 0  ;;  %v439_v7 = vlaneseq  ;;  %v4697_v10 = vld [vmem:[%s5829_s3] ss:$0 sm:$0xff]  ;;  %v4595_v13 = vmov 0.5   ;;  %s4596_s24 = smov 64  }
  0x11   :  { %s4597_s25 = smov 32   ;;  %vm459_vm6 = vcmask 261120   ;;  %v43_v50 = vld [vmem:[%s5826_s0 + $0x10] sm:$0xff]  ;;  %v44_v51 = vld [vmem:[%s5826_s0 + $0x18] sm:$0xff]  ;;  %vm605_vm7 = vcmask 523520   ;;  %vm681_vm8 = vcmask 785920  }
  0x12   :  { %v440_v8 = vand.u32 127, %v439_v7  ;;  %4041 = vmatprep.mubr.msk.f32.mxu0 %vm81_vm1, %v43_v50  ;;  %vm753_vm9 = vcmask 1048320   ;;  %s4599_s22 = smov [#allocation4]   ;;  %vm3657_vm10 = vcmask 58368  }
  0x13   :  { %4042 = vmatmul.mubr.msk.f32.gmra.mxu0 %vm81_vm1, %v44_v51 }
  0x14   :  { %vm441_vm3 = vcmp.ge.s32.totalorder %v440_v8, 64  ;;  %vm442_vm4 = vcmp.lt.s32.totalorder %v440_v8, 96 }
  0x15   :  { %vm443_vm5 = vmand %vm441_vm3, %vm442_vm4 }
  0x16   :  { %v4700_v14 = vsel %vm443_vm5, 1.0, %v4595_v13  ;;  %v4703_v22 = vsel %vm443_vm5, 0.0, %v4595_v13 }
  0xc4   :  { %v4040_v9 = vpop.f32.mrf.mxu0 }
  0xc5   :  { %v254_v35 = vadd.f32 %v4040_v9, %v4697_v10 }
  0xc6   :  { %v248_v11 = vpop.f32.mrf.mxu0 }
  0xc7   :  { %v249_v12 = vadd.f32 %v4697_v10, %v248_v11 }
  0xc9   :  { %v497_v15 = vpop.f32.mrf.mxu1 }
  0xca   :  { %v503_v16 = vadd.f32 %v497_v15, %v249_v12 }
  0xcb   :  { %v4092_v17 = vpop.f32.mrf.mxu1 }
  0xcc   :  { %v504_v18 = vmul.f32 %v503_v16, %v4700_v14 }
  0xcd   :  { %v500_v19 = vpop.f32.mrf.mxu1 }
  0xce   :  { %4436 = vtanh.f32 %v504_v18 }
  0xcf   :  { %v4093_v20 = vpop.f32.mrf.mxu1 }
  0xd3   :  { %v4043_v57 = vpop.f32.mrf.mxu0 }
  0xd4   :  { %v264_v20 = vadd.f32 %v4043_v57, %v4697_v10 }
  0xd5   :  { %v258_v58 = vpop.f32.mrf.mxu0 }
  0xd6   :  { %v259_v59 = vadd.f32 %v4697_v10, %v258_v58 }
  0xdb   :  { %v4437_v21 = vpop.eup %4436 }
  0xdc   :  { %v506_v23 = vmul.f32 %v4437_v21, %v4700_v14 }
  0xde   :  { %v507_v24 = vadd.f32 %v506_v23, %v4703_v22 }
  0xe0   :  { %510 = vrot.lane.b32.xlu0 %v507_v24, %s4596_s24  ;;  %v508_v27 = vmul.f32 0.0, %v507_v24 }
 0x152   :  { %v511_v25 = vpop.permute.xlu0 %510 }
 0x153   :  { %v513_v26 = vmul.f32 %v511_v25, %v507_v24 }
 0x155   :  { %515 = vrot.lane.b32.xlu0 %v513_v26, %s4597_s25 }
 0x1c7   :  { %v516_v28 = vpop.permute.xlu0 %515 }
 0x1c8   :  { %v518_v29 = vadd.f32 %v516_v28, %v508_v27 }
 0x1ca   :  { %4438 = vtanh.f32 %v518_v29 }
 0x1d7   :  { %v4439_v30 = vpop.eup %4438 }
 0x1d8   :  { %521 = vrot.lane.b32.xlu1 %v4439_v30, %s4596_s24 }
 0x24a   :  { %v522_v31 = vpop.permute.xlu1 %521 }
 0x24b   :  { %v4710_v32 = vmul.f32 %v522_v31, %v507_v24 }
 0x24d   :  { %v525_v33 = vpack.c.bf16 %v4710_v32, %v4710_v32 }
 0x24f   :  { %533 = vrot.lane.b32.xlu1 %v525_v33, %s4597_s25 }
 0x2c1   :  { %v534_v34 = vpop.permute.xlu1 %533 }
 0x2c2   :  { %4099 = vmatmul.mubr.msk.bf16.vlgmr.msra.gmra.mxu1 %vm459_vm6, %v534_v34 }
 0x2c3   :  { %4103 = vmatpush3.bf16.msra.mxu1 %v4665_v3  ;;  %4106 = vmatprep.mubr.msk.bf16.mxu1 %vm4593_vm2, %v4592_v2 }
 0x2c4   :  { %4104 = vmatprep.subr.bf16.mxu1 %v4592_v2 }
 0x2c7   :  { %4105 = vmatpush3.bf16.msra.mxu1 %v4676_v5 }
 0x2c8   :  { %4110 = vmatprep.subr.bf16.mxu1 %v4592_v2 }
 0x382   :  { %v572_v36 = vpop.f32.mrf.mxu1 }
 0x383   :  { %v578_v37 = vadd.f32 %v572_v36, %v254_v35 }
 0x384   :  { %v4100_v38 = vpop.f32.mrf.mxu1 }
 0x385   :  { %v579_v39 = vmul.f32 %v578_v37, %v4700_v14  ;;  %v45_v37 = vld [vmem:[%s5826_s0 + $0x20] sm:$0xff]  ;;  %v46_v38 = vld [vmem:[%s5826_s0 + $0x28] sm:$0xff] }
 0x386   :  { %v575_v40 = vpop.f32.mrf.mxu1  ;;  %4044 = vmatprep.mubr.msk.f32.mxu0 %vm81_vm1, %v45_v37 }
 0x387   :  { %4440 = vtanh.f32 %v579_v39  ;;  %4045 = vmatmul.mubr.msk.f32.gmra.mxu0 %vm81_vm1, %v46_v38 }
 0x388   :  { %v4101_v41 = vpop.f32.mrf.mxu1 }
 0x394   :  { %v4441_v42 = vpop.eup %4440 }
 0x395   :  { %v581_v43 = vmul.f32 %v4441_v42, %v4700_v14 }
 0x397   :  { %v582_v44 = vadd.f32 %v581_v43, %v4703_v22 }
 0x399   :  { %585 = vrot.lane.b32.xlu0 %v582_v44, %s4596_s24  ;;  %v583_v47 = vmul.f32 %v582_v44, %v518_v29 }
 0x40b   :  { %v586_v45 = vpop.permute.xlu0 %585 }
 0x40c   :  { %v588_v46 = vmul.f32 %v586_v45, %v582_v44 }
 0x40e   :  { %590 = vrot.lane.b32.xlu1 %v588_v46, %s4597_s25 }
 0x480   :  { %v591_v48 = vpop.permute.xlu1 %590 }
 0x481   :  { %v593_v49 = vadd.f32 %v591_v48, %v583_v47 }
 0x483   :  { %4442 = vtanh.f32 %v593_v49 }
 0x490   :  { %v4443_v52 = vpop.eup %4442 }
 0x491   :  { %596 = vrot.lane.b32.xlu0 %v4443_v52, %s4596_s24 }
 0x503   :  { %v597_v53 = vpop.permute.xlu0 %596 }
 0x504   :  { %v4737_v54 = vmul.f32 %v597_v53, %v582_v44  ;;  %v4046_v44 = vpop.f32.mrf.mxu0 }
 0x506   :  { %v600_v55 = vpack.c.bf16 %v4737_v54, %v4737_v54  ;;  %v268_v45 = vpop.f32.mrf.mxu0 }
 0x507   :  { %v269_v46 = vadd.f32 %v4697_v10, %v268_v45 }
 0x508   :  { %609 = vrot.lane.b32.xlu1 %v600_v55, %s4597_s25 }
 0x57a   :  { %v610_v56 = vpop.permute.xlu1 %609 }
 0x57b   :  { %4107 = vmatmul.mubr.msk.bf16.vlgmr.msra.gmra.mxu1 %vm459_vm6, %v610_v56 }
 0x57c   :  { %4111 = vmatpush3.bf16.msra.mxu1 %v4665_v3  ;;  %4114 = vmatprep.mubr.msk.bf16.mxu1 %vm4593_vm2, %v4592_v2 }
 0x57d   :  { %4112 = vmatprep.subr.bf16.mxu1 %v4592_v2 }
 0x580   :  { %4113 = vmatpush3.bf16.msra.mxu1 %v4676_v5 }
 0x581   :  { %4118 = vmatprep.subr.bf16.mxu1 %v4592_v2 }
 0x63b   :  { %v648_v60 = vpop.f32.mrf.mxu1 }
 0x63c   :  { %v654_v61 = vadd.f32 %v648_v60, %v259_v59 }
 0x63d   :  { %v4108_v62 = vpop.f32.mrf.mxu1 }
 0x63e   :  { %v655_v63 = vmul.f32 %v654_v61, %v4700_v14 }
 0x63f   :  { %v651_v0 = vpop.f32.mrf.mxu1 }
 0x640   :  { %4444 = vtanh.f32 %v655_v63 }
 0x641   :  { %v4109_v1 = vpop.f32.mrf.mxu1 }
 0x64d   :  { %v4445_v4 = vpop.eup %4444 }
 0x64e   :  { %v657_v6 = vmul.f32 %v4445_v4, %v4700_v14 }
 0x650   :  { %v658_v7 = vadd.f32 %v657_v6, %v4703_v22  ;;  %v274_v6 = vadd.f32 %v4046_v44, %v4697_v10 }
 0x652   :  { %661 = vrot.lane.b32.xlu0 %v658_v7, %s4596_s24  ;;  %v659_v11 = vmul.f32 %v658_v7, %v593_v49 }
 0x6c4   :  { %v662_v8 = vpop.permute.xlu0 %661 }
 0x6c5   :  { %v664_v9 = vmul.f32 %v662_v8, %v658_v7 }
 0x6c7   :  { %666 = vrot.lane.b32.xlu1 %v664_v9, %s4597_s25 }
 0x739   :  { %v667_v12 = vpop.permute.xlu1 %666 }
 0x73a   :  { %v669_v13 = vadd.f32 %v667_v12, %v659_v11 }
 0x73c   :  { %4446 = vtanh.f32 %v669_v13 }
 0x749   :  { %v4447_v15 = vpop.eup %4446 }
 0x74a   :  { %672 = vrot.lane.b32.xlu0 %v4447_v15, %s4596_s24 }
 0x7bc   :  { %v673_v16 = vpop.permute.xlu0 %672 }
 0x7bd   :  { %v4756_v17 = vmul.f32 %v673_v16, %v658_v7 }
 0x7bf   :  { %v676_v18 = vpack.c.bf16 %v4756_v17, %v4756_v17 }
 0x7c1   :  { %685 = vrot.lane.b32.xlu1 %v676_v18, %s4597_s25 }
 0x833   :  { %v686_v19 = vpop.permute.xlu1 %685 }
 0x834   :  { %4115 = vmatmul.mubr.msk.bf16.vlgmr.msra.gmra.mxu1 %vm459_vm6, %v686_v19 }
 0x835   :  { %4119 = vmatpush3.bf16.msra.mxu1 %v4665_v3  ;;  %4122 = vmatprep.mubr.msk.bf16.mxu1 %vm4593_vm2, %v4592_v2 }
 0x836   :  { %4120 = vmatprep.subr.bf16.mxu1 %v4592_v2 }
 0x839   :  { %4121 = vmatpush3.bf16.msra.mxu1 %v4676_v5 }
 0x83a   :  { %4126 = vmatprep.subr.bf16.mxu1 %v4592_v2 }
 0x8f4   :  { %v724_v21 = vpop.f32.mrf.mxu1 }
 0x8f5   :  { %v730_v23 = vadd.f32 %v724_v21, %v264_v20 }
 0x8f6   :  { %v4116_v24 = vpop.f32.mrf.mxu1 }
 0x8f7   :  { %v731_v25 = vmul.f32 %v730_v23, %v4700_v14 }
 0x8f8   :  { %v727_v26 = vpop.f32.mrf.mxu1 }
 0x8f9   :  { %4448 = vtanh.f32 %v731_v25  ;;  %v47_v25 = vld [vmem:[%s5826_s0 + $0x30] sm:$0xff]  ;;  %v48_v26 = vld [vmem:[%s5826_s0 + $0x38] sm:$0xff] }
 0x8fa   :  { %v4117_v27 = vpop.f32.mrf.mxu1  ;;  %4047 = vmatprep.mubr.msk.f32.mxu0 %vm81_vm1, %v47_v25  ;;  %v57_v25 = vld [vmem:[%s5826_s0 + $0x80] sm:$0xff] }
 0x8fb   :  { %4048 = vmatmul.mubr.msk.f32.gmra.mxu0 %vm81_vm1, %v48_v26  ;;  %v58_v26 = vld [vmem:[%s5826_s0 + $0x88] sm:$0xff] }
 0x906   :  { %v4449_v28 = vpop.eup %4448 }
 0x907   :  { %v733_v29 = vmul.f32 %v4449_v28, %v4700_v14 }
 0x909   :  { %v734_v30 = vadd.f32 %v733_v29, %v4703_v22 }
 0x90b   :  { %737 = vrot.lane.b32.xlu0 %v734_v30, %s4596_s24  ;;  %v735_v34 = vmul.f32 %v734_v30, %v669_v13 }
 0x97d   :  { %v738_v31 = vpop.permute.xlu0 %737 }
 0x97e   :  { %v740_v33 = vmul.f32 %v738_v31, %v734_v30 }
 0x980   :  { %742 = vrot.lane.b32.xlu1 %v740_v33, %s4597_s25 }
 0x9bb   :  { %v4049_v33 = vpop.f32.mrf.mxu0 }
 0x9f2   :  { %v743_v35 = vpop.permute.xlu1 %742 }
 0x9f3   :  { %v745_v36 = vadd.f32 %v743_v35, %v735_v34  ;;  %v278_v34 = vpop.f32.mrf.mxu0 }
 0x9f4   :  { %v279_v35 = vadd.f32 %v4697_v10, %v278_v34  ;;  %v64_v34 = vld [vmem:[%s5826_s0 + $0xb8] sm:$0xff] }
 0x9f5   :  { %4450 = vtanh.f32 %v745_v36 }
 0xa02   :  { %v4451_v39 = vpop.eup %4450 }
 0xa03   :  { %748 = vrot.lane.b32.xlu0 %v4451_v39, %s4596_s24 }
 0xa75   :  { %v749_v40 = vpop.permute.xlu0 %748 }
 0xa76   :  { %v4783_v41 = vmul.f32 %v749_v40, %v734_v30 }
 0xa78   :  { %v752_v42 = vpack.c.bf16 %v4783_v41, %v4783_v41 }
 0xa7a   :  { %757 = vrot.lane.b32.xlu1 %v752_v42, %s4597_s25 }
 0xaec   :  { %v758_v43 = vpop.permute.xlu1 %757 }
 0xaed   :  { %4123 = vmatmul.mubr.msk.bf16.vlgmr.msra.gmra.mxu1 %vm459_vm6, %v758_v43 }
 0xaee   :  { %4127 = vmatpush3.bf16.msra.mxu1 %v4665_v3  ;;  %4130 = vmatprep.mubr.msk.bf16.mxu1 %vm4593_vm2, %v4592_v2 }
 0xaef   :  { %4128 = vmatprep.subr.bf16.mxu1 %v4592_v2 }
 0xaf2   :  { %4129 = vmatpush3.bf16.msra.mxu1 %v4676_v5 }
 0xaf3   :  { %4134 = vmatprep.subr.bf16.mxu1 %v4592_v2 }
 0xbad   :  { %v796_v47 = vpop.f32.mrf.mxu1 }
 0xbae   :  { %v802_v48 = vadd.f32 %v796_v47, %v269_v46 }
 0xbaf   :  { %v4124_v49 = vpop.f32.mrf.mxu1 }
 0xbb0   :  { %v803_v50 = vmul.f32 %v802_v48, %v4700_v14 }
 0xbb1   :  { %v799_v51 = vpop.f32.mrf.mxu1 }
 0xbb2   :  { %4452 = vtanh.f32 %v803_v50 }
 0xbb3   :  { %v4125_v52 = vpop.f32.mrf.mxu1 }
 0xbbf   :  { %v4453_v53 = vpop.eup %4452 }
 0xbc0   :  { %v805_v55 = vmul.f32 %v4453_v53, %v4700_v14 }
 0xbc2   :  { %v806_v56 = vadd.f32 %v805_v55, %v4703_v22 }
 0xbc4   :  { %809 = vrot.lane.b32.xlu0 %v806_v56, %s4596_s24  ;;  %v807_v59 = vmul.f32 %v806_v56, %v745_v36 }
 0xc36   :  { %v810_v57 = vpop.permute.xlu0 %809 }
 0xc37   :  { %v812_v58 = vmul.f32 %v810_v57, %v806_v56  ;;  %v284_v57 = vadd.f32 %v4049_v33, %v4697_v10  ;;  %v63_v33 = vld [vmem:[%s5826_s0 + $0xb0] sm:$0xff] }
 0xc39   :  { %814 = vrot.lane.b32.xlu1 %v812_v58, %s4597_s25 }
 0xcab   :  { %v815_v60 = vpop.permute.xlu1 %814 }
 0xcac   :  { %v817_v61 = vadd.f32 %v815_v60, %v807_v59 }
 0xcae   :  { %4454 = vtanh.f32 %v817_v61 }
 0xcbb   :  { %v4455_v62 = vpop.eup %4454 }
 0xcbc   :  { %820 = vrot.lane.b32.xlu0 %v4455_v62, %s4596_s24 }
 0xd2e   :  { %v821_v63 = vpop.permute.xlu0 %820 }
 0xd2f   :  { %v4802_v0 = vmul.f32 %v821_v63, %v806_v56 }
 0xd31   :  { %v824_v1 = vpack.c.bf16 %v4802_v0, %v4802_v0 }
 0xd33   :  { %832 = vrot.lane.b32.xlu1 %v824_v1, %s4597_s25 }
 0xda5   :  { %v833_v4 = vpop.permute.xlu1 %832 }
 0xda6   :  { %4131 = vmatmul.mubr.msk.bf16.vlgmr.msra.gmra.mxu1 %vm459_vm6, %v833_v4 }
 0xda7   :  { %4135 = vmatpush3.bf16.msra.mxu1 %v4665_v3  ;;  %4138 = vmatprep.mubr.msk.bf16.mxu1 %vm4593_vm2, %v4592_v2 }
 0xda8   :  { %4136 = vmatprep.subr.bf16.mxu1 %v4592_v2 }
 0xdab   :  { %4137 = vmatpush3.bf16.msra.mxu1 %v4676_v5 }
 0xdac   :  { %4142 = vmatprep.subr.bf16.mxu1 %v4592_v2 }
 0xe66   :  { %v871_v7 = vpop.f32.mrf.mxu1 }
 0xe67   :  { %v877_v8 = vadd.f32 %v871_v7, %v274_v6 }
 0xe68   :  { %v4132_v9 = vpop.f32.mrf.mxu1 }
 0xe69   :  { %v878_v11 = vmul.f32 %v877_v8, %v4700_v14 }
 0xe6a   :  { %v874_v12 = vpop.f32.mrf.mxu1 }
 0xe6b   :  { %4456 = vtanh.f32 %v878_v11 }
 0xe6c   :  { %v4133_v13 = vpop.f32.mrf.mxu1 }
 0xe6d   :  { %v49_v13 = vld [vmem:[%s5826_s0 + $0x40] sm:$0xff] }
 0xe6e   :  { %4050 = vmatprep.mubr.msk.f32.mxu0 %vm81_vm1, %v49_v13 }
 0xe78   :  { %v4457_v15 = vpop.eup %4456 }
 0xe79   :  { %v880_v16 = vmul.f32 %v4457_v15, %v4700_v14  ;;  %v50_v15 = vld [vmem:[%s5826_s0 + $0x48] sm:$0xff] }
 0xe7a   :  { %4051 = vmatmul.mubr.msk.f32.gmra.mxu0 %vm81_vm1, %v50_v15 }
 0xe7b   :  { %v881_v18 = vadd.f32 %v880_v16, %v4703_v22  ;;  %v51_v16 = vld [vmem:[%s5826_s0 + $0x50] sm:$0xff] }
 0xe7c   :  { %4053 = vmatprep.mubr.msk.f32.mxu0 %vm81_vm1, %v51_v16 }
 0xe7d   :  { %884 = vrot.lane.b32.xlu0 %v881_v18, %s4596_s24  ;;  %v882_v21 = vmul.f32 %v881_v18, %v817_v61 }
 0xeef   :  { %v885_v19 = vpop.permute.xlu0 %884 }
 0xef0   :  { %v887_v20 = vmul.f32 %v885_v19, %v881_v18  ;;  %v53_v19 = vld [vmem:[%s5826_s0 + $0x60] sm:$0xff] }
 0xef2   :  { %889 = vrot.lane.b32.xlu1 %v887_v20, %s4597_s25  ;;  %v54_v20 = vld [vmem:[%s5826_s0 + $0x68] sm:$0xff] }
 0xf64   :  { %v890_v23 = vpop.permute.xlu1 %889 }
 0xf65   :  { %v892_v24 = vadd.f32 %v890_v23, %v882_v21  ;;  %v55_v23 = vld [vmem:[%s5826_s0 + $0x70] sm:$0xff] }
 0xf67   :  { %4458 = vtanh.f32 %v892_v24 }
 0xf74   :  { %v4459_v27 = vpop.eup %4458 }
 0xf75   :  { %895 = vrot.lane.b32.xlu0 %v4459_v27, %s4596_s24  ;;  %v59_v27 = vld [vmem:[%s5826_s0 + $0x90] sm:$0xff] }
 0xfe7   :  { %v896_v28 = vpop.permute.xlu0 %895 }
 0xfe8   :  { %v4829_v29 = vmul.f32 %v896_v28, %v881_v18  ;;  %v52_v18 = vld [vmem:[%s5826_s0 + $0x58] sm:$0xff] }
 0xfe9   :  { %4054 = vmatmul.mubr.msk.f32.gmra.mxu0 %vm81_vm1, %v52_v18  ;;  %v60_v28 = vld [vmem:[%s5826_s0 + $0x98] sm:$0xff] }
 0xfea   :  { %v899_v30 = vpack.c.bf16 %v4829_v29, %v4829_v29  ;;  %4056 = vmatprep.mubr.msk.f32.mxu0 %vm81_vm1, %v53_v19 }
 0xfec   :  { %907 = vrot.lane.b32.xlu1 %v899_v30, %s4597_s25  ;;  %v61_v30 = vld [vmem:[%s5826_s0 + $0xa0] sm:$0xff] }
 0xfed   :  { %4057 = vmatmul.mubr.msk.f32.gmra.mxu0 %vm81_vm1, %v54_v20 }
 0xfee   :  { %4059 = vmatprep.mubr.msk.f32.mxu0 %vm81_vm1, %v55_v23 }
0x105e   :  { %v908_v31 = vpop.permute.xlu1 %907 }
0x105f   :  { %4139 = vmatmul.mubr.msk.bf16.vlgmr.msra.gmra.mxu1 %vm459_vm6, %v908_v31  ;;  %v62_v31 = vld [vmem:[%s5826_s0 + $0xa8] sm:$0xff] }
0x1060   :  { %4143 = vmatpush3.bf16.msra.mxu1 %v4665_v3  ;;  %4146 = vmatprep.mubr.msk.bf16.mxu1 %vm4593_vm2, %v4592_v2 }
0x1061   :  { %4144 = vmatprep.subr.bf16.mxu1 %v4592_v2 }
0x1064   :  { %4145 = vmatpush3.bf16.msra.mxu1 %v4676_v5 }
0x1065   :  { %4158 = vmatprep.subr.bf16.mxu1 %v4592_v2 }
0x111f   :  { %v946_v36 = vpop.f32.mrf.mxu1 }
0x1120   :  { %v952_v37 = vadd.f32 %v946_v36, %v279_v35  ;;  %v65_v35 = vld [vmem:[%s5826_s0 + $0xc0] sm:$0xff]  ;;  %v66_v36 = vld [vmem:[%s5826_s0 + $0xc8] sm:$0xff] }
0x1121   :  { %v4140_v38 = vpop.f32.mrf.mxu1 }
0x1122   :  { %v953_v39 = vmul.f32 %v952_v37, %v4700_v14  ;;  %v67_v37 = vld [vmem:[%s5826_s0 + $0xd0] sm:$0xff]  ;;  %v68_v38 = vld [vmem:[%s5826_s0 + $0xd8] sm:$0xff] }
0x1123   :  { %v949_v40 = vpop.f32.mrf.mxu1 }
0x1124   :  { %4460 = vtanh.f32 %v953_v39  ;;  %v69_v39 = vld [vmem:[%s5826_s0 + $0xe0] sm:$0xff]  ;;  %v70_v40 = vld [vmem:[%s5826_s0 + $0xe8] sm:$0xff] }
0x1125   :  { %v4141_v42 = vpop.f32.mrf.mxu1 }
0x1126   :  { %v71_v42 = vld [vmem:[%s5826_s0 + $0xf0] sm:$0xff] }
0x1131   :  { %v4461_v43 = vpop.eup %4460 }
0x1132   :  { %v955_v44 = vmul.f32 %v4461_v43, %v4700_v14  ;;  %v72_v43 = vld [vmem:[%s5826_s0 + $0xf8] sm:$0xff] }
0x1134   :  { %v956_v45 = vadd.f32 %v955_v44, %v4703_v22 }
0x1136   :  { %959 = vrot.lane.b32.xlu0 %v956_v45, %s4596_s24  ;;  %v957_v48 = vmul.f32 %v956_v45, %v892_v24  ;;  %v56_v24 = vld [vmem:[%s5826_s0 + $0x78] sm:$0xff] }
0x1137   :  { %4060 = vmatmul.mubr.msk.f32.gmra.mxu0 %vm81_vm1, %v56_v24 }
0x1138   :  { %4062 = vmatprep.mubr.msk.f32.mxu0 %vm81_vm1, %v57_v25 }
0x113b   :  { %4063 = vmatmul.mubr.msk.f32.gmra.mxu0 %vm81_vm1, %v58_v26 }
0x113c   :  { %4065 = vmatprep.mubr.msk.f32.mxu0 %vm81_vm1, %v59_v27 }
0x113f   :  { %4066 = vmatmul.mubr.msk.f32.gmra.mxu0 %vm81_vm1, %v60_v28 }
0x1140   :  { %4068 = vmatprep.mubr.msk.f32.mxu0 %vm81_vm1, %v61_v30 }
0x1143   :  { %4069 = vmatmul.mubr.msk.f32.gmra.mxu0 %vm81_vm1, %v62_v31 }
0x1144   :  { %4071 = vmatprep.mubr.msk.f32.mxu0 %vm81_vm1, %v63_v33 }
0x1147   :  { %4072 = vmatmul.mubr.msk.f32.gmra.mxu0 %vm81_vm1, %v64_v34 }
0x1148   :  { %4074 = vmatprep.mubr.msk.f32.mxu0 %vm81_vm1, %v65_v35 }
0x114b   :  { %4075 = vmatmul.mubr.msk.f32.gmra.mxu0 %vm81_vm1, %v66_v36 }
0x114c   :  { %4077 = vmatprep.mubr.msk.f32.mxu0 %vm81_vm1, %v67_v37 }
0x114f   :  { %4078 = vmatmul.mubr.msk.f32.gmra.mxu0 %vm81_vm1, %v68_v38 }
0x1150   :  { %4080 = vmatprep.mubr.msk.f32.mxu0 %vm81_vm1, %v69_v39  ;;  %v5050_v39 = vld [vmem:[%s5828_s2] sm:$0xff]  }
0x1153   :  { %4081 = vmatmul.mubr.msk.f32.gmra.mxu0 %vm81_vm1, %v70_v40 }
0x1154   :  { %4083 = vmatprep.mubr.msk.f32.mxu0 %vm81_vm1, %v71_v42 }
0x1157   :  { %4084 = vmatmul.mubr.msk.f32.gmra.mxu0 %vm81_vm1, %v72_v43 }
0x1158   :  { %4154 = vmatprep.mubr.msk.bf16.mxu0 %vm4593_vm2, %v4592_v2 }
0x11a8   :  { %v960_v46 = vpop.permute.xlu0 %959 }
0x11a9   :  { %v962_v47 = vmul.f32 %v960_v46, %v956_v45 }
0x11ab   :  { %964 = vrot.lane.b32.xlu1 %v962_v47, %s4597_s25 }
0x121d   :  { %v965_v49 = vpop.permute.xlu1 %964 }
0x121e   :  { %v967_v50 = vadd.f32 %v965_v49, %v957_v48  ;;  %v4052_v48 = vpop.f32.mrf.mxu0 }
0x121f   :  { %v294_v40 = vadd.f32 %v4052_v48, %v4697_v10 }
0x1220   :  { %4462 = vtanh.f32 %v967_v50  ;;  %v288_v49 = vpop.f32.mrf.mxu0 }
0x1221   :  { %v289_v15 = vadd.f32 %v4697_v10, %v288_v49 }
0x122d   :  { %v4463_v51 = vpop.eup %4462 }
0x122e   :  { %970 = vrot.lane.b32.xlu0 %v4463_v51, %s4596_s24 }
0x12a0   :  { %v971_v52 = vpop.permute.xlu0 %970 }
0x12a1   :  { %v4848_v53 = vmul.f32 %v971_v52, %v956_v45 }
0x12a3   :  { %v974_v55 = vpack.c.bf16 %v4848_v53, %v4848_v53 }
0x12a5   :  { %982 = vrot.lane.b32.xlu1 %v974_v55, %s4597_s25 }
0x1317   :  { %v983_v56 = vpop.permute.xlu1 %982 }
0x1318   :  { %4147 = vmatmul.mubr.msk.bf16.vlgmr.msra.gmra.mxu1 %vm459_vm6, %v983_v56 }
0x1319   :  { %4159 = vmatpush3.bf16.msra.mxu1 %v4665_v3  ;;  %4162 = vmatprep.mubr.msk.bf16.mxu1 %vm4593_vm2, %v4592_v2 }
0x131a   :  { %4160 = vmatprep.subr.bf16.mxu1 %v4592_v2 }
0x131d   :  { %4161 = vmatpush3.bf16.msra.mxu1 %v4676_v5 }
0x131e   :  { %4174 = vmatprep.subr.bf16.mxu1 %v4592_v2 }
0x13d8   :  { %v1021_v58 = vpop.f32.mrf.mxu1 }
0x13d9   :  { %v1027_v59 = vadd.f32 %v1021_v58, %v284_v57 }
0x13da   :  { %v4148_v60 = vpop.f32.mrf.mxu1 }
0x13db   :  { %v1028_v61 = vmul.f32 %v1027_v59, %v4700_v14 }
0x13dc   :  { %v1024_v62 = vpop.f32.mrf.mxu1 }
0x13dd   :  { %4464 = vtanh.f32 %v1028_v61 }
0x13de   :  { %v4149_v63 = vpop.f32.mrf.mxu1 }
0x13ea   :  { %v4465_v1 = vpop.eup %4464 }
0x13eb   :  { %v1030_v4 = vmul.f32 %v4465_v1, %v4700_v14 }
0x13ed   :  { %v1031_v6 = vadd.f32 %v1030_v4, %v4703_v22 }
0x13ef   :  { %1034 = vrot.lane.b32.xlu0 %v1031_v6, %s4596_s24  ;;  %v1032_v9 = vmul.f32 %v1031_v6, %v967_v50  ;;  %v4980_v50 = vpop.f32.mrf.mxu0 }
0x13f1   :  { %v4982_v51 = vpop.f32.mrf.mxu0 }
0x13f3   :  { %v4984_v52 = vpop.f32.mrf.mxu0 }
0x13f5   :  { %v4986_v55 = vpop.f32.mrf.mxu0 }
0x1461   :  { %v1035_v7 = vpop.permute.xlu0 %1034 }
0x1462   :  { %v1037_v8 = vmul.f32 %v1035_v7, %v1031_v6 }
0x1464   :  { %1039 = vrot.lane.b32.xlu1 %v1037_v8, %s4597_s25 }
0x14d6   :  { %v1040_v11 = vpop.permute.xlu1 %1039 }
0x14d7   :  { %v4866_v12 = vadd.f32 %v1040_v11, %v1032_v9 }
0x14d9   :  { %4466 = vtanh.f32 %v4866_v12 }
0x14e6   :  { %v4467_v21 = vpop.eup %4466 }
0x14e7   :  { %1045 = vrot.lane.b32.xlu0 %v4467_v21, %s4596_s24 }
0x1559   :  { %v1046_v44 = vpop.permute.xlu0 %1045 }
0x155a   :  { %v4968_v45 = vmul.f32 %v1046_v44, %v1031_v6 }
0x155c   :  { %v1049_v46 = vpack.c.bf16 %v4968_v45, %v4968_v45 }
0x155e   :  { %1053 = vrot.lane.b32.xlu1 %v1049_v46, %s4597_s25 }
0x15d0   :  { %v1054_v47 = vpop.permute.xlu1 %1053 }
0x15d1   :  { %4155 = vmatmul.mubr.msk.bf16.vlgmr.msra.gmra.mxu0 %vm459_vm6, %v1054_v47 }
0x15d2   :  { %4167 = vmatpush3.bf16.msra.mxu0 %v4665_v3  ;;  %4170 = vmatprep.mubr.msk.bf16.mxu0 %vm4593_vm2, %v4592_v2  ;;  %v4988_v3 = vpop.f32.mrf.mxu0 }
0x15d3   :  { %4168 = vmatprep.subr.bf16.mxu0 %v4592_v2 }
0x15d4   :  { %v4990_v56 = vpop.f32.mrf.mxu0 }
0x15d6   :  { %4169 = vmatpush3.bf16.msra.mxu0 %v4676_v5  ;;  %v4992_v57 = vpop.f32.mrf.mxu0 }
0x15d7   :  { %4182 = vmatprep.subr.bf16.mxu0 %v4592_v2 }
0x15d8   :  { %v4994_v58 = vpop.f32.mrf.mxu0 }
0x15da   :  { %v4996_v5 = vpop.f32.mrf.mxu0 }
0x15dc   :  { %v4998_v59 = vpop.f32.mrf.mxu0 }
0x15de   :  { %v5000_v60 = vpop.f32.mrf.mxu0 }
0x15e0   :  { %v5002_v61 = vpop.f32.mrf.mxu0 }
0x15e2   :  { %v5004_v62 = vpop.f32.mrf.mxu0 }
0x15e4   :  { %v5006_v63 = vpop.f32.mrf.mxu0 }
0x15e6   :  { %v5008_v1 = vpop.f32.mrf.mxu0 }
0x15e8   :  { %v5010_v4 = vpop.f32.mrf.mxu0 }
0x15ea   :  { %v5012_v6 = vpop.f32.mrf.mxu0 }
0x15ec   :  { %v5014_v7 = vpop.f32.mrf.mxu0 }
0x15ee   :  { %v5016_v8 = vpop.f32.mrf.mxu0 }
0x15f0   :  { %v5018_v9 = vpop.f32.mrf.mxu0 }
0x15f2   :  { %v5020_v11 = vpop.f32.mrf.mxu0 }
0x15f4   :  { %v5022_v13 = vpop.f32.mrf.mxu0 }
0x1691   :  { %v1092_v16 = vpop.f32.mrf.mxu0 }
0x1692   :  { %v1098_v18 = vadd.f32 %v1092_v16, %v289_v15 }
0x1693   :  { %v4156_v19 = vpop.f32.mrf.mxu0 }
0x1694   :  { %v1099_v20 = vmul.f32 %v1098_v18, %v4700_v14 }
0x1695   :  { %v1095_v21 = vpop.f32.mrf.mxu0 }
0x1696   :  { %4468 = vtanh.f32 %v1099_v20 }
0x1697   :  { %v4157_v23 = vpop.f32.mrf.mxu0 }
0x16a3   :  { %v4469_v24 = vpop.eup %4468 }
0x16a4   :  { %v1101_v25 = vmul.f32 %v4469_v24, %v4700_v14 }
0x16a6   :  { %v1102_v26 = vadd.f32 %v1101_v25, %v4703_v22 }
0x16a8   :  { %1105 = vrot.lane.b32.xlu0 %v1102_v26, %s4596_s24  ;;  %v1103_v30 = vmul.f32 %v1102_v26, %v4866_v12  ;;  %v5041_v12 = vld [vmem:[%s5828_s2 + $0x8] sm:$0xff]  }
0x171a   :  { %v1106_v27 = vpop.permute.xlu0 %1105 }
0x171b   :  { %v1108_v28 = vmul.f32 %v1106_v27, %v1102_v26 }
0x171d   :  { %1110 = vrot.lane.b32.xlu1 %v1108_v28, %s4597_s25 }
0x178f   :  { %v1111_v31 = vpop.permute.xlu1 %1110 }
0x1790   :  { %v1113_v33 = vadd.f32 %v1111_v31, %v1103_v30  ;;  %v299_v30 = vadd.f32 %v4697_v10, %v4982_v51 }
0x1792   :  { %4470 = vtanh.f32 %v1113_v33 }
0x179f   :  { %v4471_v34 = vpop.eup %4470 }
0x17a0   :  { %1116 = vrot.lane.b32.xlu0 %v4471_v34, %s4596_s24 }
0x1812   :  { %v1117_v35 = vpop.permute.xlu0 %1116 }
0x1813   :  { %v5032_v36 = vmul.f32 %v1117_v35, %v1102_v26 }
0x1815   :  { %v1120_v37 = vpack.c.bf16 %v5032_v36, %v5032_v36 }
0x1817   :  { %1128 = vrot.lane.b32.xlu1 %v1120_v37, %s4597_s25 }
0x1889   :  { %v1129_v38 = vpop.permute.xlu1 %1128 }
0x188a   :  { %4163 = vmatmul.mubr.msk.bf16.vlgmr.msra.gmra.mxu1 %vm459_vm6, %v1129_v38 }
0x188b   :  { %4175 = vmatpush3.bf16.msra.mxu1 %v5041_v12  ;;  %4178 = vmatprep.mubr.msk.bf16.mxu1 %vm4593_vm2, %v4592_v2 }
0x188c   :  { %4176 = vmatprep.subr.bf16.mxu1 %v4592_v2 }
0x188f   :  { %4177 = vmatpush3.bf16.msra.mxu1 %v5050_v39 }
0x1890   :  { %4190 = vmatprep.subr.bf16.mxu1 %v4592_v2 }
0x194a   :  { %v1167_v42 = vpop.f32.mrf.mxu1 }
0x194b   :  { %v1173_v43 = vadd.f32 %v1167_v42, %v294_v40 }
0x194c   :  { %v4164_v44 = vpop.f32.mrf.mxu1 }
0x194d   :  { %v1174_v46 = vmul.f32 %v1173_v43, %v4700_v14 }
0x194e   :  { %v1170_v47 = vpop.f32.mrf.mxu1 }
0x194f   :  { %4472 = vtanh.f32 %v1174_v46 }
0x1950   :  { %v4165_v49 = vpop.f32.mrf.mxu1 }
0x195c   :  { %v4473_v15 = vpop.eup %4472 }
0x195d   :  { %v1176_v16 = vmul.f32 %v4473_v15, %v4700_v14 }
0x195f   :  { %v1177_v18 = vadd.f32 %v1176_v16, %v4703_v22 }
0x1961   :  { %1180 = vrot.lane.b32.xlu0 %v1177_v18, %s4596_s24  ;;  %v1178_v48 = vmul.f32 %v1177_v18, %v1113_v33 }
0x19d3   :  { %v1181_v19 = vpop.permute.xlu0 %1180 }
0x19d4   :  { %v1183_v20 = vmul.f32 %v1181_v19, %v1177_v18 }
0x19d6   :  { %1185 = vrot.lane.b32.xlu1 %v1183_v20, %s4597_s25 }
0x1a48   :  { %v1186_v21 = vpop.permute.xlu1 %1185 }
0x1a49   :  { %v1188_v23 = vadd.f32 %v1186_v21, %v1178_v48  ;;  %v304_v48 = vadd.f32 %v4980_v50, %v4697_v10 }
0x1a4b   :  { %4474 = vtanh.f32 %v1188_v23 }
0x1a58   :  { %v4475_v24 = vpop.eup %4474 }
0x1a59   :  { %1191 = vrot.lane.b32.xlu0 %v4475_v24, %s4596_s24 }
0x1acb   :  { %v1192_v25 = vpop.permute.xlu0 %1191 }
0x1acc   :  { %v5061_v26 = vmul.f32 %v1192_v25, %v1177_v18 }
0x1ace   :  { %v1195_v27 = vpack.c.bf16 %v5061_v26, %v5061_v26 }
0x1ad0   :  { %1203 = vrot.lane.b32.xlu1 %v1195_v27, %s4597_s25 }
0x1b42   :  { %v1204_v28 = vpop.permute.xlu1 %1203 }
0x1b43   :  { %4171 = vmatmul.mubr.msk.bf16.vlgmr.msra.gmra.mxu0 %vm459_vm6, %v1204_v28 }
0x1b44   :  { %4183 = vmatpush3.bf16.msra.mxu0 %v5041_v12  ;;  %4186 = vmatprep.mubr.msk.bf16.mxu0 %vm4593_vm2, %v4592_v2 }
0x1b45   :  { %4184 = vmatprep.subr.bf16.mxu0 %v4592_v2 }
0x1b48   :  { %4185 = vmatpush3.bf16.msra.mxu0 %v5050_v39 }
0x1b49   :  { %4198 = vmatprep.subr.bf16.mxu0 %v4592_v2 }
0x1c03   :  { %v1242_v31 = vpop.f32.mrf.mxu0 }
0x1c04   :  { %v1248_v33 = vadd.f32 %v1242_v31, %v299_v30 }
0x1c05   :  { %v4172_v34 = vpop.f32.mrf.mxu0 }
0x1c06   :  { %v1249_v35 = vmul.f32 %v1248_v33, %v4700_v14 }
0x1c07   :  { %v1245_v37 = vpop.f32.mrf.mxu0 }
0x1c08   :  { %4476 = vtanh.f32 %v1249_v35 }
0x1c09   :  { %v4173_v38 = vpop.f32.mrf.mxu0 }
0x1c15   :  { %v4477_v40 = vpop.eup %4476 }
0x1c16   :  { %v1251_v42 = vmul.f32 %v4477_v40, %v4700_v14 }
0x1c18   :  { %v1252_v43 = vadd.f32 %v1251_v42, %v4703_v22 }
0x1c1a   :  { %1255 = vrot.lane.b32.xlu0 %v1252_v43, %s4596_s24  ;;  %v1253_v51 = vmul.f32 %v1252_v43, %v1188_v23 }
0x1c8c   :  { %v1256_v44 = vpop.permute.xlu0 %1255 }
0x1c8d   :  { %v1258_v46 = vmul.f32 %v1256_v44, %v1252_v43 }
0x1c8f   :  { %1260 = vrot.lane.b32.xlu1 %v1258_v46, %s4597_s25 }
0x1d01   :  { %v1261_v47 = vpop.permute.xlu1 %1260 }
0x1d02   :  { %v1263_v49 = vadd.f32 %v1261_v47, %v1253_v51  ;;  %v309_v51 = vadd.f32 %v4697_v10, %v4986_v55 }
0x1d04   :  { %4478 = vtanh.f32 %v1263_v49 }
0x1d11   :  { %v4479_v15 = vpop.eup %4478 }
0x1d12   :  { %1266 = vrot.lane.b32.xlu0 %v4479_v15, %s4596_s24 }
0x1d84   :  { %v1267_v16 = vpop.permute.xlu0 %1266 }
0x1d85   :  { %v5081_v18 = vmul.f32 %v1267_v16, %v1252_v43 }
0x1d87   :  { %v1270_v19 = vpack.c.bf16 %v5081_v18, %v5081_v18 }
0x1d89   :  { %1278 = vrot.lane.b32.xlu1 %v1270_v19, %s4597_s25 }
0x1dfb   :  { %v1279_v20 = vpop.permute.xlu1 %1278 }
0x1dfc   :  { %4179 = vmatmul.mubr.msk.bf16.vlgmr.msra.gmra.mxu1 %vm459_vm6, %v1279_v20 }
0x1dfd   :  { %4191 = vmatpush3.bf16.msra.mxu1 %v5041_v12  ;;  %4194 = vmatprep.mubr.msk.bf16.mxu1 %vm4593_vm2, %v4592_v2 }
0x1dfe   :  { %4192 = vmatprep.subr.bf16.mxu1 %v4592_v2 }
0x1e01   :  { %4193 = vmatpush3.bf16.msra.mxu1 %v5050_v39 }
0x1e02   :  { %4206 = vmatprep.subr.bf16.mxu1 %v4592_v2 }
0x1ebc   :  { %v1317_v21 = vpop.f32.mrf.mxu1 }
0x1ebd   :  { %v1323_v23 = vadd.f32 %v1317_v21, %v304_v48 }
0x1ebe   :  { %v4180_v24 = vpop.f32.mrf.mxu1 }
0x1ebf   :  { %v1324_v25 = vmul.f32 %v1323_v23, %v4700_v14 }
0x1ec0   :  { %v1320_v27 = vpop.f32.mrf.mxu1 }
0x1ec1   :  { %4480 = vtanh.f32 %v1324_v25 }
0x1ec2   :  { %v4181_v28 = vpop.f32.mrf.mxu1 }
0x1ece   :  { %v4481_v30 = vpop.eup %4480 }
0x1ecf   :  { %v1326_v31 = vmul.f32 %v4481_v30, %v4700_v14 }
0x1ed1   :  { %v1327_v33 = vadd.f32 %v1326_v31, %v4703_v22 }
0x1ed3   :  { %1330 = vrot.lane.b32.xlu0 %v1327_v33, %s4596_s24  ;;  %v1328_v50 = vmul.f32 %v1327_v33, %v1263_v49 }
0x1f45   :  { %v1331_v34 = vpop.permute.xlu0 %1330 }
0x1f46   :  { %v1333_v35 = vmul.f32 %v1331_v34, %v1327_v33 }
0x1f48   :  { %1335 = vrot.lane.b32.xlu1 %v1333_v35, %s4597_s25  ;;  %v5136_v35 = vld [vmem:[%s5829_s3] ss:$0 sm:$0xff] }
0x1fba   :  { %v1336_v37 = vpop.permute.xlu1 %1335 }
0x1fbb   :  { %v1338_v38 = vadd.f32 %v1336_v37, %v1328_v50  ;;  %v314_v50 = vadd.f32 %v5136_v35, %v4984_v52 }
0x1fbd   :  { %4482 = vtanh.f32 %v1338_v38 }
0x1fca   :  { %v4483_v40 = vpop.eup %4482 }
0x1fcb   :  { %1341 = vrot.lane.b32.xlu0 %v4483_v40, %s4596_s24 }
0x203d   :  { %v1342_v42 = vpop.permute.xlu0 %1341 }
0x203e   :  { %v5101_v43 = vmul.f32 %v1342_v42, %v1327_v33 }
0x2040   :  { %v1345_v44 = vpack.c.bf16 %v5101_v43, %v5101_v43 }
0x2042   :  { %1349 = vrot.lane.b32.xlu1 %v1345_v44, %s4597_s25 }
0x20b4   :  { %v1350_v46 = vpop.permute.xlu1 %1349 }
0x20b5   :  { %4187 = vmatmul.mubr.msk.bf16.vlgmr.msra.gmra.mxu0 %vm459_vm6, %v1350_v46 }
0x20b6   :  { %4199 = vmatpush3.bf16.msra.mxu0 %v5041_v12  ;;  %4202 = vmatprep.mubr.msk.bf16.mxu0 %vm4593_vm2, %v4592_v2 }
0x20b7   :  { %4200 = vmatprep.subr.bf16.mxu0 %v4592_v2 }
0x20ba   :  { %4201 = vmatpush3.bf16.msra.mxu0 %v5050_v39 }
0x20bb   :  { %4214 = vmatprep.subr.bf16.mxu0 %v4592_v2 }
0x2175   :  { %v1388_v47 = vpop.f32.mrf.mxu0 }
0x2176   :  { %v1394_v49 = vadd.f32 %v1388_v47, %v309_v51 }
0x2177   :  { %v4188_v15 = vpop.f32.mrf.mxu0 }
0x2178   :  { %v1395_v16 = vmul.f32 %v1394_v49, %v4700_v14 }
0x2179   :  { %v1391_v19 = vpop.f32.mrf.mxu0 }
0x217a   :  { %4484 = vtanh.f32 %v1395_v16 }
0x217b   :  { %v4189_v20 = vpop.f32.mrf.mxu0 }
0x2187   :  { %v4485_v48 = vpop.eup %4484 }
0x2188   :  { %v1397_v21 = vmul.f32 %v4485_v48, %v4700_v14 }
0x218a   :  { %v1398_v23 = vadd.f32 %v1397_v21, %v4703_v22 }
0x218c   :  { %1401 = vrot.lane.b32.xlu0 %v1398_v23, %s4596_s24  ;;  %v1399_v10 = vmul.f32 %v1398_v23, %v1338_v38 }
0x21fe   :  { %v1402_v24 = vpop.permute.xlu0 %1401 }
0x21ff   :  { %v1404_v25 = vmul.f32 %v1402_v24, %v1398_v23 }
0x2201   :  { %1406 = vrot.lane.b32.xlu1 %v1404_v25, %s4597_s25 }
0x2273   :  { %v1407_v55 = vpop.permute.xlu1 %1406 }
0x2274   :  { %v1409_v27 = vadd.f32 %v1407_v55, %v1399_v10  ;;  %v319_v10 = vadd.f32 %v5136_v35, %v4990_v56 }
0x2276   :  { %4486 = vtanh.f32 %v1409_v27 }
0x2283   :  { %v4487_v28 = vpop.eup %4486 }
0x2284   :  { %1412 = vrot.lane.b32.xlu0 %v4487_v28, %s4596_s24 }
0x22f6   :  { %v1413_v30 = vpop.permute.xlu0 %1412 }
0x22f7   :  { %v5121_v31 = vmul.f32 %v1413_v30, %v1398_v23 }
0x22f9   :  { %v1416_v33 = vpack.c.bf16 %v5121_v31, %v5121_v31 }
0x22fb   :  { %1424 = vrot.lane.b32.xlu1 %v1416_v33, %s4597_s25 }
0x236d   :  { %v1425_v34 = vpop.permute.xlu1 %1424 }
0x236e   :  { %4195 = vmatmul.mubr.msk.bf16.vlgmr.msra.gmra.mxu1 %vm459_vm6, %v1425_v34 }
0x236f   :  { %4207 = vmatpush3.bf16.msra.mxu1 %v5041_v12  ;;  %4210 = vmatprep.mubr.msk.bf16.mxu1 %vm4593_vm2, %v4592_v2 }
0x2370   :  { %4208 = vmatprep.subr.bf16.mxu1 %v4592_v2 }
0x2373   :  { %4209 = vmatpush3.bf16.msra.mxu1 %v5050_v39 }
0x2374   :  { %4222 = vmatprep.subr.bf16.mxu1 %v4592_v2 }
0x242e   :  { %v1463_v37 = vpop.f32.mrf.mxu1 }
0x242f   :  { %v1469_v38 = vadd.f32 %v1463_v37, %v314_v50 }
0x2430   :  { %v4196_v40 = vpop.f32.mrf.mxu1 }
0x2431   :  { %v1470_v42 = vmul.f32 %v1469_v38, %v4700_v14 }
0x2432   :  { %v1466_v44 = vpop.f32.mrf.mxu1 }
0x2433   :  { %4488 = vtanh.f32 %v1470_v42 }
0x2434   :  { %v4197_v46 = vpop.f32.mrf.mxu1 }
0x2440   :  { %v4489_v51 = vpop.eup %4488 }
0x2441   :  { %v1472_v47 = vmul.f32 %v4489_v51, %v4700_v14 }
0x2443   :  { %v1473_v49 = vadd.f32 %v1472_v47, %v4703_v22 }
0x2445   :  { %1476 = vrot.lane.b32.xlu0 %v1473_v49, %s4596_s24  ;;  %v1474_v52 = vmul.f32 %v1473_v49, %v1409_v27 }
0x24b7   :  { %v1477_v15 = vpop.permute.xlu0 %1476 }
0x24b8   :  { %v1479_v16 = vmul.f32 %v1477_v15, %v1473_v49 }
0x24ba   :  { %1481 = vrot.lane.b32.xlu1 %v1479_v16, %s4597_s25 }
0x252c   :  { %v1482_v19 = vpop.permute.xlu1 %1481 }
0x252d   :  { %v1484_v20 = vadd.f32 %v1482_v19, %v1474_v52  ;;  %v324_v52 = vadd.f32 %v5136_v35, %v4988_v3 }
0x252f   :  { %4490 = vtanh.f32 %v1484_v20 }
0x253c   :  { %v4491_v48 = vpop.eup %4490 }
0x253d   :  { %1487 = vrot.lane.b32.xlu0 %v4491_v48, %s4596_s24 }
0x25af   :  { %v1488_v21 = vpop.permute.xlu0 %1487 }
0x25b0   :  { %v5146_v23 = vmul.f32 %v1488_v21, %v1473_v49 }
0x25b2   :  { %v1491_v24 = vpack.c.bf16 %v5146_v23, %v5146_v23 }
0x25b4   :  { %1499 = vrot.lane.b32.xlu1 %v1491_v24, %s4597_s25 }
0x2626   :  { %v1500_v25 = vpop.permute.xlu1 %1499 }
0x2627   :  { %4203 = vmatmul.mubr.msk.bf16.vlgmr.msra.gmra.mxu0 %vm459_vm6, %v1500_v25 }
0x2628   :  { %4215 = vmatpush3.bf16.msra.mxu0 %v5041_v12  ;;  %4218 = vmatprep.mubr.msk.bf16.mxu0 %vm4593_vm2, %v4592_v2 }
0x2629   :  { %4216 = vmatprep.subr.bf16.mxu0 %v4592_v2 }
0x262c   :  { %4217 = vmatpush3.bf16.msra.mxu0 %v5050_v39 }
0x262d   :  { %4230 = vmatprep.subr.bf16.mxu0 %v4592_v2 }
0x26e7   :  { %v1538_v55 = vpop.f32.mrf.mxu0 }
0x26e8   :  { %v1544_v27 = vadd.f32 %v1538_v55, %v319_v10 }
0x26e9   :  { %v4204_v28 = vpop.f32.mrf.mxu0 }
0x26ea   :  { %v1545_v30 = vmul.f32 %v1544_v27, %v4700_v14 }
0x26eb   :  { %v1541_v33 = vpop.f32.mrf.mxu0 }
0x26ec   :  { %4492 = vtanh.f32 %v1545_v30 }
0x26ed   :  { %v4205_v34 = vpop.f32.mrf.mxu0 }
0x26f9   :  { %v4493_v50 = vpop.eup %4492 }
0x26fa   :  { %v1547_v37 = vmul.f32 %v4493_v50, %v4700_v14 }
0x26fc   :  { %v1548_v38 = vadd.f32 %v1547_v37, %v4703_v22 }
0x26fe   :  { %1551 = vrot.lane.b32.xlu0 %v1548_v38, %s4596_s24  ;;  %v1549_v56 = vmul.f32 %v1548_v38, %v1484_v20 }
0x2770   :  { %v1552_v40 = vpop.permute.xlu0 %1551 }
0x2771   :  { %v1554_v42 = vmul.f32 %v1552_v40, %v1548_v38 }
0x2773   :  { %1556 = vrot.lane.b32.xlu1 %v1554_v42, %s4597_s25 }
0x27e5   :  { %v1557_v44 = vpop.permute.xlu1 %1556 }
0x27e6   :  { %v1559_v46 = vadd.f32 %v1557_v44, %v1549_v56  ;;  %v329_v56 = vadd.f32 %v5136_v35, %v4994_v58 }
0x27e8   :  { %4494 = vtanh.f32 %v1559_v46 }
0x27f5   :  { %v4495_v51 = vpop.eup %4494 }
0x27f6   :  { %1562 = vrot.lane.b32.xlu0 %v4495_v51, %s4596_s24 }
0x2868   :  { %v1563_v47 = vpop.permute.xlu0 %1562 }
0x2869   :  { %v5166_v49 = vmul.f32 %v1563_v47, %v1548_v38 }
0x286b   :  { %v1566_v15 = vpack.c.bf16 %v5166_v49, %v5166_v49 }
0x286d   :  { %1574 = vrot.lane.b32.xlu1 %v1566_v15, %s4597_s25 }
0x28df   :  { %v1575_v16 = vpop.permute.xlu1 %1574 }
0x28e0   :  { %4211 = vmatmul.mubr.msk.bf16.vlgmr.msra.gmra.mxu1 %vm459_vm6, %v1575_v16 }
0x28e1   :  { %4223 = vmatpush3.bf16.msra.mxu1 %v5041_v12  ;;  %4226 = vmatprep.mubr.msk.bf16.mxu1 %vm4593_vm2, %v4592_v2 }
0x28e2   :  { %4224 = vmatprep.subr.bf16.mxu1 %v4592_v2 }
0x28e5   :  { %4225 = vmatpush3.bf16.msra.mxu1 %v5050_v39 }
0x28e6   :  { %4238 = vmatprep.subr.bf16.mxu1 %v4592_v2 }
0x29a0   :  { %v1613_v19 = vpop.f32.mrf.mxu1 }
0x29a1   :  { %v1619_v20 = vadd.f32 %v1613_v19, %v324_v52 }
0x29a2   :  { %v4212_v48 = vpop.f32.mrf.mxu1 }
0x29a3   :  { %v1620_v21 = vmul.f32 %v1619_v20, %v4700_v14 }
0x29a4   :  { %v1616_v24 = vpop.f32.mrf.mxu1 }
0x29a5   :  { %4496 = vtanh.f32 %v1620_v21 }
0x29a6   :  { %v4213_v25 = vpop.f32.mrf.mxu1 }
0x29b2   :  { %v4497_v10 = vpop.eup %4496 }
0x29b3   :  { %v1622_v55 = vmul.f32 %v4497_v10, %v4700_v14 }
0x29b5   :  { %v1623_v27 = vadd.f32 %v1622_v55, %v4703_v22 }
0x29b7   :  { %1626 = vrot.lane.b32.xlu0 %v1623_v27, %s4596_s24  ;;  %v1624_v3 = vmul.f32 %v1623_v27, %v1559_v46 }
0x2a29   :  { %v1627_v28 = vpop.permute.xlu0 %1626 }
0x2a2a   :  { %v1629_v30 = vmul.f32 %v1627_v28, %v1623_v27 }
0x2a2c   :  { %1631 = vrot.lane.b32.xlu1 %v1629_v30, %s4597_s25 }
0x2a9e   :  { %v1632_v33 = vpop.permute.xlu1 %1631 }
0x2a9f   :  { %v1634_v34 = vadd.f32 %v1632_v33, %v1624_v3  ;;  %v334_v3 = vadd.f32 %v5136_v35, %v4992_v57 }
0x2aa1   :  { %4498 = vtanh.f32 %v1634_v34 }
0x2aae   :  { %v4499_v50 = vpop.eup %4498 }
0x2aaf   :  { %1637 = vrot.lane.b32.xlu0 %v4499_v50, %s4596_s24 }
0x2b21   :  { %v1638_v37 = vpop.permute.xlu0 %1637 }
0x2b22   :  { %v5186_v38 = vmul.f32 %v1638_v37, %v1623_v27 }
0x2b24   :  { %v1641_v40 = vpack.c.bf16 %v5186_v38, %v5186_v38 }
0x2b26   :  { %1645 = vrot.lane.b32.xlu1 %v1641_v40, %s4597_s25 }
0x2b98   :  { %v1646_v42 = vpop.permute.xlu1 %1645 }
0x2b99   :  { %4219 = vmatmul.mubr.msk.bf16.vlgmr.msra.gmra.mxu0 %vm459_vm6, %v1646_v42 }
0x2b9a   :  { %4231 = vmatpush3.bf16.msra.mxu0 %v5041_v12  ;;  %4234 = vmatprep.mubr.msk.bf16.mxu0 %vm4593_vm2, %v4592_v2 }
0x2b9b   :  { %4232 = vmatprep.subr.bf16.mxu0 %v4592_v2 }
0x2b9e   :  { %4233 = vmatpush3.bf16.msra.mxu0 %v5050_v39 }
0x2b9f   :  { %4246 = vmatprep.subr.bf16.mxu0 %v4592_v2 }
0x2c59   :  { %v1684_v44 = vpop.f32.mrf.mxu0 }
0x2c5a   :  { %v1690_v46 = vadd.f32 %v1684_v44, %v329_v56 }
0x2c5b   :  { %v4220_v51 = vpop.f32.mrf.mxu0 }
0x2c5c   :  { %v1691_v47 = vmul.f32 %v1690_v46, %v4700_v14 }
0x2c5d   :  { %v1687_v15 = vpop.f32.mrf.mxu0 }
0x2c5e   :  { %4500 = vtanh.f32 %v1691_v47 }
0x2c5f   :  { %v4221_v16 = vpop.f32.mrf.mxu0 }
0x2c6b   :  { %v4501_v52 = vpop.eup %4500 }
0x2c6c   :  { %v1693_v19 = vmul.f32 %v4501_v52, %v4700_v14 }
0x2c6e   :  { %v1694_v20 = vadd.f32 %v1693_v19, %v4703_v22 }
0x2c70   :  { %1697 = vrot.lane.b32.xlu0 %v1694_v20, %s4596_s24  ;;  %v1695_v58 = vmul.f32 %v1694_v20, %v1634_v34 }
0x2ce2   :  { %v1698_v48 = vpop.permute.xlu0 %1697 }
0x2ce3   :  { %v1700_v21 = vmul.f32 %v1698_v48, %v1694_v20 }
0x2ce5   :  { %1702 = vrot.lane.b32.xlu1 %v1700_v21, %s4597_s25 }
0x2d57   :  { %v1703_v24 = vpop.permute.xlu1 %1702 }
0x2d58   :  { %v1705_v25 = vadd.f32 %v1703_v24, %v1695_v58  ;;  %v339_v58 = vadd.f32 %v5136_v35, %v4998_v59 }
0x2d5a   :  { %4502 = vtanh.f32 %v1705_v25 }
0x2d67   :  { %v4503_v10 = vpop.eup %4502 }
0x2d68   :  { %1708 = vrot.lane.b32.xlu0 %v4503_v10, %s4596_s24 }
0x2dda   :  { %v1709_v55 = vpop.permute.xlu0 %1708 }
0x2ddb   :  { %v5206_v27 = vmul.f32 %v1709_v55, %v1694_v20 }
0x2ddd   :  { %v1712_v28 = vpack.c.bf16 %v5206_v27, %v5206_v27 }
0x2ddf   :  { %1720 = vrot.lane.b32.xlu1 %v1712_v28, %s4597_s25 }
0x2e51   :  { %v1721_v30 = vpop.permute.xlu1 %1720 }
0x2e52   :  { %4227 = vmatmul.mubr.msk.bf16.vlgmr.msra.gmra.mxu1 %vm459_vm6, %v1721_v30 }
0x2e53   :  { %4239 = vmatpush3.bf16.msra.mxu1 %v5041_v12  ;;  %4242 = vmatprep.mubr.msk.bf16.mxu1 %vm4593_vm2, %v4592_v2 }
0x2e54   :  { %4240 = vmatprep.subr.bf16.mxu1 %v4592_v2 }
0x2e57   :  { %4241 = vmatpush3.bf16.msra.mxu1 %v5050_v39 }
0x2e58   :  { %4254 = vmatprep.subr.bf16.mxu1 %v4592_v2 }
0x2f12   :  { %v1759_v33 = vpop.f32.mrf.mxu1 }
0x2f13   :  { %v1765_v34 = vadd.f32 %v1759_v33, %v334_v3 }
0x2f14   :  { %v4228_v50 = vpop.f32.mrf.mxu1 }
0x2f15   :  { %v1766_v37 = vmul.f32 %v1765_v34, %v4700_v14 }
0x2f16   :  { %v1762_v40 = vpop.f32.mrf.mxu1 }
0x2f17   :  { %4504 = vtanh.f32 %v1766_v37 }
0x2f18   :  { %v4229_v42 = vpop.f32.mrf.mxu1 }
0x2f24   :  { %v4505_v56 = vpop.eup %4504 }
0x2f25   :  { %v1768_v44 = vmul.f32 %v4505_v56, %v4700_v14 }
0x2f27   :  { %v1769_v46 = vadd.f32 %v1768_v44, %v4703_v22 }
0x2f29   :  { %1772 = vrot.lane.b32.xlu0 %v1769_v46, %s4596_s24  ;;  %v1770_v57 = vmul.f32 %v1769_v46, %v1705_v25 }
0x2f9b   :  { %v1773_v51 = vpop.permute.xlu0 %1772 }
0x2f9c   :  { %v1775_v47 = vmul.f32 %v1773_v51, %v1769_v46 }
0x2f9e   :  { %1777 = vrot.lane.b32.xlu1 %v1775_v47, %s4597_s25 }
0x3010   :  { %v1778_v15 = vpop.permute.xlu1 %1777 }
0x3011   :  { %v1780_v16 = vadd.f32 %v1778_v15, %v1770_v57  ;;  %v344_v57 = vadd.f32 %v5136_v35, %v4996_v5 }
0x3013   :  { %4506 = vtanh.f32 %v1780_v16 }
0x3020   :  { %v4507_v52 = vpop.eup %4506 }
0x3021   :  { %1783 = vrot.lane.b32.xlu0 %v4507_v52, %s4596_s24 }
0x3093   :  { %v1784_v19 = vpop.permute.xlu0 %1783 }
0x3094   :  { %v5226_v20 = vmul.f32 %v1784_v19, %v1769_v46 }
0x3096   :  { %v1787_v48 = vpack.c.bf16 %v5226_v20, %v5226_v20 }
0x3098   :  { %1795 = vrot.lane.b32.xlu1 %v1787_v48, %s4597_s25 }
0x310a   :  { %v1796_v21 = vpop.permute.xlu1 %1795 }
0x310b   :  { %4235 = vmatmul.mubr.msk.bf16.vlgmr.msra.gmra.mxu0 %vm459_vm6, %v1796_v21 }
0x310c   :  { %4247 = vmatpush3.bf16.msra.mxu0 %v5041_v12  ;;  %4250 = vmatprep.mubr.msk.bf16.mxu0 %vm4593_vm2, %v4592_v2 }
0x310d   :  { %4248 = vmatprep.subr.bf16.mxu0 %v4592_v2 }
0x3110   :  { %4249 = vmatpush3.bf16.msra.mxu0 %v5050_v39 }
0x3111   :  { %4262 = vmatprep.subr.bf16.mxu0 %v4592_v2 }
0x31cb   :  { %v1834_v24 = vpop.f32.mrf.mxu0 }
0x31cc   :  { %v1840_v25 = vadd.f32 %v1834_v24, %v339_v58 }
0x31cd   :  { %v4236_v10 = vpop.f32.mrf.mxu0 }
0x31ce   :  { %v1841_v55 = vmul.f32 %v1840_v25, %v4700_v14 }
0x31cf   :  { %v1837_v28 = vpop.f32.mrf.mxu0 }
0x31d0   :  { %4508 = vtanh.f32 %v1841_v55 }
0x31d1   :  { %v4237_v30 = vpop.f32.mrf.mxu0 }
0x31dd   :  { %v4509_v3 = vpop.eup %4508 }
0x31de   :  { %v1843_v33 = vmul.f32 %v4509_v3, %v4700_v14 }
0x31e0   :  { %v1844_v34 = vadd.f32 %v1843_v33, %v4703_v22 }
0x31e2   :  { %1847 = vrot.lane.b32.xlu0 %v1844_v34, %s4596_s24  ;;  %v1845_v59 = vmul.f32 %v1844_v34, %v1780_v16 }
0x3254   :  { %v1848_v50 = vpop.permute.xlu0 %1847 }
0x3255   :  { %v1850_v37 = vmul.f32 %v1848_v50, %v1844_v34 }
0x3257   :  { %1852 = vrot.lane.b32.xlu1 %v1850_v37, %s4597_s25 }
0x32c9   :  { %v1853_v40 = vpop.permute.xlu1 %1852 }
0x32ca   :  { %v1855_v42 = vadd.f32 %v1853_v40, %v1845_v59  ;;  %v349_v59 = vadd.f32 %v5136_v35, %v5002_v61 }
0x32cc   :  { %4510 = vtanh.f32 %v1855_v42 }
0x32d9   :  { %v4511_v56 = vpop.eup %4510 }
0x32da   :  { %1858 = vrot.lane.b32.xlu0 %v4511_v56, %s4596_s24 }
0x334c   :  { %v1859_v44 = vpop.permute.xlu0 %1858 }
0x334d   :  { %v5246_v46 = vmul.f32 %v1859_v44, %v1844_v34 }
0x334f   :  { %v1862_v51 = vpack.c.bf16 %v5246_v46, %v5246_v46 }
0x3351   :  { %1870 = vrot.lane.b32.xlu1 %v1862_v51, %s4597_s25 }
0x33c3   :  { %v1871_v47 = vpop.permute.xlu1 %1870 }
0x33c4   :  { %4243 = vmatmul.mubr.msk.bf16.vlgmr.msra.gmra.mxu1 %vm459_vm6, %v1871_v47 }
0x33c5   :  { %4255 = vmatpush3.bf16.msra.mxu1 %v5041_v12  ;;  %4258 = vmatprep.mubr.msk.bf16.mxu1 %vm4593_vm2, %v4592_v2 }
0x33c6   :  { %4256 = vmatprep.subr.bf16.mxu1 %v4592_v2 }
0x33c9   :  { %4257 = vmatpush3.bf16.msra.mxu1 %v5050_v39 }
0x33ca   :  { %4270 = vmatprep.subr.bf16.mxu1 %v4592_v2 }
0x3484   :  { %v1909_v15 = vpop.f32.mrf.mxu1 }
0x3485   :  { %v1915_v16 = vadd.f32 %v1909_v15, %v344_v57 }
0x3486   :  { %v4244_v52 = vpop.f32.mrf.mxu1 }
0x3487   :  { %v1916_v19 = vmul.f32 %v1915_v16, %v4700_v14 }
0x3488   :  { %v1912_v48 = vpop.f32.mrf.mxu1 }
0x3489   :  { %4512 = vtanh.f32 %v1916_v19 }
0x348a   :  { %v4245_v21 = vpop.f32.mrf.mxu1 }
0x3496   :  { %v4513_v58 = vpop.eup %4512 }
0x3497   :  { %v1918_v24 = vmul.f32 %v4513_v58, %v4700_v14 }
0x3499   :  { %v1919_v25 = vadd.f32 %v1918_v24, %v4703_v22 }
0x349b   :  { %1922 = vrot.lane.b32.xlu0 %v1919_v25, %s4596_s24  ;;  %v1920_v5 = vmul.f32 %v1919_v25, %v1855_v42 }
0x350d   :  { %v1923_v10 = vpop.permute.xlu0 %1922 }
0x350e   :  { %v1925_v55 = vmul.f32 %v1923_v10, %v1919_v25 }
0x3510   :  { %1927 = vrot.lane.b32.xlu1 %v1925_v55, %s4597_s25 }
0x3582   :  { %v1928_v28 = vpop.permute.xlu1 %1927 }
0x3583   :  { %v1930_v30 = vadd.f32 %v1928_v28, %v1920_v5  ;;  %v354_v5 = vadd.f32 %v5136_v35, %v5000_v60 }
0x3585   :  { %4514 = vtanh.f32 %v1930_v30 }
0x3592   :  { %v4515_v3 = vpop.eup %4514 }
0x3593   :  { %1933 = vrot.lane.b32.xlu0 %v4515_v3, %s4596_s24 }
0x3605   :  { %v1934_v33 = vpop.permute.xlu0 %1933 }
0x3606   :  { %v5266_v34 = vmul.f32 %v1934_v33, %v1919_v25 }
0x3608   :  { %v1937_v50 = vpack.c.bf16 %v5266_v34, %v5266_v34 }
0x360a   :  { %1941 = vrot.lane.b32.xlu1 %v1937_v50, %s4597_s25 }
0x367c   :  { %v1942_v37 = vpop.permute.xlu1 %1941 }
0x367d   :  { %4251 = vmatmul.mubr.msk.bf16.vlgmr.msra.gmra.mxu0 %vm459_vm6, %v1942_v37 }
0x367e   :  { %4263 = vmatpush3.bf16.msra.mxu0 %v5041_v12  ;;  %4266 = vmatprep.mubr.msk.bf16.mxu0 %vm4593_vm2, %v4592_v2 }
0x367f   :  { %4264 = vmatprep.subr.bf16.mxu0 %v4592_v2 }
0x3682   :  { %4265 = vmatpush3.bf16.msra.mxu0 %v5050_v39 }
0x3683   :  { %4278 = vmatprep.subr.bf16.mxu0 %v4592_v2 }
0x373d   :  { %v1980_v40 = vpop.f32.mrf.mxu0 }
0x373e   :  { %v1986_v42 = vadd.f32 %v1980_v40, %v349_v59 }
0x373f   :  { %v4252_v56 = vpop.f32.mrf.mxu0 }
0x3740   :  { %v1987_v44 = vmul.f32 %v1986_v42, %v4700_v14 }
0x3741   :  { %v1983_v51 = vpop.f32.mrf.mxu0 }
0x3742   :  { %4516 = vtanh.f32 %v1987_v44 }
0x3743   :  { %v4253_v47 = vpop.f32.mrf.mxu0 }
0x374f   :  { %v4517_v57 = vpop.eup %4516 }
0x3750   :  { %v1989_v15 = vmul.f32 %v4517_v57, %v4700_v14 }
0x3752   :  { %v1990_v16 = vadd.f32 %v1989_v15, %v4703_v22 }
0x3754   :  { %1993 = vrot.lane.b32.xlu0 %v1990_v16, %s4596_s24  ;;  %v1991_v61 = vmul.f32 %v1990_v16, %v1930_v30 }
0x37c6   :  { %v1994_v52 = vpop.permute.xlu0 %1993 }
0x37c7   :  { %v1996_v19 = vmul.f32 %v1994_v52, %v1990_v16 }
0x37c9   :  { %1998 = vrot.lane.b32.xlu1 %v1996_v19, %s4597_s25 }
0x383b   :  { %v1999_v48 = vpop.permute.xlu1 %1998 }
0x383c   :  { %v2001_v21 = vadd.f32 %v1999_v48, %v1991_v61  ;;  %v359_v61 = vadd.f32 %v5136_v35, %v5006_v63 }
0x383e   :  { %4518 = vtanh.f32 %v2001_v21 }
0x384b   :  { %v4519_v58 = vpop.eup %4518 }
0x384c   :  { %2004 = vrot.lane.b32.xlu0 %v4519_v58, %s4596_s24 }
0x38be   :  { %v2005_v24 = vpop.permute.xlu0 %2004 }
0x38bf   :  { %v5286_v25 = vmul.f32 %v2005_v24, %v1990_v16 }
0x38c1   :  { %v2008_v10 = vpack.c.bf16 %v5286_v25, %v5286_v25 }
0x38c3   :  { %2016 = vrot.lane.b32.xlu1 %v2008_v10, %s4597_s25 }
0x3935   :  { %v2017_v55 = vpop.permute.xlu1 %2016 }
0x3936   :  { %4259 = vmatmul.mubr.msk.bf16.vlgmr.msra.gmra.mxu1 %vm459_vm6, %v2017_v55 }
0x3937   :  { %4271 = vmatpush3.bf16.msra.mxu1 %v5041_v12  ;;  %4274 = vmatprep.mubr.msk.bf16.mxu1 %vm4593_vm2, %v4592_v2 }
0x3938   :  { %4272 = vmatprep.subr.bf16.mxu1 %v4592_v2 }
0x393b   :  { %4273 = vmatpush3.bf16.msra.mxu1 %v5050_v39 }
0x393c   :  { %4286 = vmatprep.subr.bf16.mxu1 %v4592_v2 }
0x39f6   :  { %v2055_v28 = vpop.f32.mrf.mxu1 }
0x39f7   :  { %v2061_v30 = vadd.f32 %v2055_v28, %v354_v5 }
0x39f8   :  { %v4260_v3 = vpop.f32.mrf.mxu1 }
0x39f9   :  { %v2062_v33 = vmul.f32 %v2061_v30, %v4700_v14 }
0x39fa   :  { %v2058_v50 = vpop.f32.mrf.mxu1 }
0x39fb   :  { %4520 = vtanh.f32 %v2062_v33 }
0x39fc   :  { %v4261_v37 = vpop.f32.mrf.mxu1 }
0x3a08   :  { %v4521_v59 = vpop.eup %4520 }
0x3a09   :  { %v2064_v40 = vmul.f32 %v4521_v59, %v4700_v14 }
0x3a0b   :  { %v2065_v42 = vadd.f32 %v2064_v40, %v4703_v22 }
0x3a0d   :  { %2068 = vrot.lane.b32.xlu0 %v2065_v42, %s4596_s24  ;;  %v2066_v60 = vmul.f32 %v2065_v42, %v2001_v21 }
0x3a7f   :  { %v2069_v56 = vpop.permute.xlu0 %2068 }
0x3a80   :  { %v2071_v44 = vmul.f32 %v2069_v56, %v2065_v42 }
0x3a82   :  { %2073 = vrot.lane.b32.xlu1 %v2071_v44, %s4597_s25 }
0x3af4   :  { %v2074_v51 = vpop.permute.xlu1 %2073 }
0x3af5   :  { %v2076_v47 = vadd.f32 %v2074_v51, %v2066_v60  ;;  %v364_v60 = vadd.f32 %v5136_v35, %v5004_v62 }
0x3af7   :  { %4522 = vtanh.f32 %v2076_v47 }
0x3b04   :  { %v4523_v57 = vpop.eup %4522 }
0x3b05   :  { %2079 = vrot.lane.b32.xlu0 %v4523_v57, %s4596_s24 }
0x3b77   :  { %v2080_v15 = vpop.permute.xlu0 %2079 }
0x3b78   :  { %v5306_v16 = vmul.f32 %v2080_v15, %v2065_v42 }
0x3b7a   :  { %v2083_v52 = vpack.c.bf16 %v5306_v16, %v5306_v16 }
0x3b7c   :  { %2091 = vrot.lane.b32.xlu1 %v2083_v52, %s4597_s25 }
0x3bee   :  { %v2092_v19 = vpop.permute.xlu1 %2091 }
0x3bef   :  { %4267 = vmatmul.mubr.msk.bf16.vlgmr.msra.gmra.mxu0 %vm459_vm6, %v2092_v19 }
0x3bf0   :  { %4279 = vmatpush3.bf16.msra.mxu0 %v5041_v12  ;;  %4282 = vmatprep.mubr.msk.bf16.mxu0 %vm4593_vm2, %v4592_v2 }
0x3bf1   :  { %4280 = vmatprep.subr.bf16.mxu0 %v4592_v2 }
0x3bf4   :  { %4281 = vmatpush3.bf16.msra.mxu0 %v5050_v39 }
0x3bf5   :  { %4294 = vmatprep.subr.bf16.mxu0 %v4592_v2 }
0x3caf   :  { %v2130_v48 = vpop.f32.mrf.mxu0 }
0x3cb0   :  { %v2136_v21 = vadd.f32 %v2130_v48, %v359_v61 }
0x3cb1   :  { %v4268_v58 = vpop.f32.mrf.mxu0 }
0x3cb2   :  { %v2137_v24 = vmul.f32 %v2136_v21, %v4700_v14 }
0x3cb3   :  { %v2133_v10 = vpop.f32.mrf.mxu0 }
0x3cb4   :  { %4524 = vtanh.f32 %v2137_v24 }
0x3cb5   :  { %v4269_v55 = vpop.f32.mrf.mxu0 }
0x3cc1   :  { %v4525_v5 = vpop.eup %4524 }
0x3cc2   :  { %v2139_v28 = vmul.f32 %v4525_v5, %v4700_v14 }
0x3cc4   :  { %v2140_v30 = vadd.f32 %v2139_v28, %v4703_v22 }
0x3cc6   :  { %2143 = vrot.lane.b32.xlu0 %v2140_v30, %s4596_s24  ;;  %v2141_v63 = vmul.f32 %v2140_v30, %v2076_v47 }
0x3d38   :  { %v2144_v3 = vpop.permute.xlu0 %2143 }
0x3d39   :  { %v2146_v33 = vmul.f32 %v2144_v3, %v2140_v30 }
0x3d3b   :  { %2148 = vrot.lane.b32.xlu1 %v2146_v33, %s4597_s25 }
0x3dad   :  { %v2149_v50 = vpop.permute.xlu1 %2148 }
0x3dae   :  { %v2151_v37 = vadd.f32 %v2149_v50, %v2141_v63  ;;  %v369_v63 = vadd.f32 %v5136_v35, %v5010_v4 }
0x3db0   :  { %4526 = vtanh.f32 %v2151_v37 }
0x3dbd   :  { %v4527_v59 = vpop.eup %4526 }
0x3dbe   :  { %2154 = vrot.lane.b32.xlu0 %v4527_v59, %s4596_s24 }
0x3e30   :  { %v2155_v40 = vpop.permute.xlu0 %2154 }
0x3e31   :  { %v5326_v42 = vmul.f32 %v2155_v40, %v2140_v30 }
0x3e33   :  { %v2158_v56 = vpack.c.bf16 %v5326_v42, %v5326_v42 }
0x3e35   :  { %2166 = vrot.lane.b32.xlu1 %v2158_v56, %s4597_s25 }
0x3ea7   :  { %v2167_v44 = vpop.permute.xlu1 %2166 }
0x3ea8   :  { %4275 = vmatmul.mubr.msk.bf16.vlgmr.msra.gmra.mxu1 %vm459_vm6, %v2167_v44 }
0x3ea9   :  { %4287 = vmatpush3.bf16.msra.mxu1 %v5041_v12  ;;  %4290 = vmatprep.mubr.msk.bf16.mxu1 %vm4593_vm2, %v4592_v2 }
0x3eaa   :  { %4288 = vmatprep.subr.bf16.mxu1 %v4592_v2 }
0x3ead   :  { %4289 = vmatpush3.bf16.msra.mxu1 %v5050_v39 }
0x3eae   :  { %4302 = vmatprep.subr.bf16.mxu1 %v4592_v2 }
0x3f68   :  { %v2205_v51 = vpop.f32.mrf.mxu1 }
0x3f69   :  { %v2211_v47 = vadd.f32 %v2205_v51, %v364_v60 }
0x3f6a   :  { %v4276_v57 = vpop.f32.mrf.mxu1 }
0x3f6b   :  { %v2212_v15 = vmul.f32 %v2211_v47, %v4700_v14 }
0x3f6c   :  { %v2208_v52 = vpop.f32.mrf.mxu1 }
0x3f6d   :  { %4528 = vtanh.f32 %v2212_v15 }
0x3f6e   :  { %v4277_v19 = vpop.f32.mrf.mxu1 }
0x3f7a   :  { %v4529_v61 = vpop.eup %4528 }
0x3f7b   :  { %v2214_v48 = vmul.f32 %v4529_v61, %v4700_v14 }
0x3f7d   :  { %v2215_v21 = vadd.f32 %v2214_v48, %v4703_v22 }
0x3f7f   :  { %2218 = vrot.lane.b32.xlu0 %v2215_v21, %s4596_s24  ;;  %v2216_v62 = vmul.f32 %v2215_v21, %v2151_v37 }
0x3ff1   :  { %v2219_v58 = vpop.permute.xlu0 %2218 }
0x3ff2   :  { %v2221_v24 = vmul.f32 %v2219_v58, %v2215_v21  ;;  %v5375_v58 = vld [vmem:[%s5828_s2 + $0x8] sm:$0xff]  }
0x3ff4   :  { %2223 = vrot.lane.b32.xlu1 %v2221_v24, %s4597_s25  ;;  %v5384_v24 = vld [vmem:[%s5828_s2] sm:$0xff]  }
0x4066   :  { %v2224_v10 = vpop.permute.xlu1 %2223 }
0x4067   :  { %v2226_v55 = vadd.f32 %v2224_v10, %v2216_v62  ;;  %v374_v62 = vadd.f32 %v5136_v35, %v5008_v1 }
0x4069   :  { %4530 = vtanh.f32 %v2226_v55 }
0x4076   :  { %v4531_v5 = vpop.eup %4530 }
0x4077   :  { %2229 = vrot.lane.b32.xlu0 %v4531_v5, %s4596_s24 }
0x40e9   :  { %v2230_v28 = vpop.permute.xlu0 %2229 }
0x40ea   :  { %v5346_v30 = vmul.f32 %v2230_v28, %v2215_v21 }
0x40ec   :  { %v2233_v3 = vpack.c.bf16 %v5346_v30, %v5346_v30 }
0x40ee   :  { %2237 = vrot.lane.b32.xlu1 %v2233_v3, %s4597_s25 }
0x4160   :  { %v2238_v33 = vpop.permute.xlu1 %2237 }
0x4161   :  { %4283 = vmatmul.mubr.msk.bf16.vlgmr.msra.gmra.mxu0 %vm459_vm6, %v2238_v33 }
0x4162   :  { %4295 = vmatpush3.bf16.msra.mxu0 %v5041_v12  ;;  %4298 = vmatprep.mubr.msk.bf16.mxu0 %vm4593_vm2, %v4592_v2 }
0x4163   :  { %4296 = vmatprep.subr.bf16.mxu0 %v4592_v2 }
0x4166   :  { %4297 = vmatpush3.bf16.msra.mxu0 %v5050_v39 }
0x4167   :  { %4310 = vmatprep.subr.bf16.mxu0 %v4592_v2 }
0x4221   :  { %v2276_v50 = vpop.f32.mrf.mxu0 }
0x4222   :  { %v2282_v37 = vadd.f32 %v2276_v50, %v369_v63 }
0x4223   :  { %v4284_v59 = vpop.f32.mrf.mxu0 }
0x4224   :  { %v2283_v40 = vmul.f32 %v2282_v37, %v4700_v14 }
0x4225   :  { %v2279_v56 = vpop.f32.mrf.mxu0 }
0x4226   :  { %4532 = vtanh.f32 %v2283_v40 }
0x4227   :  { %v4285_v12 = vpop.f32.mrf.mxu0 }
0x4233   :  { %v4533_v44 = vpop.eup %4532 }
0x4234   :  { %v2285_v60 = vmul.f32 %v4533_v44, %v4700_v14 }
0x4236   :  { %v2286_v51 = vadd.f32 %v2285_v60, %v4703_v22 }
0x4238   :  { %2289 = vrot.lane.b32.xlu0 %v2286_v51, %s4596_s24  ;;  %v2287_v4 = vmul.f32 %v2286_v51, %v2226_v55 }
0x42aa   :  { %v2290_v39 = vpop.permute.xlu0 %2289 }
0x42ab   :  { %v2292_v47 = vmul.f32 %v2290_v39, %v2286_v51 }
0x42ad   :  { %2294 = vrot.lane.b32.xlu1 %v2292_v47, %s4597_s25 }
0x431f   :  { %v2295_v57 = vpop.permute.xlu1 %2294 }
0x4320   :  { %v2297_v15 = vadd.f32 %v2295_v57, %v2287_v4  ;;  %v379_v4 = vadd.f32 %v5136_v35, %v5014_v7 }
0x4322   :  { %4534 = vtanh.f32 %v2297_v15 }
0x432f   :  { %v4535_v52 = vpop.eup %4534 }
0x4330   :  { %2300 = vrot.lane.b32.xlu0 %v4535_v52, %s4596_s24 }
0x43a2   :  { %v2301_v19 = vpop.permute.xlu0 %2300 }
0x43a3   :  { %v5366_v61 = vmul.f32 %v2301_v19, %v2286_v51 }
0x43a5   :  { %v2304_v48 = vpack.c.bf16 %v5366_v61, %v5366_v61 }
0x43a7   :  { %2312 = vrot.lane.b32.xlu1 %v2304_v48, %s4597_s25 }
0x4419   :  { %v2313_v21 = vpop.permute.xlu1 %2312 }
0x441a   :  { %4291 = vmatmul.mubr.msk.bf16.vlgmr.msra.gmra.mxu1 %vm459_vm6, %v2313_v21 }
0x441b   :  { %4303 = vmatpush3.bf16.msra.mxu1 %v5375_v58  ;;  %4306 = vmatprep.mubr.msk.bf16.mxu1 %vm4593_vm2, %v4592_v2 }
0x441c   :  { %4304 = vmatprep.subr.bf16.mxu1 %v4592_v2 }
0x441f   :  { %4305 = vmatpush3.bf16.msra.mxu1 %v5384_v24 }
0x4420   :  { %4318 = vmatprep.subr.bf16.mxu1 %v4592_v2 }
0x44da   :  { %v2351_v10 = vpop.f32.mrf.mxu1 }
0x44db   :  { %v2357_v55 = vadd.f32 %v2351_v10, %v374_v62 }
0x44dc   :  { %v4292_v5 = vpop.f32.mrf.mxu1 }
0x44dd   :  { %v2358_v28 = vmul.f32 %v2357_v55, %v4700_v14 }
0x44de   :  { %v2354_v3 = vpop.f32.mrf.mxu1 }
0x44df   :  { %4536 = vtanh.f32 %v2358_v28 }
0x44e0   :  { %v4293_v33 = vpop.f32.mrf.mxu1 }
0x44ec   :  { %v4537_v63 = vpop.eup %4536 }
0x44ed   :  { %v2360_v50 = vmul.f32 %v4537_v63, %v4700_v14 }
0x44ef   :  { %v2361_v37 = vadd.f32 %v2360_v50, %v4703_v22 }
0x44f1   :  { %2364 = vrot.lane.b32.xlu0 %v2361_v37, %s4596_s24  ;;  %v2362_v1 = vmul.f32 %v2361_v37, %v2297_v15 }
0x4563   :  { %v2365_v59 = vpop.permute.xlu0 %2364 }
0x4564   :  { %v2367_v40 = vmul.f32 %v2365_v59, %v2361_v37 }
0x4566   :  { %2369 = vrot.lane.b32.xlu1 %v2367_v40, %s4597_s25 }
0x45d8   :  { %v2370_v56 = vpop.permute.xlu1 %2369 }
0x45d9   :  { %v2372_v12 = vadd.f32 %v2370_v56, %v2362_v1  ;;  %v384_v1 = vadd.f32 %v5136_v35, %v5012_v6 }
0x45db   :  { %4538 = vtanh.f32 %v2372_v12 }
0x45e8   :  { %v4539_v44 = vpop.eup %4538 }
0x45e9   :  { %2375 = vrot.lane.b32.xlu0 %v4539_v44, %s4596_s24 }
0x465b   :  { %v2376_v60 = vpop.permute.xlu0 %2375 }
0x465c   :  { %v5396_v51 = vmul.f32 %v2376_v60, %v2361_v37 }
0x465e   :  { %v2379_v39 = vpack.c.bf16 %v5396_v51, %v5396_v51 }
0x4660   :  { %2387 = vrot.lane.b32.xlu1 %v2379_v39, %s4597_s25 }
0x46d2   :  { %v2388_v47 = vpop.permute.xlu1 %2387 }
0x46d3   :  { %4299 = vmatmul.mubr.msk.bf16.vlgmr.msra.gmra.mxu0 %vm459_vm6, %v2388_v47 }
0x46d4   :  { %4311 = vmatpush3.bf16.msra.mxu0 %v5375_v58  ;;  %4314 = vmatprep.mubr.msk.bf16.mxu0 %vm4593_vm2, %v4592_v2 }
0x46d5   :  { %4312 = vmatprep.subr.bf16.mxu0 %v4592_v2 }
0x46d8   :  { %4313 = vmatpush3.bf16.msra.mxu0 %v5384_v24 }
0x46d9   :  { %4326 = vmatprep.subr.bf16.mxu0 %v4592_v2 }
0x4793   :  { %v2426_v57 = vpop.f32.mrf.mxu0 }
0x4794   :  { %v2432_v15 = vadd.f32 %v2426_v57, %v379_v4 }
0x4795   :  { %v4300_v52 = vpop.f32.mrf.mxu0 }
0x4796   :  { %v2433_v19 = vmul.f32 %v2432_v15, %v4700_v14 }
0x4797   :  { %v2429_v48 = vpop.f32.mrf.mxu0 }
0x4798   :  { %4540 = vtanh.f32 %v2433_v19 }
0x4799   :  { %v4301_v21 = vpop.f32.mrf.mxu0 }
0x47a5   :  { %v4541_v62 = vpop.eup %4540 }
0x47a6   :  { %v2435_v10 = vmul.f32 %v4541_v62, %v4700_v14 }
0x47a8   :  { %v2436_v55 = vadd.f32 %v2435_v10, %v4703_v22 }
0x47aa   :  { %2439 = vrot.lane.b32.xlu0 %v2436_v55, %s4596_s24  ;;  %v2437_v7 = vmul.f32 %v2436_v55, %v2372_v12 }
0x481c   :  { %v2440_v5 = vpop.permute.xlu0 %2439 }
0x481d   :  { %v2442_v28 = vmul.f32 %v2440_v5, %v2436_v55 }
0x481f   :  { %2444 = vrot.lane.b32.xlu1 %v2442_v28, %s4597_s25 }
0x4891   :  { %v2445_v3 = vpop.permute.xlu1 %2444 }
0x4892   :  { %v2447_v33 = vadd.f32 %v2445_v3, %v2437_v7  ;;  %v389_v7 = vadd.f32 %v5136_v35, %v5018_v9 }
0x4894   :  { %4542 = vtanh.f32 %v2447_v33 }
0x48a1   :  { %v4543_v63 = vpop.eup %4542 }
0x48a2   :  { %2450 = vrot.lane.b32.xlu0 %v4543_v63, %s4596_s24 }
0x4914   :  { %v2451_v50 = vpop.permute.xlu0 %2450 }
0x4915   :  { %v5416_v37 = vmul.f32 %v2451_v50, %v2436_v55 }
0x4917   :  { %v2454_v59 = vpack.c.bf16 %v5416_v37, %v5416_v37 }
0x4919   :  { %2462 = vrot.lane.b32.xlu1 %v2454_v59, %s4597_s25 }
0x498b   :  { %v2463_v40 = vpop.permute.xlu1 %2462 }
0x498c   :  { %4307 = vmatmul.mubr.msk.bf16.vlgmr.msra.gmra.mxu1 %vm459_vm6, %v2463_v40 }
0x498d   :  { %4319 = vmatpush3.bf16.msra.mxu1 %v5375_v58  ;;  %4322 = vmatprep.mubr.msk.bf16.mxu1 %vm4593_vm2, %v4592_v2 }
0x498e   :  { %4320 = vmatprep.subr.bf16.mxu1 %v4592_v2 }
0x4991   :  { %4321 = vmatpush3.bf16.msra.mxu1 %v5384_v24 }
0x4992   :  { %4334 = vmatprep.subr.bf16.mxu1 %v4592_v2 }
0x4a4c   :  { %v2501_v56 = vpop.f32.mrf.mxu1 }
0x4a4d   :  { %v2507_v12 = vadd.f32 %v2501_v56, %v384_v1 }
0x4a4e   :  { %v4308_v44 = vpop.f32.mrf.mxu1 }
0x4a4f   :  { %v2508_v60 = vmul.f32 %v2507_v12, %v4700_v14 }
0x4a50   :  { %v2504_v39 = vpop.f32.mrf.mxu1 }
0x4a51   :  { %4544 = vtanh.f32 %v2508_v60 }
0x4a52   :  { %v4309_v47 = vpop.f32.mrf.mxu1 }
0x4a5e   :  { %v4545_v4 = vpop.eup %4544 }
0x4a5f   :  { %v2510_v57 = vmul.f32 %v4545_v4, %v4700_v14 }
0x4a61   :  { %v2511_v15 = vadd.f32 %v2510_v57, %v4703_v22 }
0x4a63   :  { %2514 = vrot.lane.b32.xlu0 %v2511_v15, %s4596_s24  ;;  %v2512_v6 = vmul.f32 %v2511_v15, %v2447_v33 }
0x4ad5   :  { %v2515_v52 = vpop.permute.xlu0 %2514 }
0x4ad6   :  { %v2517_v19 = vmul.f32 %v2515_v52, %v2511_v15 }
0x4ad8   :  { %2519 = vrot.lane.b32.xlu1 %v2517_v19, %s4597_s25 }
0x4b4a   :  { %v2520_v48 = vpop.permute.xlu1 %2519 }
0x4b4b   :  { %v2522_v21 = vadd.f32 %v2520_v48, %v2512_v6  ;;  %v394_v6 = vadd.f32 %v5136_v35, %v5016_v8 }
0x4b4d   :  { %4546 = vtanh.f32 %v2522_v21 }
0x4b5a   :  { %v4547_v62 = vpop.eup %4546 }
0x4b5b   :  { %2525 = vrot.lane.b32.xlu0 %v4547_v62, %s4596_s24 }
0x4bcd   :  { %v2526_v10 = vpop.permute.xlu0 %2525 }
0x4bce   :  { %v5436_v55 = vmul.f32 %v2526_v10, %v2511_v15 }
0x4bd0   :  { %v2529_v5 = vpack.c.bf16 %v5436_v55, %v5436_v55 }
0x4bd2   :  { %2533 = vrot.lane.b32.xlu1 %v2529_v5, %s4597_s25 }
0x4c44   :  { %v2534_v28 = vpop.permute.xlu1 %2533 }
0x4c45   :  { %4315 = vmatmul.mubr.msk.bf16.vlgmr.msra.gmra.mxu0 %vm459_vm6, %v2534_v28 }
0x4c46   :  { %4327 = vmatpush3.bf16.msra.mxu0 %v5375_v58  ;;  %4330 = vmatprep.mubr.msk.bf16.mxu0 %vm4593_vm2, %v4592_v2 }
0x4c47   :  { %4328 = vmatprep.subr.bf16.mxu0 %v4592_v2 }
0x4c4a   :  { %4329 = vmatpush3.bf16.msra.mxu0 %v5384_v24 }
0x4d05   :  { %v2572_v3 = vpop.f32.mrf.mxu0 }
0x4d06   :  { %v2578_v33 = vadd.f32 %v2572_v3, %v389_v7 }
0x4d07   :  { %v4316_v63 = vpop.f32.mrf.mxu0 }
0x4d08   :  { %v2579_v50 = vmul.f32 %v2578_v33, %v4700_v14 }
0x4d09   :  { %v2575_v59 = vpop.f32.mrf.mxu0 }
0x4d0a   :  { %4548 = vtanh.f32 %v2579_v50 }
0x4d0b   :  { %v4317_v40 = vpop.f32.mrf.mxu0 }
0x4d17   :  { %v4549_v1 = vpop.eup %4548 }
0x4d18   :  { %v2581_v56 = vmul.f32 %v4549_v1, %v4700_v14 }
0x4d1a   :  { %v2582_v12 = vadd.f32 %v2581_v56, %v4703_v22 }
0x4d1c   :  { %2585 = vrot.lane.b32.xlu0 %v2582_v12, %s4596_s24  ;;  %v2583_v9 = vmul.f32 %v2582_v12, %v2522_v21 }
0x4d8e   :  { %v2586_v44 = vpop.permute.xlu0 %2585 }
0x4d8f   :  { %v2588_v60 = vmul.f32 %v2586_v44, %v2582_v12 }
0x4d91   :  { %2590 = vrot.lane.b32.xlu1 %v2588_v60, %s4597_s25 }
0x4e03   :  { %v2591_v39 = vpop.permute.xlu1 %2590 }
0x4e04   :  { %v2593_v47 = vadd.f32 %v2591_v39, %v2583_v9 }
0x4e06   :  { %4550 = vtanh.f32 %v2593_v47 }
0x4e13   :  { %v4551_v4 = vpop.eup %4550 }
0x4e14   :  { %2596 = vrot.lane.b32.xlu0 %v4551_v4, %s4596_s24 }
0x4e86   :  { %v2597_v57 = vpop.permute.xlu0 %2596 }
0x4e87   :  { %v5455_v15 = vmul.f32 %v2597_v57, %v2582_v12  ;;  %v4569_v12 = vld [vmem:[%s5829_s3] ss:$0 sm:$0xff]  ;;  %s4598_s3 = smov 96  }
0x4e88   :  { %v399_v44 = vadd.f32 %v4569_v12, %v5022_v13 }
0x4e89   :  { %v2600_v52 = vpack.c.bf16 %v5455_v15, %v5455_v15 }
0x4e8b   :  { %2608 = vrot.lane.b32.xlu1 %v2600_v52, %s4597_s25 }
0x4efd   :  { %v2609_v19 = vpop.permute.xlu1 %2608 }
0x4efe   :  { %4323 = vmatmul.mubr.msk.bf16.vlgmr.msra.gmra.mxu1 %vm459_vm6, %v2609_v19 }
0x4eff   :  { %4335 = vmatpush3.bf16.msra.mxu1 %v5375_v58  ;;  %4338 = vmatprep.mubr.msk.bf16.mxu1 %vm4593_vm2, %v4592_v2 }
0x4f00   :  { %4336 = vmatprep.subr.bf16.mxu1 %v4592_v2 }
0x4f03   :  { %4337 = vmatpush3.bf16.msra.mxu1 %v5384_v24 }
0x4fbe   :  { %v2647_v48 = vpop.f32.mrf.mxu1 }
0x4fbf   :  { %v2653_v21 = vadd.f32 %v2647_v48, %v394_v6 }
0x4fc0   :  { %v4324_v62 = vpop.f32.mrf.mxu1 }
0x4fc1   :  { %v2654_v10 = vmul.f32 %v2653_v21, %v4700_v14 }
0x4fc2   :  { %v2650_v5 = vpop.f32.mrf.mxu1 }
0x4fc3   :  { %4552 = vtanh.f32 %v2654_v10 }
0x4fc4   :  { %v4325_v28 = vpop.f32.mrf.mxu1 }
0x4fd0   :  { %v4553_v7 = vpop.eup %4552 }
0x4fd1   :  { %v2656_v58 = vmul.f32 %v4553_v7, %v4700_v14 }
0x4fd3   :  { %v2657_v3 = vadd.f32 %v2656_v58, %v4703_v22 }
0x4fd5   :  { %2660 = vrot.lane.b32.xlu0 %v2657_v3, %s4596_s24  ;;  %v2658_v8 = vmul.f32 %v2657_v3, %v2593_v47 }
0x5047   :  { %v2661_v33 = vpop.permute.xlu0 %2660 }
0x5048   :  { %v2663_v24 = vmul.f32 %v2661_v33, %v2657_v3  ;;  %v404_v33 = vadd.f32 %v4569_v12, %v5020_v11  ;;  %v4374_v11 = vld [vmem:[%s5830_s4 + $0x60] sm:$0xff]   ;;  %v4384_v12 = vld [vmem:[%s5830_s4 + $0x48] sm:$0xff]  }
0x504a   :  { %2665 = vrot.lane.b32.xlu1 %v2663_v24, %s4597_s25 }
0x50bc   :  { %v2666_v35 = vpop.permute.xlu1 %2665 }
0x50bd   :  { %v2668_v63 = vadd.f32 %v2666_v35, %v2658_v8 }
0x50bf   :  { %4554 = vtanh.f32 %v2668_v63 }
0x50cc   :  { %v4555_v50 = vpop.eup %4554 }
0x50cd   :  { %2671 = vrot.lane.b32.xlu0 %v4555_v50, %s4596_s24 }
0x513f   :  { %v2672_v59 = vpop.permute.xlu0 %2671 }
0x5140   :  { %v5474_v40 = vmul.f32 %v2672_v59, %v2657_v3 }
0x5142   :  { %v2675_v1 = vpack.c.bf16 %v5474_v40, %v5474_v40 }
0x5144   :  { %2683 = vrot.lane.b32.xlu1 %v2675_v1, %s4597_s25 }
0x51b6   :  { %v2684_v56 = vpop.permute.xlu1 %2683 }
0x51b7   :  { %4331 = vmatmul.mubr.msk.bf16.vlgmr.msra.gmra.mxu0 %vm459_vm6, %v2684_v56 }
0x5277   :  { %v2722_v60 = vpop.f32.mrf.mxu0 }
0x5278   :  { %v2728_v9 = vadd.f32 %v2722_v60, %v399_v44  ;;  %v4385_v60 = vld [vmem:[%s5830_s4 + $0xe8] sm:$0xff]  }
0x5279   :  { %v4332_v39 = vpop.f32.mrf.mxu0 }
0x527a   :  { %v2729_v47 = vmul.f32 %v2728_v9, %v4700_v14  ;;  %v4386_v39 = vld [vmem:[%s5830_s4 + $0x8] sm:$0xff]  }
0x527b   :  { %v2725_v4 = vpop.f32.mrf.mxu0 }
0x527c   :  { %4556 = vtanh.f32 %v2729_v47  ;;  %v4387_v47 = vld [vmem:[%s5830_s4 + $0xa8] sm:$0xff]  }
0x527d   :  { %v4333_v57 = vpop.f32.mrf.mxu0 }
0x527e   :  { %v4388_v57 = vld [vmem:[%s5830_s4 + $0x40] sm:$0xff]  }
0x5289   :  { %v4557_v52 = vpop.eup %4556 }
0x528a   :  { %v2731_v19 = vmul.f32 %v4557_v52, %v4700_v14  ;;  %v4389_v52 = vld [vmem:[%s5830_s4 + $0xe0] sm:$0xff]  }
0x528c   :  { %v2732_v6 = vadd.f32 %v2731_v19, %v4703_v22 }
0x528e   :  { %2735 = vrot.lane.b32.xlu0 %v2732_v6, %s4596_s24  ;;  %v2733_v13 = vmul.f32 %v2732_v6, %v2668_v63 }
0x5300   :  { %v2736_v48 = vpop.permute.xlu0 %2735 }
0x5301   :  { %v2738_v21 = vmul.f32 %v2736_v48, %v2732_v6  ;;  %v4391_v48 = vld [vmem:[%s5830_s4 + $0xa0] sm:$0xff]  }
0x5303   :  { %2740 = vrot.lane.b32.xlu1 %v2738_v21, %s4597_s25  ;;  %v4392_v21 = vld [vmem:[%s5830_s4 + $0xd8] sm:$0xff]  }
0x5375   :  { %v2741_v62 = vpop.permute.xlu1 %2740 }
0x5376   :  { %v5489_v10 = vadd.f32 %v2741_v62, %v2733_v13  ;;  %v4393_v13 = vld [vmem:[%s5830_s4 + $0x178] sm:$0xff]  }
0x5378   :  { %4558 = vtanh.f32 %v5489_v10 }
0x5385   :  { %v4559_v5 = vpop.eup %4558 }
0x5386   :  { %2746 = vrot.lane.b32.xlu0 %v4559_v5, %s4596_s24  ;;  %v4394_v5 = vld [vmem:[%s5830_s4 + $0x98] sm:$0xff]  }
0x53f8   :  { %v2747_v28 = vpop.permute.xlu0 %2746 }
0x53f9   :  { %v5493_v7 = vmul.f32 %v2747_v28, %v2732_v6  ;;  %v4390_v6 = vld [vmem:[%s5830_s4] sm:$0xff]   ;;  %v4396_v28 = vld [vmem:[%s5830_s4 + $0xd0] sm:$0xff]  }
0x53fb   :  { %v2750_v58 = vpack.c.bf16 %v5493_v7, %v5493_v7 }
0x53fd   :  { %2758 = vrot.lane.b32.xlu1 %v2750_v58, %s4597_s25  ;;  %v4398_v58 = vld [vmem:[%s5830_s4 + $0x90] sm:$0xff]  }
0x546f   :  { %v2759_v3 = vpop.permute.xlu1 %2758 }
0x5470   :  { %4339 = vmatmul.mubr.msk.bf16.vlgmr.msra.gmra.mxu1 %vm459_vm6, %v2759_v3 }
0x5530   :  { %v2797_v24 = vpop.f32.mrf.mxu1 }
0x5531   :  { %v2803_v8 = vadd.f32 %v2797_v24, %v404_v33  ;;  %v4402_v33 = vld [vmem:[%s5830_s4 + $0x88] sm:$0xff]  }
0x5532   :  { %v4340_v35 = vpop.f32.mrf.mxu1 }
0x5533   :  { %v2804_v63 = vmul.f32 %v2803_v8, %v4700_v14  ;;  %v4406_v8 = vld [vmem:[%s5830_s4 + $0x80] sm:$0xff]  }
0x5534   :  { %v2800_v50 = vpop.f32.mrf.mxu1 }
0x5535   :  { %4560 = vtanh.f32 %v2804_v63 }
0x5536   :  { %v4341_v59 = vpop.f32.mrf.mxu1 }
0x5542   :  { %v4561_v1 = vpop.eup %4560 }
0x5543   :  { %v2806_v56 = vmul.f32 %v4561_v1, %v4700_v14  ;;  %v4368_v14 = vld [vmem:[%s5830_s4 + $0x78] sm:$0xff]  }
0x5544   :  { %3942 = vmatprep.subr.bf16.mxu0 %v4368_v14 }
0x5545   :  { %v5503_v44 = vadd.f32 %v2806_v56, %v4703_v22  ;;  %v4369_v22 = vld [vmem:[%s5830_s4 + $0x38] sm:$0xff]  }
0x5546   :  { %3943 = vmatpush3.bf16.msra.mxu0 %v4369_v22 }
0x5547   :  { %2810 = vrot.lane.b32.xlu0 %v5503_v44, %s4596_s24 }
0x554b   :  { %826 = vrot.lane.b32.xlu0 %v4802_v0, %s4597_s25  ;;  %v4371_v0 = vld [vmem:[%s5830_s4 + $0x30] sm:$0xff]  }
0x554f   :  { %901 = vrot.lane.b32.xlu0 %v4829_v29, %s4596_s24  ;;  %v4372_v29 = vld [vmem:[%s5830_s4 + $0x68] sm:$0xff]  }
0x5553   :  { %976 = vrot.lane.b32.xlu0 %v4848_v53, %s4598_s3  ;;  %v4373_v53 = vld [vmem:[%s5830_s4 + $0x28] sm:$0xff]  }
0x5557   :  { %678 = vrot.lane.b32.xlu0 %v4756_v17, %s4598_s3  ;;  %v4370_v17 = vld [vmem:[%s5830_s4 + $0x70] sm:$0xff]  }
0x5558   :  { %3944 = vmatprep.subr.bf16.mxu0 %v4370_v17  ;;  %v4397_v17 = vld [vmem:[%s5830_s4 + $0x170] sm:$0xff]  }
0x5559   :  { %3945 = vmatpush3.bf16.msra.mxu0 %v4371_v0 }
0x555a   :  { %3946 = vmatprep.subr.bf16.mxu0 %v4372_v29 }
0x555b   :  { %1493 = vrot.lane.b32.xlu0 %v5146_v23, %s4596_s24  ;;  %v4375_v23 = vld [vmem:[%s5830_s4 + $0x20] sm:$0xff]  }
0x555d   :  { %3947 = vmatpush3.bf16.msra.mxu0 %v4373_v53 }
0x555e   :  { %3948 = vmatprep.subr.bf16.mxu0 %v4374_v11  ;;  %v4401_v11 = vld [vmem:[%s5830_s4 + $0x168] sm:$0xff]  }
0x555f   :  { %1568 = vrot.lane.b32.xlu0 %v5166_v49, %s4598_s3  ;;  %v4376_v49 = vld [vmem:[%s5830_s4 + $0x58] sm:$0xff]  }
0x5561   :  { %3949 = vmatpush3.bf16.msra.mxu0 %v4375_v23 }
0x5562   :  { %3950 = vmatprep.subr.bf16.mxu0 %v4376_v49 }
0x5563   :  { %2010 = vrot.lane.b32.xlu0 %v5286_v25, %s4597_s25  ;;  %v4378_v25 = vld [vmem:[%s5830_s4 + $0x18] sm:$0xff]  }
0x5565   :  { %3951 = vmatpush3.bf16.msra.mxu0 %v4378_v25  ;;  %v4405_v25 = vld [vmem:[%s5830_s4 + $0x160] sm:$0xff]  }
0x5567   :  { %2085 = vrot.lane.b32.xlu0 %v5306_v16, %s4596_s24  ;;  %v4379_v16 = vld [vmem:[%s5830_s4 + $0xb8] sm:$0xff]  }
0x556b   :  { %2160 = vrot.lane.b32.xlu0 %v5326_v42, %s4598_s3  ;;  %v4380_v42 = vld [vmem:[%s5830_s4 + $0x50] sm:$0xff]  }
0x556c   :  { %3952 = vmatprep.subr.bf16.mxu0 %v4380_v42 }
0x556f   :  { %1864 = vrot.lane.b32.xlu0 %v5246_v46, %s4598_s3  ;;  %v4377_v46 = vld [vmem:[%s5830_s4 + $0xf8] sm:$0xff]  }
0x5570   :  { %3964 = vmatprep.subr.bf16.mxu1 %v4377_v46 }
0x5571   :  { %3965 = vmatpush3.bf16.msra.mxu1 %v4379_v16 }
0x5573   :  { %2677 = vrot.lane.b32.xlu0 %v5474_v40, %s4596_s24  ;;  %v4383_v40 = vld [vmem:[%s5830_s4 + $0xb0] sm:$0xff]  }
0x5577   :  { %2381 = vrot.lane.b32.xlu0 %v5396_v51, %s4596_s24  ;;  %v4381_v51 = vld [vmem:[%s5830_s4 + $0xf0] sm:$0xff]  }
0x5578   :  { %3966 = vmatprep.subr.bf16.mxu1 %v4381_v51  ;;  %v4408_v51 = vld [vmem:[%s5830_s4 + $0x158] sm:$0xff]  }
0x5579   :  { %3967 = vmatpush3.bf16.msra.mxu1 %v4383_v40 }
0x557a   :  { %3968 = vmatprep.subr.bf16.mxu1 %v4385_v60 }
0x557b   :  { %2456 = vrot.lane.b32.xlu0 %v5416_v37, %s4598_s3  ;;  %v4382_v37 = vld [vmem:[%s5830_s4 + $0x10] sm:$0xff]  }
0x557c   :  { %3953 = vmatpush3.bf16.msra.mxu0 %v4382_v37 }
0x557d   :  { %3954 = vmatprep.subr.bf16.mxu0 %v4384_v12  ;;  %3969 = vmatpush3.bf16.msra.mxu1 %v4387_v47  ;;  %v4417_v12 = vld [vmem:[%s5830_s4 + $0x1b8] sm:$0xff]   ;;  %v4410_v47 = vld [vmem:[%s5830_s4 + $0x150] sm:$0xff]  }
0x557e   :  { %3970 = vmatprep.subr.bf16.mxu1 %v4389_v52  ;;  %v4419_v52 = vld [vmem:[%s5830_s4 + $0x1b0] sm:$0xff]  }
0x5580   :  { %3955 = vmatpush3.bf16.msra.mxu0 %v4386_v39  ;;  %v4418_v39 = vld [vmem:[%s5830_s4 + $0x1f0] sm:$0xff]  }
0x5581   :  { %3956 = vmatprep.subr.bf16.mxu0 %v4388_v57  ;;  %3971 = vmatpush3.bf16.msra.mxu1 %v4391_v48 }
0x5582   :  { %3972 = vmatprep.subr.bf16.mxu1 %v4392_v21  ;;  %v4421_v21 = vld [vmem:[%s5830_s4 + $0x1a8] sm:$0xff]  }
0x5584   :  { %3957 = vmatpush3.bf16.msra.mxu0 %v4390_v6  ;;  %v4412_v6 = vld [vmem:[%s5830_s4 + $0x148] sm:$0xff]  }
0x5585   :  { %3986 = vmatprep.subr.bf16.mxu0 %v4393_v13  ;;  %3973 = vmatpush3.bf16.msra.mxu1 %v4394_v5  ;;  %v4422_v5 = vld [vmem:[%s5830_s4 + $0x1e0] sm:$0xff]  }
0x5586   :  { %3974 = vmatprep.subr.bf16.mxu1 %v4396_v28  ;;  %v4414_v28 = vld [vmem:[%s5830_s4 + $0x140] sm:$0xff]  }
0x5589   :  { %3975 = vmatpush3.bf16.msra.mxu1 %v4398_v58  ;;  %v4415_v58 = vld [vmem:[%s5830_s4 + $0x100] sm:$0xff]  }
0x55b9   :  { %v2811_v9 = vpop.permute.xlu0 %2810 }
0x55ba   :  { %v2813_v4 = vmul.f32 %v2811_v9, %v5503_v44  ;;  %v4409_v9 = vld [vmem:[%s5830_s4 + $0x118] sm:$0xff]  }
0x55bc   :  { %2815 = vrot.lane.b32.xlu1 %v2813_v4, %s4597_s25 }
0x55bd   :  { %v827_v19 = vpop.permute.xlu0 %826 }
0x55be   :  { %829 = vst.msk [vmem:[#allocation3 + $0x8] sm:$0xff] %vm459_vm6, %v827_v19  ;;  %v4420_v19 = vld [vmem:[%s5830_s4 + $0x1e8] sm:$0xff]  }
0x55c0   :  { %527 = vrot.lane.b32.xlu1 %v4710_v32, %s4597_s25 }
0x55c1   :  { %v902_v62 = vpop.permute.xlu0 %901 }
0x55c2   :  { %904 = vst.msk [vmem:[#allocation3 + $0x8] sm:$0xff] %vm605_vm7, %v902_v62  ;;  %v4413_v62 = vld [vmem:[%s5830_s4 + $0x108] sm:$0xff]  }
0x55c4   :  { %602 = vrot.lane.b32.xlu1 %v4737_v54, %s4596_s24  ;;  %v4400_v54 = vld [vmem:[%s5830_s4 + $0xc8] sm:$0xff]  }
0x55c5   :  { %v977_v32 = vpop.permute.xlu0 %976  ;;  %3976 = vmatprep.subr.bf16.mxu1 %v4400_v54  ;;  %v4424_v54 = vld [vmem:[%s5830_s4 + $0x1d8] sm:$0xff]  }
0x55c6   :  { %979 = vst.msk [vmem:[#allocation3 + $0x8] sm:$0xff] %vm681_vm8, %v977_v32  ;;  %3977 = vmatpush3.bf16.msra.mxu1 %v4402_v33  ;;  %v4423_v32 = vld [vmem:[%s5830_s4 + $0x1a0] sm:$0xff]   ;;  %v4426_v33 = vld [vmem:[%s5830_s4 + $0x1d0] sm:$0xff]  }
0x55c7   :  { %1050 = vst.msk [vmem:[#allocation3 + $0x8] sm:$0xff] %vm753_vm9, %v4968_v45  ;;  %v4404_v45 = vld [vmem:[%s5830_s4 + $0xc0] sm:$0xff]  }
0x55c8   :  { %1418 = vrot.lane.b32.xlu1 %v5121_v31, %s4597_s25  ;;  %3978 = vmatprep.subr.bf16.mxu1 %v4404_v45 }
0x55c9   :  { %v679_v3 = vpop.permute.xlu0 %678 }
0x55ca   :  { %3979 = vmatpush3.bf16.msra.mxu1 %v4406_v8  ;;  %v4429_v8 = vld [vmem:[%s5830_s4 + $0x188] sm:$0xff]  }
0x55cc   :  { %1122 = vrot.lane.b32.xlu1 %v5032_v36, %s4597_s25 }
0x55cd   :  { %v1494_v31 = vpop.permute.xlu0 %1493 }
0x55ce   :  { %v2827_v24 = vld [vmem:[#allocation3 + $0x8] sm:$0xff] }
0x55cf   :  { %v2835_v35 = vpack.c.bf16 %v2827_v24, %v2827_v24  ;;  %v4428_v24 = vld [vmem:[%s5830_s4 + $0x1c8] sm:$0xff]  }
0x55d0   :  { %1197 = vrot.lane.b32.xlu1 %v5061_v26, %s4596_s24  ;;  %v4416_v26 = vld [vmem:[%s5830_s4 + $0x1f8] sm:$0xff]  }
0x55d1   :  { %3393 = vmatprep.mubr.bf16.mxu0 %v2835_v35  ;;  %v1569_v63 = vpop.permute.xlu0 %1568  ;;  %4008 = vmatprep.subr.bf16.mxu1 %v4416_v26  ;;  %v4430_v35 = vld [vmem:[%s5830_s4 + $0x1c0] sm:$0xff]  }
0x55d4   :  { %1272 = vrot.lane.b32.xlu1 %v5081_v18, %s4598_s3  ;;  %v2808_v18 = vmul.f32 %v5503_v44, %v5489_v10 }
0x55d5   :  { %v2011_v36 = vpop.permute.xlu0 %2010 }
0x55d6   :  { %2013 = vst.msk [vmem:[#allocation3 + $0x28] sm:$0xff] %vm459_vm6, %v2011_v36 }
0x55d8   :  { %1714 = vrot.lane.b32.xlu1 %v5206_v27, %s4597_s25 }
0x55d9   :  { %v2086_v50 = vpop.permute.xlu0 %2085 }
0x55da   :  { %2088 = vst.msk [vmem:[#allocation3 + $0x28] sm:$0xff] %vm605_vm7, %v2086_v50 }
0x55dc   :  { %1789 = vrot.lane.b32.xlu1 %v5226_v20, %s4596_s24 }
0x55dd   :  { %v2161_v59 = vpop.permute.xlu0 %2160 }
0x55de   :  { %2163 = vst.msk [vmem:[#allocation3 + $0x28] sm:$0xff] %vm681_vm8, %v2161_v59 }
0x55df   :  { %2234 = vst.msk [vmem:[#allocation3 + $0x28] sm:$0xff] %vm753_vm9, %v5346_v30 }
0x55e0   :  { %2602 = vrot.lane.b32.xlu1 %v5455_v15, %s4597_s25 }
0x55e1   :  { %v1865_v23 = vpop.permute.xlu0 %1864 }
0x55e4   :  { %2306 = vrot.lane.b32.xlu1 %v5366_v61, %s4597_s25 }
0x55e5   :  { %v2678_v42 = vpop.permute.xlu0 %2677 }
0x55e6   :  { %v2831_v56 = vld [vmem:[#allocation3 + $0x28] sm:$0xff] }
0x55e7   :  { %v2839_v29 = vpack.c.bf16 %v2831_v56, %v2831_v56  ;;  %v4433_v56 = vld [vmem:[%s5832_s6] sm:$0xff]  }
0x55e9   :  { %v2382_v4 = vpop.permute.xlu0 %2381 }
0x55ed   :  { %v2457_v13 = vpop.permute.xlu0 %2456 }
0x562e   :  { %v2816_v27 = vpop.permute.xlu1 %2815 }
0x562f   :  { %v2818_v20 = vadd.f32 %v2816_v27, %v2808_v18 }
0x5631   :  { %4562 = vtanh.f32 %v2818_v20 }
0x5632   :  { %v528_v1 = vpop.permute.xlu1 %527 }
0x5633   :  { %530 = vst.msk [vmem:[#allocation3] sm:$0xff] %vm459_vm6, %v528_v1 }
0x5636   :  { %v603_v30 = vpop.permute.xlu1 %602 }
0x5637   :  { %606 = vst.msk [vmem:[#allocation3] sm:$0xff] %vm605_vm7, %v603_v30 }
0x5638   :  { %682 = vst.msk [vmem:[#allocation3] sm:$0xff] %vm681_vm8, %v679_v3 }
0x5639   :  { %754 = vst.msk [vmem:[#allocation3] sm:$0xff] %vm753_vm9, %v4783_v41  ;;  %v4395_v41 = vld [vmem:[%s5830_s4 + $0x138] sm:$0xff]  }
0x563a   :  { %v1419_v15 = vpop.permute.xlu1 %1418 }
0x563b   :  { %1421 = vst.msk [vmem:[#allocation3 + $0x18] sm:$0xff] %vm459_vm6, %v1419_v15 }
0x563c   :  { %1496 = vst.msk [vmem:[#allocation3 + $0x18] sm:$0xff] %vm605_vm7, %v1494_v31  ;;  %v4427_v31 = vld [vmem:[%s5830_s4 + $0x190] sm:$0xff]  }
0x563d   :  { %1571 = vst.msk [vmem:[#allocation3 + $0x18] sm:$0xff] %vm681_vm8, %v1569_v63  ;;  %v4431_v63 = vld [vmem:[%s5830_s4 + $0x180] sm:$0xff]  }
0x563e   :  { %v4563_v61 = vpop.eup %4562  ;;  %1642 = vst.msk [vmem:[#allocation3 + $0x18] sm:$0xff] %vm753_vm9, %v5186_v38  ;;  %v1123_v10 = vpop.permute.xlu1 %1122  ;;  %v4399_v38 = vld [vmem:[%s5830_s4 + $0x130] sm:$0xff]  }
0x563f   :  { %1125 = vst.msk [vmem:[#allocation3 + $0x10] sm:$0xff] %vm459_vm6, %v1123_v10  ;;  %2821 = vrot.lane.b32.xlu1 %v4563_v61, %s4596_s24 }
0x5640   :  { %v2826_v14 = vld [vmem:[#allocation3] sm:$0xff] }
0x5641   :  { %v2834_v22 = vpack.c.bf16 %v2826_v14, %v2826_v14  ;;  %v4434_v14 = vld [vmem:[%s5834_s8 + $0x8] sm:$0xff]  }
0x5642   :  { %v1198_v0 = vpop.permute.xlu1 %1197 }
0x5643   :  { %1200 = vst.msk [vmem:[#allocation3 + $0x10] sm:$0xff] %vm605_vm7, %v1198_v0  ;;  %3394 = vmatmul.mubr.bf16.vlgmr.msra.gmra.mxu0 %v2834_v22  ;;  %2752 = vrot.lane.b32.xlu1 %v5493_v7, %s4598_s3  ;;  %v4403_v7 = vld [vmem:[%s5830_s4 + $0x128] sm:$0xff]  }
0x5644   :  { %3987 = vmatpush3.bf16.msra.mxu0 %v4395_v41  ;;  %3473 = vmatprep.mubr.bf16.mxu0 %v2839_v29  ;;  %v3740_v41 = vld [vmem:[%s5831_s5] ss:$0 sm:$0xff] }
0x5645   :  { %3988 = vmatprep.subr.bf16.mxu0 %v4397_v17  ;;  %v2829_v53 = vld [vmem:[#allocation3 + $0x18] sm:$0xff] }
0x5646   :  { %v1273_v49 = vpop.permute.xlu1 %1272  ;;  %v2837_v46 = vpack.c.bf16 %v2829_v53, %v2829_v53 }
0x5647   :  { %1275 = vst.msk [vmem:[#allocation3 + $0x10] sm:$0xff] %vm681_vm8, %v1273_v49 }
0x5648   :  { %1346 = vst.msk [vmem:[#allocation3 + $0x10] sm:$0xff] %vm753_vm9, %v5101_v43  ;;  %3989 = vmatpush3.bf16.msra.mxu0 %v4399_v38  ;;  %3433 = vmatprep.mubr.bf16.mxu1 %v2837_v46  ;;  %v4407_v43 = vld [vmem:[%s5830_s4 + $0x120] sm:$0xff]  }
0x5649   :  { %3990 = vmatprep.subr.bf16.mxu0 %v4401_v11 }
0x564a   :  { %v1715_v16 = vpop.permute.xlu1 %1714 }
0x564b   :  { %1717 = vst.msk [vmem:[#allocation3 + $0x20] sm:$0xff] %vm459_vm6, %v1715_v16 }
0x564c   :  { %3991 = vmatpush3.bf16.msra.mxu0 %v4403_v7 }
0x564d   :  { %3992 = vmatprep.subr.bf16.mxu0 %v4405_v25 }
0x564e   :  { %v1790_v37 = vpop.permute.xlu1 %1789 }
0x564f   :  { %1792 = vst.msk [vmem:[#allocation3 + $0x20] sm:$0xff] %vm605_vm7, %v1790_v37  ;;  %v2828_v40 = vld [vmem:[#allocation3 + $0x10] sm:$0xff] }
0x5650   :  { %1867 = vst.msk [vmem:[#allocation3 + $0x20] sm:$0xff] %vm681_vm8, %v1865_v23  ;;  %3993 = vmatpush3.bf16.msra.mxu0 %v4407_v43  ;;  %v2836_v60 = vpack.c.bf16 %v2828_v40, %v2828_v40 }
0x5651   :  { %1938 = vst.msk [vmem:[#allocation3 + $0x20] sm:$0xff] %vm753_vm9, %v5266_v34  ;;  %3994 = vmatprep.subr.bf16.mxu0 %v4408_v51  ;;  %v4411_v34 = vld [vmem:[%s5830_s4 + $0x110] sm:$0xff]  }
0x5652   :  { %v2603_v57 = vpop.permute.xlu1 %2602  ;;  %3434 = vmatmul.mubr.bf16.vlgmr.msra.gmra.mxu1 %v2836_v60 }
0x5653   :  { %2605 = vst.msk [vmem:[#allocation3 + $0x38] sm:$0xff] %vm459_vm6, %v2603_v57  ;;  %4009 = vmatpush3.bf16.msra.mxu1 %v4417_v12 }
0x5654   :  { %2680 = vst.msk [vmem:[#allocation3 + $0x38] sm:$0xff] %vm605_vm7, %v2678_v42  ;;  %3995 = vmatpush3.bf16.msra.mxu0 %v4409_v9  ;;  %4010 = vmatprep.subr.bf16.mxu1 %v4418_v39  ;;  %v4435_v9 = vld [vmem:[%s5834_s8] sm:$0xff]   ;;  %s3665_s8 = sshll.u32 %s4599_s22, 4  ;;  %s3666_s8 = int_to_ptr.vmem [resolvable:$true] %s3665_s8 }
0x5655   :  { %3996 = vmatprep.subr.bf16.mxu0 %v4410_v47  ;;  %v3805_v39 = vld [vmem:[%s5833_s7] ss:$0 sm:$0xff]  ;;  %s4570_s7 = scalar_lea.vmem %s3666_s8, 32  ;;  %p4575_p1 = scmp.lt.s32.totalorder %s3666_s8, %s3666_s8 }
0x5656   :  { %v2307_v48 = vpop.permute.xlu1 %2306  ;;  %p4571_p0 = scmp.ne.s32.totalorder %s3666_s8, %s4570_s7  ;;  %p4576_p2 = scmp.lt.s32.totalorder %s4570_s7, %s4570_s7 }
0x5657   :  { %2309 = vst.msk [vmem:[#allocation3 + $0x30] sm:$0xff] %vm459_vm6, %v2307_v48  ;;  %4011 = vmatpush3.bf16.msra.mxu1 %v4419_v52  ;;  %v3809_v48 = vld [vmem:[%s5835_s9] ss:$0 sm:$0xff] }
0x5658   :  { %2384 = vst.msk [vmem:[#allocation3 + $0x30] sm:$0xff] %vm605_vm7, %v2382_v4  ;;  %3997 = vmatpush3.bf16.msra.mxu0 %v4411_v34  ;;  %4012 = vmatprep.subr.bf16.mxu1 %v4420_v19  ;;  %v2830_v3 = vld [vmem:[#allocation3 + $0x20] sm:$0xff]  ;;  %p4577_p3 = por %p4576_p2, %p4575_p1 }
0x5659   :  { %2459 = vst.msk [vmem:[#allocation3 + $0x30] sm:$0xff] %vm681_vm8, %v2457_v13  ;;  %3998 = vmatprep.subr.bf16.mxu0 %v4412_v6  ;;  %v2838_v45 = vpack.c.bf16 %v2830_v3, %v2830_v3 }
0x565a   :  { %2530 = vst.msk [vmem:[#allocation3 + $0x30] sm:$0xff] %vm753_vm9, %v5436_v55  ;;  %v4425_v55 = vld [vmem:[%s5830_s4 + $0x198] sm:$0xff]   ;;  %p4578_p4 = pnand %p4577_p3, %p4571_p0 }
0x565b   :  { %4013 = vmatpush3.bf16.msra.mxu1 %v4421_v21 }
0x565c   :  { %3999 = vmatpush3.bf16.msra.mxu0 %v4413_v62  ;;  %4014 = vmatprep.subr.bf16.mxu1 %v4422_v5 }
0x565d   :  { %4000 = vmatprep.subr.bf16.mxu0 %v4414_v28 }
0x565f   :  { %4015 = vmatpush3.bf16.msra.mxu1 %v4423_v32 }
0x5660   :  { %4001 = vmatpush3.bf16.msra.mxu0 %v4415_v58  ;;  %4016 = vmatprep.subr.bf16.mxu1 %v4424_v54 }
0x5661   :  { %4342 = vmatprep.subr.bf16.mxu0 %v4592_v2  ;;  %v2832_v26 = vld [vmem:[#allocation3 + $0x30] sm:$0xff] }
0x5662   :  { %v2840_v20 = vpack.c.bf16 %v2832_v26, %v2832_v26 }
0x5663   :  { %3474 = vmatmul.mubr.bf16.vlgmr.msra.gmra.mxu0 %v2838_v45  ;;  %4017 = vmatpush3.bf16.msra.mxu1 %v4425_v55 }
0x5664   :  { %4018 = vmatprep.subr.bf16.mxu1 %v4426_v33  ;;  %4346 = vmatprep.mubr.msk.bf16.mxu0 %vm4593_vm2, %v4592_v2 }
0x5667   :  { %4019 = vmatpush3.bf16.msra.mxu1 %v4427_v31 }
0x5668   :  { %4020 = vmatprep.subr.bf16.mxu1 %v4428_v24 }
0x566b   :  { %4021 = vmatpush3.bf16.msra.mxu1 %v4429_v8 }
0x566c   :  { %4022 = vmatprep.subr.bf16.mxu1 %v4430_v35 }
0x566f   :  { %4023 = vmatpush3.bf16.msra.mxu1 %v4431_v63 }
0x5670   :  { %4350 = vmatprep.subr.bf16.mxu1 %v4592_v2 }
0x56b1   :  { %v2822_v36 = vpop.permute.xlu1 %2821 }
0x56b2   :  { %v2824_v50 = vmul.f32 %v2822_v36, %v5503_v44  ;;  %v4432_v44 = vld [vmem:[%s5832_s6 + $0x8] sm:$0xff]  }
0x56b3   :  { %4343 = vmatpush3.bf16.msra.mxu0 %v4432_v44 }
0x56b4   :  { %4344 = vmatprep.subr.bf16.mxu0 %v4592_v2 }
0x56b5   :  { %v2753_v59 = vpop.permute.xlu1 %2752 }
0x56b6   :  { %2755 = vst.msk [vmem:[#allocation3 + $0x38] sm:$0xff] %vm681_vm8, %v2753_v59 }
0x56b7   :  { %2825 = vst.msk [vmem:[#allocation3 + $0x38] sm:$0xff] %vm753_vm9, %v2824_v50  ;;  %4345 = vmatpush3.bf16.msra.mxu0 %v4433_v56 }
0x56be   :  { %v2833_v18 = vld [vmem:[#allocation3 + $0x38] sm:$0xff] }
0x56bf   :  { %v2841_v27 = vpack.c.bf16 %v2833_v18, %v2833_v18 }
0x56c1   :  { %3513 = vmatprep.mubr.bf16.mxu1 %v2841_v27 }
0x56c2   :  { %3514 = vmatmul.mubr.bf16.vlgmr.msra.gmra.mxu1 %v2840_v20 }
0x56c3   :  { %4354 = vmatprep.mubr.msk.bf16.mxu1 %vm4593_vm2, %v4592_v2  ;;  %4351 = vmatpush3.bf16.msra.mxu1 %v4434_v14 }
0x56c4   :  { %4352 = vmatprep.subr.bf16.mxu1 %v4592_v2 }
0x56c7   :  { %4353 = vmatpush3.bf16.msra.mxu1 %v4435_v9 }
0x5703   :  { %v3958_v1 = vpop.f32.mrf.mxu0 }
0x5705   :  { %v3959_v30 = vpop.f32.mrf.mxu0 }
0x5706   :  { %v3960_v15 = vadd.f32 %v3959_v30, %v3958_v1 }
0x5707   :  { %v3961_v61 = vpop.f32.mrf.mxu0 }
0x5708   :  { %v3396_v0 = vadd.f32 %v3960_v15, %v3740_v41 }
0x5709   :  { %v3962_v10 = vpop.f32.mrf.mxu0 }
0x5712   :  { %v3980_v22 = vpop.f32.mrf.mxu1 }
0x5714   :  { %v3981_v17 = vpop.f32.mrf.mxu1 }
0x5715   :  { %v3982_v29 = vadd.f32 %v3981_v17, %v3980_v22 }
0x5716   :  { %v3983_v38 = vpop.f32.mrf.mxu1 }
0x5717   :  { %v3436_v53 = vadd.f32 %v3982_v29, %v3396_v0 }
0x5718   :  { %v3984_v11 = vpop.f32.mrf.mxu1 }
0x5723   :  { %v4002_v23 = vpop.f32.mrf.mxu0 }
0x5725   :  { %v4003_v49 = vpop.f32.mrf.mxu0 }
0x5726   :  { %v4004_v46 = vadd.f32 %v4003_v49, %v4002_v23 }
0x5727   :  { %v4005_v7 = vpop.f32.mrf.mxu0 }
0x5728   :  { %v3476_v25 = vadd.f32 %v4004_v46, %v3436_v53 }
0x5729   :  { %v4006_v16 = vpop.f32.mrf.mxu0 }
0x5782   :  { %v4024_v42 = vpop.f32.mrf.mxu1 }
0x5784   :  { %v4025_v43 = vpop.f32.mrf.mxu1 }
0x5785   :  { %v4026_v2 = vadd.f32 %v4025_v43, %v4024_v42 }
0x5786   :  { %v4027_v51 = vpop.f32.mrf.mxu1 }
0x5787   :  { %v3516_v37 = vadd.f32 %v4026_v2, %v3476_v25 }
0x5788   :  { %v4028_v40 = vpop.f32.mrf.mxu1 }
0x5789   :  { %v3521_v12 = vmax.f32 %v3516_v37, 0.0 }
0x578b   :  { %v3522_v60 = vpack.c.bf16 %v3521_v12, %v3521_v12 }
0x578d   :  { %4347 = vmatmul.mubr.msk.bf16.vlgmr.msra.gmra.mxu0 %vm459_vm6, %v3522_v60 }
0x584d   :  { %v3583_v47 = vpop.f32.mrf.mxu0 }
0x584e   :  { %v3584_v4 = vadd.f32 %v3805_v39, %v3583_v47 }
0x584f   :  { %v4348_v57 = vpop.f32.mrf.mxu0 }
0x5850   :  { %v3589_v52 = vmax.f32 %v3584_v4, 0.0 }
0x5851   :  { %v3586_v34 = vpop.f32.mrf.mxu0 }
0x5852   :  { %v3590_v19 = vpack.c.bf16 %v3589_v52, %v3589_v52 }
0x5853   :  { %v4349_v6 = vpop.f32.mrf.mxu0 }
0x5854   :  { %4355 = vmatmul.mubr.msk.bf16.vlgmr.msra.gmra.mxu1 %vm459_vm6, %v3590_v19 }
0x5914   :  { %v3651_v21 = vpop.f32.mrf.mxu1 }
0x5915   :  { %v3652_v13 = vadd.f32 %v3809_v48, %v3651_v21 }
0x5916   :  { %v4356_v62 = vpop.f32.mrf.mxu1 }
0x5917   :  { %3658 = vst.msk [vmem:[#allocation4] sm:$0x3] %vm3657_vm10, %v3652_v13 }
0x5918   :  { %v3654_v5 = vpop.f32.mrf.mxu1 }
0x5919   :  { %4581 = shalt.err (!%p4578_p4)
}
0x591a   :  { %3668 = dma.vmem_to_hbm [thread:$0]  %s3666_s8, 32, %s5836_s10, [#allocation5]   ;;  %v4357_v28 = vpop.f32.mrf.mxu1 }
0x591b   :  { %4590 = dma.done.wait [#allocation5], 32  }
0x591c   :  { %4591 = vsyncadd [#allocation5], 4294967264 }
0x591d   :  { %3672 = vsyncpa [#allocation5], 1 }

</bundles_post_ra>
